<compile_context>
chip_gen: v7x
topology: tpu7x:2x2x1
jax: 0.10.0
libtpu: 0.0.40
codegen_flags: <defaults>
</compile_context>

<pallas_src>
import functools

import numpy as np
import jax
import jax.numpy as jnp
from jax.experimental import pallas as pl
from jax.experimental.pallas import tpu as pltpu


# (cin, cout, k, s, p) for the six Conv2d layers of Encoder (static config).
CONV_CFG = [
    (1, 4, 4, 2, 1), (4, 8, 4, 2, 1), (8, 16, 4, 2, 1),
    (16, 32, 4, 2, 1), (32, 64, 4, 2, 1), (64, 128, 2, 2, 0),
]
MAX_TM = (2048, 1024, 256)   # lane-tile per conv GEMM launch (grid = 4, 2, 2)
H_LSTM = 64                  # true hidden size (nn.LSTM(hidden_size=64))
HP_LSTM = 128                # padded per-gate width (lane-aligned)
NEG_SLOPE = 0.01             # nn.LeakyReLU default


# ----------------------------------------------------------------------------
# Kernel 1: transposed conv GEMM   y(Cout, tm) = LeakyReLU(W @ cols + b)
# ----------------------------------------------------------------------------
def tconv_leaky_kernel(x_ref, w_ref, b_ref, o_ref):
    # bf16 operands, f32 accumulate; elementwise stays f32; bf16 store.
    y = jnp.dot(w_ref[...], x_ref[...],
                preferred_element_type=jnp.float32) + b_ref[...]
    o_ref[...] = jnp.where(y >= 0, y, NEG_SLOPE * y).astype(o_ref.dtype)


def _pick_tm(m, max_tm):
    """Largest 128-multiple divisor of m that is <= max_tm (full m if m small)."""
    if m <= max_tm:
        return m
    t = (max_tm // 128) * 128
    while t >= 128:
        if m % t == 0:
            return t
        t -= 128
    return m


def tconv_gemm_leaky(cols_t, w_t, b, max_tm):
    """cols_t:(K, M) bf16, w_t:(Cout, K) bf16, b:(Cout,1) f32 -> (Cout, M) bf16."""
    K, M = cols_t.shape
    Cout = w_t.shape[0]
    tm = _pick_tm(M, max_tm)
    return pl.pallas_call(
        tconv_leaky_kernel,
        out_shape=jax.ShapeDtypeStruct((Cout, M), jnp.bfloat16),
        grid=(M // tm,),
        in_specs=[
            pl.BlockSpec((K, tm), lambda i: (0, i)),
            pl.BlockSpec((Cout, K), lambda i: (0, 0)),
            pl.BlockSpec((Cout, 1), lambda i: (0, 0)),
        ],
        out_specs=pl.BlockSpec((Cout, tm), lambda i: (0, i)),
        compiler_params=pltpu.CompilerParams(
            dimension_semantics=("parallel",),
            vmem_limit_bytes=32 * 1024 * 1024,
        ),
    )(cols_t, w_t, b)


# ----------------------------------------------------------------------------
# Kernel 2: fused conv4 + conv5 + conv6 + fc1 + MLP64 + LSTM (proj + recurrence)
# ----------------------------------------------------------------------------
def fused_head_lstm_kernel(z_ref, w4_ref, b4_ref, w5_ref, b5_ref, w6_ref, b6_ref,
                           wf_ref, bf_ref, w1_ref, b1_ref, w2_ref, b2_ref,
                           w3_ref, b3_ref, wih_ref, bih_ref, whh_ref,
                           o_ref, gx_ref, *, T, B, Hp):
    leaky = lambda v: jnp.where(v >= 0, v, NEG_SLOPE * v)
    bf16 = jnp.bfloat16

    # conv4 / conv5 / conv6 as dense matmuls over the per-image CHW-flat map.
    h = leaky(jnp.dot(z_ref[...], w4_ref[...],
                      preferred_element_type=jnp.float32) + b4_ref[...])        # (N, 512)
    h = leaky(jnp.dot(h.astype(bf16), w5_ref[...],
                      preferred_element_type=jnp.float32) + b5_ref[...])        # (N, 256)
    h = leaky(jnp.dot(h.astype(bf16), w6_ref[...],
                      preferred_element_type=jnp.float32) + b6_ref[...])        # (N, 128)
    # fc1 + sigmoid
    h = jax.nn.sigmoid(jnp.dot(h, wf_ref[...],
                               preferred_element_type=jnp.float32) + bf_ref[...])  # (N, 64)
    # MLP64: three Linear + ReLU
    h = jnp.maximum(jnp.dot(h, w1_ref[...],
                            preferred_element_type=jnp.float32) + b1_ref[...], 0.0)
    h = jnp.maximum(jnp.dot(h, w2_ref[...],
                            preferred_element_type=jnp.float32) + b2_ref[...], 0.0)
    h = jnp.maximum(jnp.dot(h, w3_ref[...],
                            preferred_element_type=jnp.float32) + b3_ref[...], 0.0)
    # LSTM input projection (b_ih + b_hh folded, gate-padded to 4*Hp)
    gates = jnp.dot(h, wih_ref[...],
                    preferred_element_type=jnp.float32) + bih_ref[...]           # (T*B, 4*Hp)

    # Images are t-major (row n = t*B + b) -> stage gates as (T, B, 4*Hp).
    for t in range(T):
        gx_ref[t] = gates[t * B:(t + 1) * B, :]

    whh = whh_ref[...]

    def step(t, carry):
        h_prev, c_prev = carry
        g = gx_ref[t] + jnp.dot(h_prev, whh,
                                preferred_element_type=jnp.float32)              # (B, 4*Hp)
        # PyTorch gate order i, f, g, o — each gate starts on a 128-lane boundary.
        i_g = jax.nn.sigmoid(g[:, 0 * Hp:1 * Hp])
        f_g = jax.nn.sigmoid(g[:, 1 * Hp:2 * Hp])
        g_g = jnp.tanh(g[:, 2 * Hp:3 * Hp])
        o_g = jax.nn.sigmoid(g[:, 3 * Hp:4 * Hp])
        c_new = f_g * c_prev + i_g * g_g
        h_new = o_g * jnp.tanh(c_new)
        o_ref[t] = h_new.astype(o_ref.dtype)
        return h_new, c_new

    h0 = jnp.zeros((B, Hp), jnp.float32)
    c0 = jnp.zeros((B, Hp), jnp.float32)
    jax.lax.fori_loop(0, T, step, (h0, c0), unroll=True)


def fused_head_lstm(z4, head_params, T, B):
    """z4:(T*B, 1024) bf16 conv3 activations (per-image CHW-flat) -> (T, B, Hp)."""
    args = (z4,) + tuple(head_params)
    Hp = HP_LSTM
    kern = functools.partial(fused_head_lstm_kernel, T=T, B=B, Hp=Hp)
    return pl.pallas_call(
        kern,
        out_shape=jax.ShapeDtypeStruct((T, B, Hp), jnp.float32),
        grid=(1,),
        in_specs=[pl.BlockSpec(a.shape, lambda i: (0, 0)) for a in args],  # all 2-D
        out_specs=pl.BlockSpec((T, B, Hp), lambda i: (0, 0, 0)),
        scratch_shapes=[pltpu.VMEM((T, B, 4 * Hp), jnp.float32)],
        compiler_params=pltpu.CompilerParams(
            dimension_semantics=("arbitrary",),
            vmem_limit_bytes=32 * 1024 * 1024,
        ),
    )(*args)


# ----------------------------------------------------------------------------
# Host-side glue: bf16 transposed im2col (stride/pad identical to PyTorch)
# ----------------------------------------------------------------------------
def im2col_T(x_cnhw, k, s, p):
    """x:(C, N, H, W) -> cols_t:((kh*k+kw)*C + ci, (n*OH+oh)*OW + ow)."""
    C, N, H, W = x_cnhw.shape
    xp = jnp.pad(x_cnhw, ((0, 0), (0, 0), (p, p), (p, p)))
    OH = (H + 2 * p - k) // s + 1
    OW = (W + 2 * p - k) // s + 1
    taps = []
    for kh in range(k):
        for kw in range(k):
            taps.append(xp[:, :, kh:kh + (OH - 1) * s + 1:s,
                           kw:kw + (OW - 1) * s + 1:s])          # (C, N, OH, OW)
    cols = jnp.stack(taps, axis=0)                               # (k*k, C, N, OH, OW)
    return cols.reshape(k * k * C, N * OH * OW)


# ----------------------------------------------------------------------------
# Parameter construction (deterministic, synthetic, PyTorch-equivalent layout)
# ----------------------------------------------------------------------------
def conv_to_dense(w, b, hin, win, stride, pad):
    """Dense equivalent of Conv2d over the CHW-flattened per-image feature map.
    w:(Cout,Cin,k,k) numpy -> D:(Cin*hin*win, Cout*hout*wout), bD:(Cout*hout*wout,)."""
    cout, cin, k, _ = w.shape
    hout = (hin + 2 * pad - k) // stride + 1
    wout = (win + 2 * pad - k) // stride + 1
    D = np.zeros((cin, hin, win, cout, hout, wout), np.float32)
    for oh in range(hout):
        for ow in range(wout):
            for kh in range(k):
                for kw in range(k):
                    ih = oh * stride + kh - pad
                    iw = ow * stride + kw - pad
                    if 0 <= ih < hin and 0 <= iw < win:
                        D[:, ih, iw, :, oh, ow] = w[:, :, kh, kw].T
                    # taps landing in the zero padding contribute nothing
    bD = np.repeat(np.asarray(b, np.float32), hout * wout)
    return D.reshape(cin * hin * win, cout * hout * wout), bD


def pad_lstm_gates(w_ih_t, w_hh_t, bias, Hp):
    """Pad each of the 4 gates from width H to Hp (zero columns); zero rows >= H
    in W_hh.  Padded lanes of h/c stay identically 0 through the recurrence."""
    I, fourH = w_ih_t.shape
    H = fourH // 4
    w_ih_p = jnp.zeros((I, 4 * Hp), jnp.float32)
    w_hh_p = jnp.zeros((Hp, 4 * Hp), jnp.float32)
    b_p = jnp.zeros((4 * Hp,), jnp.float32)
    for g in range(4):
        w_ih_p = w_ih_p.at[:, g * Hp:g * Hp + H].set(w_ih_t[:, g * H:(g + 1) * H])
        w_hh_p = w_hh_p.at[:H, g * Hp:g * Hp + H].set(w_hh_t[:, g * H:(g + 1) * H])
        b_p = b_p.at[g * Hp:g * Hp + H].set(bias[g * H:(g + 1) * H])
    return w_ih_p, w_hh_p, b_p


def make_params(key):
    keys = jax.random.split(key, 24)
    ki = 0
    conv_w, conv_b = [], []
    for (cin, cout, k, s, p) in CONV_CFG:
        fan_in = cin * k * k
        w = jax.random.normal(keys[ki], (cout, cin, k, k), jnp.float32) / np.sqrt(fan_in)
        b = jax.random.normal(keys[ki + 1], (cout,), jnp.float32) * 0.01
        conv_w.append(w)
        conv_b.append(b)
        ki += 2

    # conv1-3: transposed-GEMM weights (Cout, kh*kw*Cin), bf16 operands
    tconv = []
    for li in range(3):
        cin, cout, k, s, p = CONV_CFG[li]
        w_t = jnp.transpose(conv_w[li], (0, 2, 3, 1)).reshape(cout, k * k * cin)
        tconv.append((w_t.astype(jnp.bfloat16),
                      conv_b[li].reshape(cout, 1).astype(jnp.float32)))

    # conv4-6: dense equivalents over the CHW-flattened per-image map, bf16
    spatial_in = {3: 8, 4: 4, 5: 2}
    dense = []
    for li in (3, 4, 5):
        cin, cout, k, s, p = CONV_CFG[li]
        D, bD = conv_to_dense(np.asarray(conv_w[li]), np.asarray(conv_b[li]),
                              spatial_in[li], spatial_in[li], s, p)
        dense.append((jnp.asarray(D, jnp.bfloat16),
                      jnp.asarray(bD, jnp.float32).reshape(1, -1)))

    def linear(kw, kb, fin, fout):
        w = jax.random.normal(kw, (fin, fout), jnp.float32) / np.sqrt(fin)
        b = jax.random.normal(kb, (fout,), jnp.float32) * 0.01
        return w, b.reshape(1, fout)

    wf, bf = linear(keys[ki], keys[ki + 1], 128, 64); ki += 2
    w1, b1 = linear(keys[ki], keys[ki + 1], 64, 64); ki += 2
    w2, b2 = linear(keys[ki], keys[ki + 1], 64, 64); ki += 2
    w3, b3 = linear(keys[ki], keys[ki + 1], 64, 64); ki += 2

    I, H, Hp = 64, H_LSTM, HP_LSTM
    w_ih = jax.random.normal(keys[ki], (I, 4 * H), jnp.float32) / np.sqrt(H)
    w_hh = jax.random.normal(keys[ki + 1], (H, 4 * H), jnp.float32) / np.sqrt(H)
    bias = jax.random.normal(keys[ki + 2], (4 * H,), jnp.float32) * 0.01  # b_ih + b_hh folded
    w_ih_pad, w_hh_pad, b_pad = pad_lstm_gates(w_ih, w_hh, bias, Hp)

    head = (dense[0][0], dense[0][1],          # conv4 dense
            dense[1][0], dense[1][1],          # conv5 dense
            dense[2][0], dense[2][1],          # conv6 dense (exact)
            wf, bf, w1, b1, w2, b2, w3, b3,
            w_ih_pad, b_pad.reshape(1, -1), w_hh_pad)
    return {"tconv": tconv, "head": head}


# ----------------------------------------------------------------------------
# Full forward pass (mirrors LSTM_Encoder.forward)
# ----------------------------------------------------------------------------
def lstm_encoder_forward(params, x):
    """x: (B, T, 64, 64) float32 -> (B, T, 64)."""
    B, T = x.shape[0], x.shape[1]
    N = B * T
    # t-major image order (row n = t*B + b) so the fused kernel reads gate rows
    # per time step contiguously (no gate transpose / extra launch).
    imgs = x.transpose(1, 0, 2, 3).reshape(1, N, 64, 64).astype(jnp.bfloat16)  # (C=1,N,H,W)

    h = imgs
    spatial = 64
    for li in range(3):
        cin, cout, k, s, p = CONV_CFG[li]
        w_t, b = params["tconv"][li]
        cols_t = im2col_T(h, k, s, p)                             # (k*k*cin, N*OH*OW) bf16
        spatial //= 2
        h = tconv_gemm_leaky(cols_t, w_t, b, MAX_TM[li])          # (cout, N*OH*OW) bf16
        h = h.reshape(cout, N, spatial, spatial)                  # NCHW, free reshape

    # conv3 output (16, N, 8, 8) -> per-image CHW-flat (N, 1024) for dense conv4
    z4 = h.reshape(16, N, 64).transpose(1, 0, 2).reshape(N, 16 * 64)

    out_pad = fused_head_lstm(z4, params["head"], T, B)           # (T, B, Hp)
    return out_pad[:, :, :H_LSTM].transpose(1, 0, 2)              # (B, T, 64)


if __name__ == "__main__":
    key = jax.random.PRNGKey(0)
    pkey, xkey = jax.random.split(key)
    params = make_params(pkey)

    # batch=2, seq=4, spatial 64x64 (the conv stack hard-requires 64 -> 1)
    x = jax.random.normal(xkey, (2, 4, 64, 64), jnp.float32)

    fwd = jax.jit(lstm_encoder_forward)
    out = jax.block_until_ready(fwd(params, x))
    assert out.shape == (2, 4, 64), out.shape
    assert bool(jnp.all(jnp.isfinite(out)))
    print("KERNEL_OK")
</pallas_src>

<mosaic_0001>
module attributes {stable_mosaic.version = 11 : i64} {
  func.func @tconv_leaky_kernel(%arg0: i32, %arg1: memref<16x2048xbf16, #tpu.memory_space<vmem>>, %arg2: memref<4x16xbf16, #tpu.memory_space<vmem>>, %arg3: memref<4x1xf32, #tpu.memory_space<vmem>>, %arg4: memref<4x2048xbf16, #tpu.memory_space<vmem>>) attributes {dimension_semantics = [#tpu.dimension_semantics<parallel>], iteration_bounds = array<i64: 4>, scalar_prefetch = 0 : i64, scratch_operands = 0 : i64, tpu.core_type = #tpu.core_type<tc>, window_params = [{transform_indices = @transform_0, window_bounds = array<i64: 16, 2048>}, {pipeline_mode = #tpu.pipeline_mode<synchronous>, transform_indices = @transform_1, window_bounds = array<i64: 4, 16>}, {pipeline_mode = #tpu.pipeline_mode<synchronous>, transform_indices = @transform_2, window_bounds = array<i64: 4, 1>}, {transform_indices = @transform_3, window_bounds = array<i64: 4, 2048>}]} {
    %c0 = arith.constant 0 : index
    %c0_0 = arith.constant 0 : index
    %0 = vector.load %arg2[%c0, %c0_0] : memref<4x16xbf16, #tpu.memory_space<vmem>>, vector<4x16xbf16>
    %c0_1 = arith.constant 0 : index
    %c0_2 = arith.constant 0 : index
    %1 = vector.load %arg1[%c0_1, %c0_2] : memref<16x2048xbf16, #tpu.memory_space<vmem>>, vector<16x2048xbf16>
    %cst = arith.constant dense<0.000000e+00> : vector<4x2048xf32>
    %2 = tpu.matmul %0, %1, %cst {dimension_numbers = #tpu.dot_dimension_numbers<[1], [0], [0], [1], [0, 0, 1, 1], [], []>} : vector<4x16xbf16>, vector<16x2048xbf16>, vector<4x2048xf32> -> vector<4x2048xf32>
    %c0_3 = arith.constant 0 : index
    %c0_4 = arith.constant 0 : index
    %3 = vector.load %arg3[%c0_3, %c0_4] : memref<4x1xf32, #tpu.memory_space<vmem>>, vector<4x1xf32>
    %4 = vector.broadcast %3 : vector<4x1xf32> to vector<4x2048xf32>
    %5 = arith.addf %2, %4 : vector<4x2048xf32>
    %cst_5 = arith.constant 0.000000e+00 : f32
    %6 = vector.broadcast %cst_5 : f32 to vector<4x2048xf32>
    %7 = arith.cmpf oge, %5, %6 : vector<4x2048xf32>
    %cst_6 = arith.constant 0.00999999977 : f32
    %8 = vector.broadcast %cst_6 : f32 to vector<4x2048xf32>
    %9 = arith.mulf %8, %5 : vector<4x2048xf32>
    %10 = arith.select %7, %5, %9 : vector<4x2048xi1>, vector<4x2048xf32>
    %11 = arith.truncf %10 : vector<4x2048xf32> to vector<4x2048xbf16>
    %c0_7 = arith.constant 0 : index
    %c0_8 = arith.constant 0 : index
    %12 = vector.load %arg4[%c0_7, %c0_8] : memref<4x2048xbf16, #tpu.memory_space<vmem>>, vector<4x2048xbf16>
    tpu.vector_store %arg4[%c0_7, %c0_8], %11 {strides = array<i32>} : memref<4x2048xbf16, #tpu.memory_space<vmem>>, vector<4x2048xbf16>,
    return
  }
  func.func @transform_0(%arg0: i32) -> (i32, i32) {
    %c0_i32 = arith.constant 0 : i32
    %c0_i32_0 = arith.constant 0 : i32
    return %c0_i32, %arg0 : i32, i32
  }
  func.func @transform_1(%arg0: i32) -> (i32, i32) {
    %c0_i32 = arith.constant 0 : i32
    %c0_i32_0 = arith.constant 0 : i32
    %c0_i32_1 = arith.constant 0 : i32
    return %c0_i32, %c0_i32_0 : i32, i32
  }
  func.func @transform_2(%arg0: i32) -> (i32, i32) {
    %c0_i32 = arith.constant 0 : i32
    %c0_i32_0 = arith.constant 0 : i32
    %c0_i32_1 = arith.constant 0 : i32
    return %c0_i32, %c0_i32_0 : i32, i32
  }
  func.func @transform_3(%arg0: i32) -> (i32, i32) {
    %c0_i32 = arith.constant 0 : i32
    %c0_i32_0 = arith.constant 0 : i32
    return %c0_i32, %arg0 : i32, i32
  }
}

module attributes {stable_mosaic.version = 11 : i64} {
  func.func @tconv_leaky_kernel(%arg0: i32, %arg1: memref<64x1024xbf16, #tpu.memory_space<vmem>>, %arg2: memref<8x64xbf16, #tpu.memory_space<vmem>>, %arg3: memref<8x1xf32, #tpu.memory_space<vmem>>, %arg4: memref<8x1024xbf16, #tpu.memory_space<vmem>>) attributes {dimension_semantics = [#tpu.dimension_semantics<parallel>], iteration_bounds = array<i64: 2>, scalar_prefetch = 0 : i64, scratch_operands = 0 : i64, tpu.core_type = #tpu.core_type<tc>, window_params = [{transform_indices = @transform_0, window_bounds = array<i64: 64, 1024>}, {pipeline_mode = #tpu.pipeline_mode<synchronous>, transform_indices = @transform_1, window_bounds = array<i64: 8, 64>}, {pipeline_mode = #tpu.pipeline_mode<synchronous>, transform_indices = @transform_2, window_bounds = array<i64: 8, 1>}, {transform_indices = @transform_3, window_bounds = array<i64: 8, 1024>}]} {
    %c0 = arith.constant 0 : index
    %c0_0 = arith.constant 0 : index
    %0 = vector.load %arg2[%c0, %c0_0] : memref<8x64xbf16, #tpu.memory_space<vmem>>, vector<8x64xbf16>
    %c0_1 = arith.constant 0 : index
    %c0_2 = arith.constant 0 : index
    %1 = vector.load %arg1[%c0_1, %c0_2] : memref<64x1024xbf16, #tpu.memory_space<vmem>>, vector<64x1024xbf16>
    %cst = arith.constant dense<0.000000e+00> : vector<8x1024xf32>
    %2 = tpu.matmul %0, %1, %cst {dimension_numbers = #tpu.dot_dimension_numbers<[1], [0], [0], [1], [0, 0, 1, 1], [], []>} : vector<8x64xbf16>, vector<64x1024xbf16>, vector<8x1024xf32> -> vector<8x1024xf32>
    %c0_3 = arith.constant 0 : index
    %c0_4 = arith.constant 0 : index
    %3 = vector.load %arg3[%c0_3, %c0_4] : memref<8x1xf32, #tpu.memory_space<vmem>>, vector<8x1xf32>
    %4 = vector.broadcast %3 : vector<8x1xf32> to vector<8x1024xf32>
    %5 = arith.addf %2, %4 : vector<8x1024xf32>
    %cst_5 = arith.constant 0.000000e+00 : f32
    %6 = vector.broadcast %cst_5 : f32 to vector<8x1024xf32>
    %7 = arith.cmpf oge, %5, %6 : vector<8x1024xf32>
    %cst_6 = arith.constant 0.00999999977 : f32
    %8 = vector.broadcast %cst_6 : f32 to vector<8x1024xf32>
    %9 = arith.mulf %8, %5 : vector<8x1024xf32>
    %10 = arith.select %7, %5, %9 : vector<8x1024xi1>, vector<8x1024xf32>
    %11 = arith.truncf %10 : vector<8x1024xf32> to vector<8x1024xbf16>
    %c0_7 = arith.constant 0 : index
    %c0_8 = arith.constant 0 : index
    %12 = vector.load %arg4[%c0_7, %c0_8] : memref<8x1024xbf16, #tpu.memory_space<vmem>>, vector<8x1024xbf16>
    tpu.vector_store %arg4[%c0_7, %c0_8], %11 {strides = array<i32>} : memref<8x1024xbf16, #tpu.memory_space<vmem>>, vector<8x1024xbf16>,
    return
  }
  func.func @transform_0(%arg0: i32) -> (i32, i32) {
    %c0_i32 = arith.constant 0 : i32
    %c0_i32_0 = arith.constant 0 : i32
    return %c0_i32, %arg0 : i32, i32
  }
  func.func @transform_1(%arg0: i32) -> (i32, i32) {
    %c0_i32 = arith.constant 0 : i32
    %c0_i32_0 = arith.constant 0 : i32
    %c0_i32_1 = arith.constant 0 : i32
    return %c0_i32, %c0_i32_0 : i32, i32
  }
  func.func @transform_2(%arg0: i32) -> (i32, i32) {
    %c0_i32 = arith.constant 0 : i32
    %c0_i32_0 = arith.constant 0 : i32
    %c0_i32_1 = arith.constant 0 : i32
    return %c0_i32, %c0_i32_0 : i32, i32
  }
  func.func @transform_3(%arg0: i32) -> (i32, i32) {
    %c0_i32 = arith.constant 0 : i32
    %c0_i32_0 = arith.constant 0 : i32
    return %c0_i32, %arg0 : i32, i32
  }
}

module attributes {stable_mosaic.version = 11 : i64} {
  func.func @tconv_leaky_kernel(%arg0: i32, %arg1: memref<128x256xbf16, #tpu.memory_space<vmem>>, %arg2: memref<16x128xbf16, #tpu.memory_space<vmem>>, %arg3: memref<16x1xf32, #tpu.memory_space<vmem>>, %arg4: memref<16x256xbf16, #tpu.memory_space<vmem>>) attributes {dimension_semantics = [#tpu.dimension_semantics<parallel>], iteration_bounds = array<i64: 2>, scalar_prefetch = 0 : i64, scratch_operands = 0 : i64, tpu.core_type = #tpu.core_type<tc>, window_params = [{transform_indices = @transform_0, window_bounds = array<i64: 128, 256>}, {pipeline_mode = #tpu.pipeline_mode<synchronous>, transform_indices = @transform_1, window_bounds = array<i64: 16, 128>}, {pipeline_mode = #tpu.pipeline_mode<synchronous>, transform_indices = @transform_2, window_bounds = array<i64: 16, 1>}, {transform_indices = @transform_3, window_bounds = array<i64: 16, 256>}]} {
    %c0 = arith.constant 0 : index
    %c0_0 = arith.constant 0 : index
    %0 = vector.load %arg2[%c0, %c0_0] : memref<16x128xbf16, #tpu.memory_space<vmem>>, vector<16x128xbf16>
    %c0_1 = arith.constant 0 : index
    %c0_2 = arith.constant 0 : index
    %1 = vector.load %arg1[%c0_1, %c0_2] : memref<128x256xbf16, #tpu.memory_space<vmem>>, vector<128x256xbf16>
    %cst = arith.constant dense<0.000000e+00> : vector<16x256xf32>
    %2 = tpu.matmul %0, %1, %cst {dimension_numbers = #tpu.dot_dimension_numbers<[1], [0], [0], [1], [0, 0, 1, 1], [], []>} : vector<16x128xbf16>, vector<128x256xbf16>, vector<16x256xf32> -> vector<16x256xf32>
    %c0_3 = arith.constant 0 : index
    %c0_4 = arith.constant 0 : index
    %3 = vector.load %arg3[%c0_3, %c0_4] : memref<16x1xf32, #tpu.memory_space<vmem>>, vector<16x1xf32>
    %4 = vector.broadcast %3 : vector<16x1xf32> to vector<16x256xf32>
    %5 = arith.addf %2, %4 : vector<16x256xf32>
    %cst_5 = arith.constant 0.000000e+00 : f32
    %6 = vector.broadcast %cst_5 : f32 to vector<16x256xf32>
    %7 = arith.cmpf oge, %5, %6 : vector<16x256xf32>
    %cst_6 = arith.constant 0.00999999977 : f32
    %8 = vector.broadcast %cst_6 : f32 to vector<16x256xf32>
    %9 = arith.mulf %8, %5 : vector<16x256xf32>
    %10 = arith.select %7, %5, %9 : vector<16x256xi1>, vector<16x256xf32>
    %11 = arith.truncf %10 : vector<16x256xf32> to vector<16x256xbf16>
    %c0_7 = arith.constant 0 : index
    %c0_8 = arith.constant 0 : index
    %12 = vector.load %arg4[%c0_7, %c0_8] : memref<16x256xbf16, #tpu.memory_space<vmem>>, vector<16x256xbf16>
    tpu.vector_store %arg4[%c0_7, %c0_8], %11 {strides = array<i32>} : memref<16x256xbf16, #tpu.memory_space<vmem>>, vector<16x256xbf16>,
    return
  }
  func.func @transform_0(%arg0: i32) -> (i32, i32) {
    %c0_i32 = arith.constant 0 : i32
    %c0_i32_0 = arith.constant 0 : i32
    return %c0_i32, %arg0 : i32, i32
  }
  func.func @transform_1(%arg0: i32) -> (i32, i32) {
    %c0_i32 = arith.constant 0 : i32
    %c0_i32_0 = arith.constant 0 : i32
    %c0_i32_1 = arith.constant 0 : i32
    return %c0_i32, %c0_i32_0 : i32, i32
  }
  func.func @transform_2(%arg0: i32) -> (i32, i32) {
    %c0_i32 = arith.constant 0 : i32
    %c0_i32_0 = arith.constant 0 : i32
    %c0_i32_1 = arith.constant 0 : i32
    return %c0_i32, %c0_i32_0 : i32, i32
  }
  func.func @transform_3(%arg0: i32) -> (i32, i32) {
    %c0_i32 = arith.constant 0 : i32
    %c0_i32_0 = arith.constant 0 : i32
    return %c0_i32, %arg0 : i32, i32
  }
}

module attributes {stable_mosaic.version = 11 : i64} {
  func.func @fused_head_lstm_kernel(%arg0: i32, %arg1: memref<8x1024xbf16, #tpu.memory_space<vmem>>, %arg2: memref<1024x512xbf16, #tpu.memory_space<vmem>>, %arg3: memref<1x512xf32, #tpu.memory_space<vmem>>, %arg4: memref<512x256xbf16, #tpu.memory_space<vmem>>, %arg5: memref<1x256xf32, #tpu.memory_space<vmem>>, %arg6: memref<256x128xbf16, #tpu.memory_space<vmem>>, %arg7: memref<1x128xf32, #tpu.memory_space<vmem>>, %arg8: memref<128x64xf32, #tpu.memory_space<vmem>>, %arg9: memref<1x64xf32, #tpu.memory_space<vmem>>, %arg10: memref<64x64xf32, #tpu.memory_space<vmem>>, %arg11: memref<1x64xf32, #tpu.memory_space<vmem>>, %arg12: memref<64x64xf32, #tpu.memory_space<vmem>>, %arg13: memref<1x64xf32, #tpu.memory_space<vmem>>, %arg14: memref<64x64xf32, #tpu.memory_space<vmem>>, %arg15: memref<1x64xf32, #tpu.memory_space<vmem>>, %arg16: memref<64x512xf32, #tpu.memory_space<vmem>>, %arg17: memref<1x512xf32, #tpu.memory_space<vmem>>, %arg18: memref<128x512xf32, #tpu.memory_space<vmem>>, %arg19: memref<4x2x128xf32, #tpu.memory_space<vmem>>, %arg20: memref<4x2x512xf32, #tpu.memory_space<vmem>>) attributes {dimension_semantics = [#tpu.dimension_semantics<arbitrary>], iteration_bounds = array<i64: 1>, scalar_prefetch = 0 : i64, scratch_operands = 1 : i64, tpu.core_type = #tpu.core_type<tc>, window_params = [{pipeline_mode = #tpu.pipeline_mode<synchronous>, transform_indices = @transform_0, window_bounds = array<i64: 8, 1024>}, {pipeline_mode = #tpu.pipeline_mode<synchronous>, transform_indices = @transform_1, window_bounds = array<i64: 1024, 512>}, {pipeline_mode = #tpu.pipeline_mode<synchronous>, transform_indices = @transform_2, window_bounds = array<i64: 1, 512>}, {pipeline_mode = #tpu.pipeline_mode<synchronous>, transform_indices = @transform_3, window_bounds = array<i64: 512, 256>}, {pipeline_mode = #tpu.pipeline_mode<synchronous>, transform_indices = @transform_4, window_bounds = array<i64: 1, 256>}, {pipeline_mode = #tpu.pipeline_mode<synchronous>, transform_indices = @transform_5, window_bounds = array<i64: 256, 128>}, {pipeline_mode = #tpu.pipeline_mode<synchronous>, transform_indices = @transform_6, window_bounds = array<i64: 1, 128>}, {pipeline_mode = #tpu.pipeline_mode<synchronous>, transform_indices = @transform_7, window_bounds = array<i64: 128, 64>}, {pipeline_mode = #tpu.pipeline_mode<synchronous>, transform_indices = @transform_8, window_bounds = array<i64: 1, 64>}, {pipeline_mode = #tpu.pipeline_mode<synchronous>, transform_indices = @transform_9, window_bounds = array<i64: 64, 64>}, {pipeline_mode = #tpu.pipeline_mode<synchronous>, transform_indices = @transform_10, window_bounds = array<i64: 1, 64>}, {pipeline_mode = #tpu.pipeline_mode<synchronous>, transform_indices = @transform_11, window_bounds = array<i64: 64, 64>}, {pipeline_mode = #tpu.pipeline_mode<synchronous>, transform_indices = @transform_12, window_bounds = array<i64: 1, 64>}, {pipeline_mode = #tpu.pipeline_mode<synchronous>, transform_indices = @transform_13, window_bounds = array<i64: 64, 64>}, {pipeline_mode = #tpu.pipeline_mode<synchronous>, transform_indices = @transform_14, window_bounds = array<i64: 1, 64>}, {pipeline_mode = #tpu.pipeline_mode<synchronous>, transform_indices = @transform_15, window_bounds = array<i64: 64, 512>}, {pipeline_mode = #tpu.pipeline_mode<synchronous>, transform_indices = @transform_16, window_bounds = array<i64: 1, 512>}, {pipeline_mode = #tpu.pipeline_mode<synchronous>, transform_indices = @transform_17, window_bounds = array<i64: 128, 512>}, {pipeline_mode = #tpu.pipeline_mode<synchronous>, transform_indices = @transform_18, window_bounds = array<i64: 4, 2, 128>}]} {
    %c0 = arith.constant 0 : index
    %c0_0 = arith.constant 0 : index
    %0 = vector.load %arg1[%c0, %c0_0] : memref<8x1024xbf16, #tpu.memory_space<vmem>>, vector<8x1024xbf16>
    %c0_1 = arith.constant 0 : index
    %c0_2 = arith.constant 0 : index
    %1 = vector.load %arg2[%c0_1, %c0_2] : memref<1024x512xbf16, #tpu.memory_space<vmem>>, vector<1024x512xbf16>
    %cst = arith.constant dense<0.000000e+00> : vector<8x512xf32>
    %2 = tpu.matmul %0, %1, %cst {dimension_numbers = #tpu.dot_dimension_numbers<[1], [0], [0], [1], [0, 0, 1, 1], [], []>} : vector<8x1024xbf16>, vector<1024x512xbf16>, vector<8x512xf32> -> vector<8x512xf32>
    %c0_3 = arith.constant 0 : index
    %c0_4 = arith.constant 0 : index
    %3 = vector.load %arg3[%c0_3, %c0_4] : memref<1x512xf32, #tpu.memory_space<vmem>>, vector<1x512xf32>
    %4 = vector.broadcast %3 : vector<1x512xf32> to vector<8x512xf32>
    %5 = arith.addf %2, %4 : vector<8x512xf32>
    %cst_5 = arith.constant 0.000000e+00 : f32
    %6 = vector.broadcast %cst_5 : f32 to vector<8x512xf32>
    %7 = arith.cmpf oge, %5, %6 : vector<8x512xf32>
    %cst_6 = arith.constant 0.00999999977 : f32
    %8 = vector.broadcast %cst_6 : f32 to vector<8x512xf32>
    %9 = arith.mulf %8, %5 : vector<8x512xf32>
    %10 = arith.select %7, %5, %9 : vector<8x512xi1>, vector<8x512xf32>
    %11 = arith.truncf %10 : vector<8x512xf32> to vector<8x512xbf16>
    %c0_7 = arith.constant 0 : index
    %c0_8 = arith.constant 0 : index
    %12 = vector.load %arg4[%c0_7, %c0_8] : memref<512x256xbf16, #tpu.memory_space<vmem>>, vector<512x256xbf16>
    %cst_9 = arith.constant dense<0.000000e+00> : vector<8x256xf32>
    %13 = tpu.matmul %11, %12, %cst_9 {dimension_numbers = #tpu.dot_dimension_numbers<[1], [0], [0], [1], [0, 0, 1, 1], [], []>} : vector<8x512xbf16>, vector<512x256xbf16>, vector<8x256xf32> -> vector<8x256xf32>
    %c0_10 = arith.constant 0 : index
    %c0_11 = arith.constant 0 : index
    %14 = vector.load %arg5[%c0_10, %c0_11] : memref<1x256xf32, #tpu.memory_space<vmem>>, vector<1x256xf32>
    %15 = vector.broadcast %14 : vector<1x256xf32> to vector<8x256xf32>
    %16 = arith.addf %13, %15 : vector<8x256xf32>
    %cst_12 = arith.constant 0.000000e+00 : f32
    %17 = vector.broadcast %cst_12 : f32 to vector<8x256xf32>
    %18 = arith.cmpf oge, %16, %17 : vector<8x256xf32>
    %cst_13 = arith.constant 0.00999999977 : f32
    %19 = vector.broadcast %cst_13 : f32 to vector<8x256xf32>
    %20 = arith.mulf %19, %16 : vector<8x256xf32>
    %21 = arith.select %18, %16, %20 : vector<8x256xi1>, vector<8x256xf32>
    %22 = arith.truncf %21 : vector<8x256xf32> to vector<8x256xbf16>
    %c0_14 = arith.constant 0 : index
    %c0_15 = arith.constant 0 : index
    %23 = vector.load %arg6[%c0_14, %c0_15] : memref<256x128xbf16, #tpu.memory_space<vmem>>, vector<256x128xbf16>
    %cst_16 = arith.constant dense<0.000000e+00> : vector<8x128xf32>
    %24 = tpu.matmul %22, %23, %cst_16 {dimension_numbers = #tpu.dot_dimension_numbers<[1], [0], [0], [1], [0, 0, 1, 1], [], []>} : vector<8x256xbf16>, vector<256x128xbf16>, vector<8x128xf32> -> vector<8x128xf32>
    %c0_17 = arith.constant 0 : index
    %c0_18 = arith.constant 0 : index
    %25 = vector.load %arg7[%c0_17, %c0_18] : memref<1x128xf32, #tpu.memory_space<vmem>>, vector<1x128xf32>
    %26 = vector.broadcast %25 : vector<1x128xf32> to vector<8x128xf32>
    %27 = arith.addf %24, %26 : vector<8x128xf32>
    %cst_19 = arith.constant 0.000000e+00 : f32
    %28 = vector.broadcast %cst_19 : f32 to vector<8x128xf32>
    %29 = arith.cmpf oge, %27, %28 : vector<8x128xf32>
    %cst_20 = arith.constant 0.00999999977 : f32
    %30 = vector.broadcast %cst_20 : f32 to vector<8x128xf32>
    %31 = arith.mulf %30, %27 : vector<8x128xf32>
    %32 = arith.select %29, %27, %31 : vector<8x128xi1>, vector<8x128xf32>
    %c0_21 = arith.constant 0 : index
    %c0_22 = arith.constant 0 : index
    %33 = vector.load %arg8[%c0_21, %c0_22] : memref<128x64xf32, #tpu.memory_space<vmem>>, vector<128x64xf32>
    %cst_23 = arith.constant dense<0.000000e+00> : vector<8x64xf32>
    %34 = tpu.matmul %32, %33, %cst_23 {dimension_numbers = #tpu.dot_dimension_numbers<[1], [0], [0], [1], [0, 0, 1, 1], [], []>} : vector<8x128xf32>, vector<128x64xf32>, vector<8x64xf32> -> vector<8x64xf32>
    %c0_24 = arith.constant 0 : index
    %c0_25 = arith.constant 0 : index
    %35 = vector.load %arg9[%c0_24, %c0_25] : memref<1x64xf32, #tpu.memory_space<vmem>>, vector<1x64xf32>
    %36 = vector.broadcast %35 : vector<1x64xf32> to vector<8x64xf32>
    %37 = arith.addf %34, %36 : vector<8x64xf32>
    %38 = arith.negf %37 : vector<8x64xf32>
    %39 = math.exp %38 : vector<8x64xf32>
    %cst_26 = arith.constant 1.000000e+00 : f32
    %40 = vector.broadcast %cst_26 : f32 to vector<8x64xf32>
    %41 = arith.addf %40, %39 : vector<8x64xf32>
    %42 = arith.divf %40, %41 : vector<8x64xf32>
    %c0_27 = arith.constant 0 : index
    %c0_28 = arith.constant 0 : index
    %43 = vector.load %arg10[%c0_27, %c0_28] : memref<64x64xf32, #tpu.memory_space<vmem>>, vector<64x64xf32>
    %cst_29 = arith.constant dense<0.000000e+00> : vector<8x64xf32>
    %44 = tpu.matmul %42, %43, %cst_29 {dimension_numbers = #tpu.dot_dimension_numbers<[1], [0], [0], [1], [0, 0, 1, 1], [], []>} : vector<8x64xf32>, vector<64x64xf32>, vector<8x64xf32> -> vector<8x64xf32>
    %c0_30 = arith.constant 0 : index
    %c0_31 = arith.constant 0 : index
    %45 = vector.load %arg11[%c0_30, %c0_31] : memref<1x64xf32, #tpu.memory_space<vmem>>, vector<1x64xf32>
    %46 = vector.broadcast %45 : vector<1x64xf32> to vector<8x64xf32>
    %47 = arith.addf %44, %46 : vector<8x64xf32>
    %cst_32 = arith.constant 0.000000e+00 : f32
    %48 = vector.broadcast %cst_32 : f32 to vector<8x64xf32>
    %49 = arith.maximumf %47, %48 : vector<8x64xf32>
    %c0_33 = arith.constant 0 : index
    %c0_34 = arith.constant 0 : index
    %50 = vector.load %arg12[%c0_33, %c0_34] : memref<64x64xf32, #tpu.memory_space<vmem>>, vector<64x64xf32>
    %cst_35 = arith.constant dense<0.000000e+00> : vector<8x64xf32>
    %51 = tpu.matmul %49, %50, %cst_35 {dimension_numbers = #tpu.dot_dimension_numbers<[1], [0], [0], [1], [0, 0, 1, 1], [], []>} : vector<8x64xf32>, vector<64x64xf32>, vector<8x64xf32> -> vector<8x64xf32>
    %c0_36 = arith.constant 0 : index
    %c0_37 = arith.constant 0 : index
    %52 = vector.load %arg13[%c0_36, %c0_37] : memref<1x64xf32, #tpu.memory_space<vmem>>, vector<1x64xf32>
    %53 = vector.broadcast %52 : vector<1x64xf32> to vector<8x64xf32>
    %54 = arith.addf %51, %53 : vector<8x64xf32>
    %cst_38 = arith.constant 0.000000e+00 : f32
    %55 = vector.broadcast %cst_38 : f32 to vector<8x64xf32>
    %56 = arith.maximumf %54, %55 : vector<8x64xf32>
    %c0_39 = arith.constant 0 : index
    %c0_40 = arith.constant 0 : index
    %57 = vector.load %arg14[%c0_39, %c0_40] : memref<64x64xf32, #tpu.memory_space<vmem>>, vector<64x64xf32>
    %cst_41 = arith.constant dense<0.000000e+00> : vector<8x64xf32>
    %58 = tpu.matmul %56, %57, %cst_41 {dimension_numbers = #tpu.dot_dimension_numbers<[1], [0], [0], [1], [0, 0, 1, 1], [], []>} : vector<8x64xf32>, vector<64x64xf32>, vector<8x64xf32> -> vector<8x64xf32>
    %c0_42 = arith.constant 0 : index
    %c0_43 = arith.constant 0 : index
    %59 = vector.load %arg15[%c0_42, %c0_43] : memref<1x64xf32, #tpu.memory_space<vmem>>, vector<1x64xf32>
    %60 = vector.broadcast %59 : vector<1x64xf32> to vector<8x64xf32>
    %61 = arith.addf %58, %60 : vector<8x64xf32>
    %cst_44 = arith.constant 0.000000e+00 : f32
    %62 = vector.broadcast %cst_44 : f32 to vector<8x64xf32>
    %63 = arith.maximumf %61, %62 : vector<8x64xf32>
    %c0_45 = arith.constant 0 : index
    %c0_46 = arith.constant 0 : index
    %64 = vector.load %arg16[%c0_45, %c0_46] : memref<64x512xf32, #tpu.memory_space<vmem>>, vector<64x512xf32>
    %cst_47 = arith.constant dense<0.000000e+00> : vector<8x512xf32>
    %65 = tpu.matmul %63, %64, %cst_47 {dimension_numbers = #tpu.dot_dimension_numbers<[1], [0], [0], [1], [0, 0, 1, 1], [], []>} : vector<8x64xf32>, vector<64x512xf32>, vector<8x512xf32> -> vector<8x512xf32>
    %c0_48 = arith.constant 0 : index
    %c0_49 = arith.constant 0 : index
    %66 = vector.load %arg17[%c0_48, %c0_49] : memref<1x512xf32, #tpu.memory_space<vmem>>, vector<1x512xf32>
    %67 = vector.broadcast %66 : vector<1x512xf32> to vector<8x512xf32>
    %68 = arith.addf %65, %67 : vector<8x512xf32>
    %69 = vector.extract_strided_slice %68 {offsets = [0, 0], sizes = [2, 512], strides = [1, 1]} : vector<8x512xf32> to vector<2x512xf32>
    %c0_50 = arith.constant 0 : index
    %c0_51 = arith.constant 0 : index
    %c0_52 = arith.constant 0 : index
    %70 = vector.load %arg20[%c0_50, %c0_51, %c0_52] : memref<4x2x512xf32, #tpu.memory_space<vmem>>, vector<1x2x512xf32>
    %71 = vector.shape_cast %70 : vector<1x2x512xf32> to vector<2x512xf32>
    %72 = vector.shape_cast %69 : vector<2x512xf32> to vector<1x2x512xf32>
    tpu.vector_store %arg20[%c0_50, %c0_51, %c0_52], %72 {strides = array<i32>} : memref<4x2x512xf32, #tpu.memory_space<vmem>>, vector<1x2x512xf32>,
    %73 = vector.extract_strided_slice %68 {offsets = [2, 0], sizes = [2, 512], strides = [1, 1]} : vector<8x512xf32> to vector<2x512xf32>
    %c1 = arith.constant 1 : index
    %c0_53 = arith.constant 0 : index
    %c0_54 = arith.constant 0 : index
    %74 = vector.load %arg20[%c1, %c0_53, %c0_54] : memref<4x2x512xf32, #tpu.memory_space<vmem>>, vector<1x2x512xf32>
    %75 = vector.shape_cast %74 : vector<1x2x512xf32> to vector<2x512xf32>
    %76 = vector.shape_cast %73 : vector<2x512xf32> to vector<1x2x512xf32>
    tpu.vector_store %arg20[%c1, %c0_53, %c0_54], %76 {strides = array<i32>} : memref<4x2x512xf32, #tpu.memory_space<vmem>>, vector<1x2x512xf32>,
    %77 = vector.extract_strided_slice %68 {offsets = [4, 0], sizes = [2, 512], strides = [1, 1]} : vector<8x512xf32> to vector<2x512xf32>
    %c2 = arith.constant 2 : index
    %c0_55 = arith.constant 0 : index
    %c0_56 = arith.constant 0 : index
    %78 = vector.load %arg20[%c2, %c0_55, %c0_56] : memref<4x2x512xf32, #tpu.memory_space<vmem>>, vector<1x2x512xf32>
    %79 = vector.shape_cast %78 : vector<1x2x512xf32> to vector<2x512xf32>
    %80 = vector.shape_cast %77 : vector<2x512xf32> to vector<1x2x512xf32>
    tpu.vector_store %arg20[%c2, %c0_55, %c0_56], %80 {strides = array<i32>} : memref<4x2x512xf32, #tpu.memory_space<vmem>>, vector<1x2x512xf32>,
    %81 = vector.extract_strided_slice %68 {offsets = [6, 0], sizes = [2, 512], strides = [1, 1]} : vector<8x512xf32> to vector<2x512xf32>
    %c3 = arith.constant 3 : index
    %c0_57 = arith.constant 0 : index
    %c0_58 = arith.constant 0 : index
    %82 = vector.load %arg20[%c3, %c0_57, %c0_58] : memref<4x2x512xf32, #tpu.memory_space<vmem>>, vector<1x2x512xf32>
    %83 = vector.shape_cast %82 : vector<1x2x512xf32> to vector<2x512xf32>
    %84 = vector.shape_cast %81 : vector<2x512xf32> to vector<1x2x512xf32>
    tpu.vector_store %arg20[%c3, %c0_57, %c0_58], %84 {strides = array<i32>} : memref<4x2x512xf32, #tpu.memory_space<vmem>>, vector<1x2x512xf32>,
    %c0_59 = arith.constant 0 : index
    %c0_60 = arith.constant 0 : index
    %85 = vector.load %arg18[%c0_59, %c0_60] : memref<128x512xf32, #tpu.memory_space<vmem>>, vector<128x512xf32>
    %cst_61 = arith.constant 0.000000e+00 : f32
    %86 = vector.broadcast %cst_61 : f32 to vector<2x128xf32>
    %cst_62 = arith.constant 0.000000e+00 : f32
    %87 = vector.broadcast %cst_62 : f32 to vector<2x128xf32>
    %c0_i32 = arith.constant 0 : i32
    %88 = arith.index_cast %c0_i32 : i32 to index
    %c0_63 = arith.constant 0 : index
    %c0_64 = arith.constant 0 : index
    %89 = vector.load %arg20[%88, %c0_63, %c0_64] : memref<4x2x512xf32, #tpu.memory_space<vmem>>, vector<1x2x512xf32>
    %90 = vector.shape_cast %89 : vector<1x2x512xf32> to vector<2x512xf32>
    %cst_65 = arith.constant dense<0.000000e+00> : vector<2x512xf32>
    %91 = tpu.matmul %86, %85, %cst_65 {dimension_numbers = #tpu.dot_dimension_numbers<[1], [0], [0], [1], [0, 0, 1, 1], [], []>} : vector<2x128xf32>, vector<128x512xf32>, vector<2x512xf32> -> vector<2x512xf32>
    %92 = arith.addf %90, %91 : vector<2x512xf32>
    %93 = vector.extract_strided_slice %92 {offsets = [0, 0], sizes = [2, 128], strides = [1, 1]} : vector<2x512xf32> to vector<2x128xf32>
    %94 = arith.negf %93 : vector<2x128xf32>
    %95 = math.exp %94 : vector<2x128xf32>
    %cst_66 = arith.constant 1.000000e+00 : f32
    %96 = vector.broadcast %cst_66 : f32 to vector<2x128xf32>
    %97 = arith.addf %96, %95 : vector<2x128xf32>
    %98 = arith.divf %96, %97 : vector<2x128xf32>
    %99 = vector.extract_strided_slice %92 {offsets = [0, 128], sizes = [2, 128], strides = [1, 1]} : vector<2x512xf32> to vector<2x128xf32>
    %100 = arith.negf %99 : vector<2x128xf32>
    %101 = math.exp %100 : vector<2x128xf32>
    %cst_67 = arith.constant 1.000000e+00 : f32
    %102 = vector.broadcast %cst_67 : f32 to vector<2x128xf32>
    %103 = arith.addf %102, %101 : vector<2x128xf32>
    %104 = arith.divf %102, %103 : vector<2x128xf32>
    %105 = vector.extract_strided_slice %92 {offsets = [0, 256], sizes = [2, 128], strides = [1, 1]} : vector<2x512xf32> to vector<2x128xf32>
    %106 = math.tanh %105 : vector<2x128xf32>
    %107 = vector.extract_strided_slice %92 {offsets = [0, 384], sizes = [2, 128], strides = [1, 1]} : vector<2x512xf32> to vector<2x128xf32>
    %108 = arith.negf %107 : vector<2x128xf32>
    %109 = math.exp %108 : vector<2x128xf32>
    %cst_68 = arith.constant 1.000000e+00 : f32
    %110 = vector.broadcast %cst_68 : f32 to vector<2x128xf32>
    %111 = arith.addf %110, %109 : vector<2x128xf32>
    %112 = arith.divf %110, %111 : vector<2x128xf32>
    %113 = arith.mulf %104, %87 : vector<2x128xf32>
    %114 = arith.mulf %98, %106 : vector<2x128xf32>
    %115 = arith.addf %113, %114 : vector<2x128xf32>
    %116 = math.tanh %115 : vector<2x128xf32>
    %117 = arith.mulf %112, %116 : vector<2x128xf32>
    %118 = arith.index_cast %c0_i32 : i32 to index
    %c0_69 = arith.constant 0 : index
    %c0_70 = arith.constant 0 : index
    %119 = vector.load %arg19[%118, %c0_69, %c0_70] : memref<4x2x128xf32, #tpu.memory_space<vmem>>, vector<1x2x128xf32>
    %120 = vector.shape_cast %119 : vector<1x2x128xf32> to vector<2x128xf32>
    %121 = vector.shape_cast %117 : vector<2x128xf32> to vector<1x2x128xf32>
    tpu.vector_store %arg19[%118, %c0_69, %c0_70], %121 {strides = array<i32>} : memref<4x2x128xf32, #tpu.memory_space<vmem>>, vector<1x2x128xf32>,
    %c1_i32 = arith.constant 1 : i32
    %122 = arith.index_cast %c1_i32 : i32 to index
    %c0_71 = arith.constant 0 : index
    %c0_72 = arith.constant 0 : index
    %123 = vector.load %arg20[%122, %c0_71, %c0_72] : memref<4x2x512xf32, #tpu.memory_space<vmem>>, vector<1x2x512xf32>
    %124 = vector.shape_cast %123 : vector<1x2x512xf32> to vector<2x512xf32>
    %cst_73 = arith.constant dense<0.000000e+00> : vector<2x512xf32>
    %125 = tpu.matmul %117, %85, %cst_73 {dimension_numbers = #tpu.dot_dimension_numbers<[1], [0], [0], [1], [0, 0, 1, 1], [], []>} : vector<2x128xf32>, vector<128x512xf32>, vector<2x512xf32> -> vector<2x512xf32>
    %126 = arith.addf %124, %125 : vector<2x512xf32>
    %127 = vector.extract_strided_slice %126 {offsets = [0, 0], sizes = [2, 128], strides = [1, 1]} : vector<2x512xf32> to vector<2x128xf32>
    %128 = arith.negf %127 : vector<2x128xf32>
    %129 = math.exp %128 : vector<2x128xf32>
    %cst_74 = arith.constant 1.000000e+00 : f32
    %130 = vector.broadcast %cst_74 : f32 to vector<2x128xf32>
    %131 = arith.addf %130, %129 : vector<2x128xf32>
    %132 = arith.divf %130, %131 : vector<2x128xf32>
    %133 = vector.extract_strided_slice %126 {offsets = [0, 128], sizes = [2, 128], strides = [1, 1]} : vector<2x512xf32> to vector<2x128xf32>
    %134 = arith.negf %133 : vector<2x128xf32>
    %135 = math.exp %134 : vector<2x128xf32>
    %cst_75 = arith.constant 1.000000e+00 : f32
    %136 = vector.broadcast %cst_75 : f32 to vector<2x128xf32>
    %137 = arith.addf %136, %135 : vector<2x128xf32>
    %138 = arith.divf %136, %137 : vector<2x128xf32>
    %139 = vector.extract_strided_slice %126 {offsets = [0, 256], sizes = [2, 128], strides = [1, 1]} : vector<2x512xf32> to vector<2x128xf32>
    %140 = math.tanh %139 : vector<2x128xf32>
    %141 = vector.extract_strided_slice %126 {offsets = [0, 384], sizes = [2, 128], strides = [1, 1]} : vector<2x512xf32> to vector<2x128xf32>
    %142 = arith.negf %141 : vector<2x128xf32>
    %143 = math.exp %142 : vector<2x128xf32>
    %cst_76 = arith.constant 1.000000e+00 : f32
    %144 = vector.broadcast %cst_76 : f32 to vector<2x128xf32>
    %145 = arith.addf %144, %143 : vector<2x128xf32>
    %146 = arith.divf %144, %145 : vector<2x128xf32>
    %147 = arith.mulf %138, %115 : vector<2x128xf32>
    %148 = arith.mulf %132, %140 : vector<2x128xf32>
    %149 = arith.addf %147, %148 : vector<2x128xf32>
    %150 = math.tanh %149 : vector<2x128xf32>
    %151 = arith.mulf %146, %150 : vector<2x128xf32>
    %152 = arith.index_cast %c1_i32 : i32 to index
    %c0_77 = arith.constant 0 : index
    %c0_78 = arith.constant 0 : index
    %153 = vector.load %arg19[%152, %c0_77, %c0_78] : memref<4x2x128xf32, #tpu.memory_space<vmem>>, vector<1x2x128xf32>
    %154 = vector.shape_cast %153 : vector<1x2x128xf32> to vector<2x128xf32>
    %155 = vector.shape_cast %151 : vector<2x128xf32> to vector<1x2x128xf32>
    tpu.vector_store %arg19[%152, %c0_77, %c0_78], %155 {strides = array<i32>} : memref<4x2x128xf32, #tpu.memory_space<vmem>>, vector<1x2x128xf32>,
    %c2_i32 = arith.constant 2 : i32
    %156 = arith.index_cast %c2_i32 : i32 to index
    %c0_79 = arith.constant 0 : index
    %c0_80 = arith.constant 0 : index
    %157 = vector.load %arg20[%156, %c0_79, %c0_80] : memref<4x2x512xf32, #tpu.memory_space<vmem>>, vector<1x2x512xf32>
    %158 = vector.shape_cast %157 : vector<1x2x512xf32> to vector<2x512xf32>
    %cst_81 = arith.constant dense<0.000000e+00> : vector<2x512xf32>
    %159 = tpu.matmul %151, %85, %cst_81 {dimension_numbers = #tpu.dot_dimension_numbers<[1], [0], [0], [1], [0, 0, 1, 1], [], []>} : vector<2x128xf32>, vector<128x512xf32>, vector<2x512xf32> -> vector<2x512xf32>
    %160 = arith.addf %158, %159 : vector<2x512xf32>
    %161 = vector.extract_strided_slice %160 {offsets = [0, 0], sizes = [2, 128], strides = [1, 1]} : vector<2x512xf32> to vector<2x128xf32>
    %162 = arith.negf %161 : vector<2x128xf32>
    %163 = math.exp %162 : vector<2x128xf32>
    %cst_82 = arith.constant 1.000000e+00 : f32
    %164 = vector.broadcast %cst_82 : f32 to vector<2x128xf32>
    %165 = arith.addf %164, %163 : vector<2x128xf32>
    %166 = arith.divf %164, %165 : vector<2x128xf32>
    %167 = vector.extract_strided_slice %160 {offsets = [0, 128], sizes = [2, 128], strides = [1, 1]} : vector<2x512xf32> to vector<2x128xf32>
    %168 = arith.negf %167 : vector<2x128xf32>
    %169 = math.exp %168 : vector<2x128xf32>
    %cst_83 = arith.constant 1.000000e+00 : f32
    %170 = vector.broadcast %cst_83 : f32 to vector<2x128xf32>
    %171 = arith.addf %170, %169 : vector<2x128xf32>
    %172 = arith.divf %170, %171 : vector<2x128xf32>
    %173 = vector.extract_strided_slice %160 {offsets = [0, 256], sizes = [2, 128], strides = [1, 1]} : vector<2x512xf32> to vector<2x128xf32>
    %174 = math.tanh %173 : vector<2x128xf32>
    %175 = vector.extract_strided_slice %160 {offsets = [0, 384], sizes = [2, 128], strides = [1, 1]} : vector<2x512xf32> to vector<2x128xf32>
    %176 = arith.negf %175 : vector<2x128xf32>
    %177 = math.exp %176 : vector<2x128xf32>
    %cst_84 = arith.constant 1.000000e+00 : f32
    %178 = vector.broadcast %cst_84 : f32 to vector<2x128xf32>
    %179 = arith.addf %178, %177 : vector<2x128xf32>
    %180 = arith.divf %178, %179 : vector<2x128xf32>
    %181 = arith.mulf %172, %149 : vector<2x128xf32>
    %182 = arith.mulf %166, %174 : vector<2x128xf32>
    %183 = arith.addf %181, %182 : vector<2x128xf32>
    %184 = math.tanh %183 : vector<2x128xf32>
    %185 = arith.mulf %180, %184 : vector<2x128xf32>
    %186 = arith.index_cast %c2_i32 : i32 to index
    %c0_85 = arith.constant 0 : index
    %c0_86 = arith.constant 0 : index
    %187 = vector.load %arg19[%186, %c0_85, %c0_86] : memref<4x2x128xf32, #tpu.memory_space<vmem>>, vector<1x2x128xf32>
    %188 = vector.shape_cast %187 : vector<1x2x128xf32> to vector<2x128xf32>
    %189 = vector.shape_cast %185 : vector<2x128xf32> to vector<1x2x128xf32>
    tpu.vector_store %arg19[%186, %c0_85, %c0_86], %189 {strides = array<i32>} : memref<4x2x128xf32, #tpu.memory_space<vmem>>, vector<1x2x128xf32>,
    %c3_i32 = arith.constant 3 : i32
    %190 = arith.index_cast %c3_i32 : i32 to index
    %c0_87 = arith.constant 0 : index
    %c0_88 = arith.constant 0 : index
    %191 = vector.load %arg20[%190, %c0_87, %c0_88] : memref<4x2x512xf32, #tpu.memory_space<vmem>>, vector<1x2x512xf32>
    %192 = vector.shape_cast %191 : vector<1x2x512xf32> to vector<2x512xf32>
    %cst_89 = arith.constant dense<0.000000e+00> : vector<2x512xf32>
    %193 = tpu.matmul %185, %85, %cst_89 {dimension_numbers = #tpu.dot_dimension_numbers<[1], [0], [0], [1], [0, 0, 1, 1], [], []>} : vector<2x128xf32>, vector<128x512xf32>, vector<2x512xf32> -> vector<2x512xf32>
    %194 = arith.addf %192, %193 : vector<2x512xf32>
    %195 = vector.extract_strided_slice %194 {offsets = [0, 0], sizes = [2, 128], strides = [1, 1]} : vector<2x512xf32> to vector<2x128xf32>
    %196 = arith.negf %195 : vector<2x128xf32>
    %197 = math.exp %196 : vector<2x128xf32>
    %cst_90 = arith.constant 1.000000e+00 : f32
    %198 = vector.broadcast %cst_90 : f32 to vector<2x128xf32>
    %199 = arith.addf %198, %197 : vector<2x128xf32>
    %200 = arith.divf %198, %199 : vector<2x128xf32>
    %201 = vector.extract_strided_slice %194 {offsets = [0, 128], sizes = [2, 128], strides = [1, 1]} : vector<2x512xf32> to vector<2x128xf32>
    %202 = arith.negf %201 : vector<2x128xf32>
    %203 = math.exp %202 : vector<2x128xf32>
    %cst_91 = arith.constant 1.000000e+00 : f32
    %204 = vector.broadcast %cst_91 : f32 to vector<2x128xf32>
    %205 = arith.addf %204, %203 : vector<2x128xf32>
    %206 = arith.divf %204, %205 : vector<2x128xf32>
    %207 = vector.extract_strided_slice %194 {offsets = [0, 256], sizes = [2, 128], strides = [1, 1]} : vector<2x512xf32> to vector<2x128xf32>
    %208 = math.tanh %207 : vector<2x128xf32>
    %209 = vector.extract_strided_slice %194 {offsets = [0, 384], sizes = [2, 128], strides = [1, 1]} : vector<2x512xf32> to vector<2x128xf32>
    %210 = arith.negf %209 : vector<2x128xf32>
    %211 = math.exp %210 : vector<2x128xf32>
    %cst_92 = arith.constant 1.000000e+00 : f32
    %212 = vector.broadcast %cst_92 : f32 to vector<2x128xf32>
    %213 = arith.addf %212, %211 : vector<2x128xf32>
    %214 = arith.divf %212, %213 : vector<2x128xf32>
    %215 = arith.mulf %206, %183 : vector<2x128xf32>
    %216 = arith.mulf %200, %208 : vector<2x128xf32>
    %217 = arith.addf %215, %216 : vector<2x128xf32>
    %218 = math.tanh %217 : vector<2x128xf32>
    %219 = arith.mulf %214, %218 : vector<2x128xf32>
    %220 = arith.index_cast %c3_i32 : i32 to index
    %c0_93 = arith.constant 0 : index
    %c0_94 = arith.constant 0 : index
    %221 = vector.load %arg19[%220, %c0_93, %c0_94] : memref<4x2x128xf32, #tpu.memory_space<vmem>>, vector<1x2x128xf32>
    %222 = vector.shape_cast %221 : vector<1x2x128xf32> to vector<2x128xf32>
    %223 = vector.shape_cast %219 : vector<2x128xf32> to vector<1x2x128xf32>
    tpu.vector_store %arg19[%220, %c0_93, %c0_94], %223 {strides = array<i32>} : memref<4x2x128xf32, #tpu.memory_space<vmem>>, vector<1x2x128xf32>,
    %c4_i32 = arith.constant 4 : i32
    return
  }
  func.func @transform_0(%arg0: i32) -> (i32, i32) {
    %c0_i32 = arith.constant 0 : i32
    %c0_i32_0 = arith.constant 0 : i32
    %c0_i32_1 = arith.constant 0 : i32
    return %c0_i32, %c0_i32_0 : i32, i32
  }
  func.func @transform_1(%arg0: i32) -> (i32, i32) {
    %c0_i32 = arith.constant 0 : i32
    %c0_i32_0 = arith.constant 0 : i32
    %c0_i32_1 = arith.constant 0 : i32
    return %c0_i32, %c0_i32_0 : i32, i32
  }
  func.func @transform_2(%arg0: i32) -> (i32, i32) {
    %c0_i32 = arith.constant 0 : i32
    %c0_i32_0 = arith.constant 0 : i32
    %c0_i32_1 = arith.constant 0 : i32
    return %c0_i32, %c0_i32_0 : i32, i32
  }
  func.func @transform_3(%arg0: i32) -> (i32, i32) {
    %c0_i32 = arith.constant 0 : i32
    %c0_i32_0 = arith.constant 0 : i32
    %c0_i32_1 = arith.constant 0 : i32
    return %c0_i32, %c0_i32_0 : i32, i32
  }
  func.func @transform_4(%arg0: i32) -> (i32, i32) {
    %c0_i32 = arith.constant 0 : i32
    %c0_i32_0 = arith.constant 0 : i32
    %c0_i32_1 = arith.constant 0 : i32
    return %c0_i32, %c0_i32_0 : i32, i32
  }
  func.func @transform_5(%arg0: i32) -> (i32, i32) {
    %c0_i32 = arith.constant 0 : i32
    %c0_i32_0 = arith.constant 0 : i32
    %c0_i32_1 = arith.constant 0 : i32
    return %c0_i32, %c0_i32_0 : i32, i32
  }
  func.func @transform_6(%arg0: i32) -> (i32, i32) {
    %c0_i32 = arith.constant 0 : i32
    %c0_i32_0 = arith.constant 0 : i32
    %c0_i32_1 = arith.constant 0 : i32
    return %c0_i32, %c0_i32_0 : i32, i32
  }
  func.func @transform_7(%arg0: i32) -> (i32, i32) {
    %c0_i32 = arith.constant 0 : i32
    %c0_i32_0 = arith.constant 0 : i32
    %c0_i32_1 = arith.constant 0 : i32
    return %c0_i32, %c0_i32_0 : i32, i32
  }
  func.func @transform_8(%arg0: i32) -> (i32, i32) {
    %c0_i32 = arith.constant 0 : i32
    %c0_i32_0 = arith.constant 0 : i32
    %c0_i32_1 = arith.constant 0 : i32
    return %c0_i32, %c0_i32_0 : i32, i32
  }
  func.func @transform_9(%arg0: i32) -> (i32, i32) {
    %c0_i32 = arith.constant 0 : i32
    %c0_i32_0 = arith.constant 0 : i32
    %c0_i32_1 = arith.constant 0 : i32
    return %c0_i32, %c0_i32_0 : i32, i32
  }
  func.func @transform_10(%arg0: i32) -> (i32, i32) {
    %c0_i32 = arith.constant 0 : i32
    %c0_i32_0 = arith.constant 0 : i32
    %c0_i32_1 = arith.constant 0 : i32
    return %c0_i32, %c0_i32_0 : i32, i32
  }
  func.func @transform_11(%arg0: i32) -> (i32, i32) {
    %c0_i32 = arith.constant 0 : i32
    %c0_i32_0 = arith.constant 0 : i32
    %c0_i32_1 = arith.constant 0 : i32
    return %c0_i32, %c0_i32_0 : i32, i32
  }
  func.func @transform_12(%arg0: i32) -> (i32, i32) {
    %c0_i32 = arith.constant 0 : i32
    %c0_i32_0 = arith.constant 0 : i32
    %c0_i32_1 = arith.constant 0 : i32
    return %c0_i32, %c0_i32_0 : i32, i32
  }
  func.func @transform_13(%arg0: i32) -> (i32, i32) {
    %c0_i32 = arith.constant 0 : i32
    %c0_i32_0 = arith.constant 0 : i32
    %c0_i32_1 = arith.constant 0 : i32
    return %c0_i32, %c0_i32_0 : i32, i32
  }
  func.func @transform_14(%arg0: i32) -> (i32, i32) {
    %c0_i32 = arith.constant 0 : i32
    %c0_i32_0 = arith.constant 0 : i32
    %c0_i32_1 = arith.constant 0 : i32
    return %c0_i32, %c0_i32_0 : i32, i32
  }
  func.func @transform_15(%arg0: i32) -> (i32, i32) {
    %c0_i32 = arith.constant 0 : i32
    %c0_i32_0 = arith.constant 0 : i32
    %c0_i32_1 = arith.constant 0 : i32
    return %c0_i32, %c0_i32_0 : i32, i32
  }
  func.func @transform_16(%arg0: i32) -> (i32, i32) {
    %c0_i32 = arith.constant 0 : i32
    %c0_i32_0 = arith.constant 0 : i32
    %c0_i32_1 = arith.constant 0 : i32
    return %c0_i32, %c0_i32_0 : i32, i32
  }
  func.func @transform_17(%arg0: i32) -> (i32, i32) {
    %c0_i32 = arith.constant 0 : i32
    %c0_i32_0 = arith.constant 0 : i32
    %c0_i32_1 = arith.constant 0 : i32
    return %c0_i32, %c0_i32_0 : i32, i32
  }
  func.func @transform_18(%arg0: i32) -> (i32, i32, i32) {
    %c0_i32 = arith.constant 0 : i32
    %c0_i32_0 = arith.constant 0 : i32
    %c0_i32_1 = arith.constant 0 : i32
    %c0_i32_2 = arith.constant 0 : i32
    return %c0_i32, %c0_i32_0, %c0_i32_1 : i32, i32, i32
  }
}

</mosaic_0001>

<bundles_post_ra>
// kernel: lstm_encoder_forward.4
= control target key start
LH: loop header
LB: loop body
LE: loop exit
PB: predicated region body
PF: predicated region fallthrough
CT: control target
= control target key end

     0   :  { %s996_s12 = smov 0   ;;  %s998_s13 = smov 0   ;;  %s1144_s0 = inlined_call_operand.vmem [shape: bf16[16,8192], index: 0, kind: input, shape index: {}]   ;;  %s1145_s1 = inlined_call_operand.vmem [shape: bf16[4,16], index: 1, kind: input, shape index: {}]   ;;  %s1146_s2 = inlined_call_operand.vmem [shape: f32[4,1], index: 2, kind: input, shape index: {}]   ;;  %s1147_s3 = inlined_call_operand.vmem [shape: bf16[4,8192], index: 3, kind: output, shape index: {}]  }
   0x1   :  { %s1000_s14 = smov 0  }
   0x2 LB: > { %s877_s15 = sadd.s32 4294967295, %s972_s14   ;;  %s1013_s16 = sadd.s32 1, %s972_s14   ;;  %s972_s14 = sphi %s1000_s14, %s1150_s14   ;;  %s968_s13 = sphi %s998_s13, %s1149_s13   ;;  %s964_s12 = sphi %s996_s12, %s1148_s12  }
   0x3   : > { %s17_s17 = ssub.s32 %s972_s14, %s1013_s16  ;;  %s20_s18 = sadd.s32 1, %s968_s13 }
   0x4   : > { %p18_p0 = scmp.eq.s32.totalorder %s17_s17, 0  ;;  %p27_p1 = scmp.ne.s32.totalorder %s968_s13, %s964_s12 }
   0x5   : > { %p28_p2 = scmp.eq.s32.totalorder %s972_s14, 0  ;;  %p880_p4 = scmp.ge.s32.totalorder %s972_s14, 4 }
   0x6   : > { %s1022_s19 = scalar_select %p18_p0, %s968_s13, %s20_s18  }
   0x7   : > { %p29_p3 = por %p28_p2, %p27_p1  ;;  %127 = sbr.rel (%p880_p4) target bundleno = 26 (0x1a), region = 24 }
   0xe   : > { %130 = sbr.rel (!%p29_p3) target bundleno = 26 (0x1a), region = 28  ;;  %s132_s20 = sand.u32 (%p29_p3), 1, %s968_s13  }
   0xf   : > { %s922_s21 = sshll.u32 (%p29_p3), %s972_s14, 6  ;;  %s881_s22 = sshll.u32 (%p29_p3), %s132_s20, 7 }
  0x10   : > { %s1030_s25 = scalar_lea.vmem (%p29_p3), %s1144_s0, %s922_s21  ;;  %s134_s26 = scalar_lea.vmem (%p29_p3), [#allocation2], %s881_s22 }
  0x11   : > { %v150_v0 = vld [vmem:[%s1030_s25] sm:$0xff] (%p29_p3)  ;;  %v152_v1 = vld [vmem:[%s1030_s25 + $0x8] sm:$0xff] (%p29_p3)  ;;  %v154_v2 = vld [vmem:[%s1030_s25 + $0x10] sm:$0xff] (%p29_p3) }
  0x12   : > { %151 = vst [vmem:[%s134_s26] sm:$0xff] (%p29_p3), %v150_v0  ;;  %153 = vst [vmem:[%s134_s26 + $0x8] sm:$0xff] (%p29_p3), %v152_v1  ;;  %v156_v3 = vld [vmem:[%s1030_s25 + $0x18] sm:$0xff] (%p29_p3)  ;;  %v158_v4 = vld [vmem:[%s1030_s25 + $0x20] sm:$0xff] (%p29_p3) }
  0x13   : > { %155 = vst [vmem:[%s134_s26 + $0x10] sm:$0xff] (%p29_p3), %v154_v2  ;;  %v160_v5 = vld [vmem:[%s1030_s25 + $0x28] sm:$0xff] (%p29_p3)  ;;  %157 = vst [vmem:[%s134_s26 + $0x18] sm:$0xff] (%p29_p3), %v156_v3  ;;  %v162_v6 = vld [vmem:[%s1030_s25 + $0x30] sm:$0xff] (%p29_p3) }
  0x14   : > { %159 = vst [vmem:[%s134_s26 + $0x20] sm:$0xff] (%p29_p3), %v158_v4  ;;  %161 = vst [vmem:[%s134_s26 + $0x28] sm:$0xff] (%p29_p3), %v160_v5  ;;  %v164_v7 = vld [vmem:[%s1030_s25 + $0x38] sm:$0xff] (%p29_p3)  ;;  %v166_v8 = vld [vmem:[%s1030_s25 + $0x100] sm:$0xff] (%p29_p3) }
  0x15   : > { %163 = vst [vmem:[%s134_s26 + $0x30] sm:$0xff] %v162_v6  ;;  %165 = vst [vmem:[%s134_s26 + $0x38] sm:$0xff] %v164_v7  ;;  %v168_v9 = vld [vmem:[%s1030_s25 + $0x108] sm:$0xff]  ;;  %v170_v10 = vld [vmem:[%s1030_s25 + $0x110] sm:$0xff] }
  0x16   : > { %167 = vst [vmem:[%s134_s26 + $0x40] sm:$0xff] %v166_v8  ;;  %v172_v11 = vld [vmem:[%s1030_s25 + $0x118] sm:$0xff]  ;;  %169 = vst [vmem:[%s134_s26 + $0x48] sm:$0xff] %v168_v9  ;;  %v174_v12 = vld [vmem:[%s1030_s25 + $0x120] sm:$0xff] }
  0x17   : > { %171 = vst [vmem:[%s134_s26 + $0x50] sm:$0xff] %v170_v10  ;;  %173 = vst [vmem:[%s134_s26 + $0x58] sm:$0xff] %v172_v11  ;;  %v176_v13 = vld [vmem:[%s1030_s25 + $0x128] sm:$0xff]  ;;  %v178_v14 = vld [vmem:[%s1030_s25 + $0x130] sm:$0xff] }
  0x18   : > { %175 = vst [vmem:[%s134_s26 + $0x60] sm:$0xff] %v174_v12  ;;  %177 = vst [vmem:[%s134_s26 + $0x68] sm:$0xff] %v176_v13  ;;  %v180_v15 = vld [vmem:[%s1030_s25 + $0x138] sm:$0xff] }
  0x19   : > { %179 = vst [vmem:[%s134_s26 + $0x70] sm:$0xff] %v178_v14  ;;  %181 = vst [vmem:[%s134_s26 + $0x78] sm:$0xff] %v180_v15 }
  0x1a PF: > { %p884_p5 = scmp.ge.s32.totalorder %s972_s14, 1  ;;  %p186_p6 = scmp.lt.s32.totalorder %s972_s14, 5 }
  0x1c   : > { %p187_p7 = pnand %p884_p5, %p186_p6 }
  0x1d   : > { %s193_s27 = sand.u32 (!%p187_p7), 1, %s964_s12   ;;  %v974_v16 = vmov (!%p187_p7), 0   ;;  %v241_v17 = vld [vmem:[%s1146_s2] sm:$0xf] (!%p187_p7)  ;;  %vm327_vm0 = vcmask (!%p187_p7), 130048   ;;  %s886_s7 = sshll.u32 (!%p187_p7), %s877_s15, 4  ;;  %v744_v53 = vlaneseq (!%p187_p7) }
  0x1e   : > { %190 = sbr.rel (%p187_p7) target bundleno = 290 (0x122), region = 51  ;;  %s885_s28 = sshll.u32 (!%p187_p7), %s193_s27, 7  ;;  %363 = vmatprep.mubr.bf16.mxu0 (!%p187_p7), %v974_v16  ;;  %404 = vmatprep.mubr.bf16.mxu1 (!%p187_p7), %v974_v16  ;;  %v224_v34 = vld [vmem:[%s1145_s1] sm:$0x3] (!%p187_p7)  ;;  %v975_v51 = vmov (!%p187_p7), 1983009808  }
  0x1f   : > { %949 = vset.pattern.permute.xlu0 (!%p187_p7), %v974_v16  ;;  %s1057_s4 = scalar_lea.vmem (!%p187_p7), [#allocation2], %s885_s28  ;;  %v742_v52 = vunpack.c.l.s4 (!%p187_p7), %v975_v51  ;;  %p218_p8 = scmp.lt.s32.totalorder (!%p187_p7), %s886_s7, 63  ;;  %v745_v60 = vshrl.u32 (!%p187_p7), %v744_v53, 7 }
  0x20   : > { %v225_v18 = vld [vmem:[%s1057_s4] sm:$0xff] (!%p187_p7)  ;;  %v226_v20 = vld [vmem:[%s1057_s4 + $0x8] sm:$0xff] (!%p187_p7)  ;;  %244 = vperm.xlu0 (!%p187_p7), %949, %v241_v17   ;;  %v227_v24 = vld [vmem:[%s1057_s4 + $0x10] sm:$0xff] (!%p187_p7) }
  0x21   : > { %v233_v19 = vld [vmem:[%s1057_s4 + $0x40] sm:$0xff] (!%p187_p7)  ;;  %v234_v22 = vld [vmem:[%s1057_s4 + $0x48] sm:$0xff] (!%p187_p7)  ;;  %v235_v25 = vld [vmem:[%s1057_s4 + $0x50] sm:$0xff] (!%p187_p7)  ;;  %v743_v59 = vunpack.c.0.s8 (!%p187_p7), %v742_v52 }
  0x22   : > { %v889_v21 = vcombine.high (!%p187_p7), %v225_v18, %v233_v19  ;;  %v888_v23 = vcombine.low (!%p187_p7), %v225_v18, %v233_v19  ;;  %v891_v26 = vcombine.high (!%p187_p7), %v226_v20, %v234_v22  ;;  %v890_v27 = vcombine.low (!%p187_p7), %v226_v20, %v234_v22  ;;  %v228_v29 = vld [vmem:[%s1057_s4 + $0x18] sm:$0xff] (!%p187_p7)  ;;  %v229_v32 = vld [vmem:[%s1057_s4 + $0x20] sm:$0xff] (!%p187_p7)  ;;  %v230_v36 = vld [vmem:[%s1057_s4 + $0x28] sm:$0xff] (!%p187_p7) }
  0x23   : > { %v893_v28 = vcombine.high (!%p187_p7), %v227_v24, %v235_v25  ;;  %v236_v30 = vld [vmem:[%s1057_s4 + $0x58] sm:$0xff] (!%p187_p7)  ;;  %v237_v33 = vld [vmem:[%s1057_s4 + $0x60] sm:$0xff] (!%p187_p7)  ;;  %v892_v35 = vcombine.low (!%p187_p7), %v227_v24, %v235_v25  ;;  %v238_v37 = vld [vmem:[%s1057_s4 + $0x68] sm:$0xff] (!%p187_p7)  ;;  %v1102_v8 = vsub.s32 (!%p187_p7), %v743_v59, %v745_v60 }
  0x24   : > { %331 = vmatprep.subr.bf16.mxu0 (!%p187_p7), %v889_v21  ;;  %v895_v31 = vcombine.high (!%p187_p7), %v228_v29, %v236_v30  ;;  %372 = vmatprep.subr.bf16.mxu1 (!%p187_p7), %v891_v26  ;;  %v894_v38 = vcombine.low (!%p187_p7), %v228_v29, %v236_v30  ;;  %v897_v39 = vcombine.high (!%p187_p7), %v229_v32, %v237_v33  ;;  %v231_v41 = vld [vmem:[%s1057_s4 + $0x30] sm:$0xff] (!%p187_p7)  ;;  %v232_v44 = vld [vmem:[%s1057_s4 + $0x38] sm:$0xff] (!%p187_p7) }
  0x25   : > { %332 = vmatpush1.bf16.msra.mxu0 %v888_v23  ;;  %373 = vmatpush1.bf16.msra.mxu1 %v890_v27  ;;  %v899_v40 = vcombine.high %v230_v36, %v238_v37  ;;  %v239_v42 = vld [vmem:[%s1057_s4 + $0x70] sm:$0xff]  ;;  %v896_v43 = vcombine.low %v229_v32, %v237_v33  ;;  %v240_v45 = vld [vmem:[%s1057_s4 + $0x78] sm:$0xff]  ;;  %v898_v46 = vcombine.low %v230_v36, %v238_v37  ;;  %s1152_s7 = smov (!%p218_p8, %s886_s7), 63 }
  0x26   : > { %413 = vmatprep.subr.bf16.mxu0 %v893_v28  ;;  %454 = vmatprep.subr.bf16.mxu1 %v895_v31  ;;  %v901_v47 = vcombine.high %v231_v41, %v239_v42  ;;  %v903_v48 = vcombine.high %v232_v44, %v240_v45  ;;  %v900_v49 = vcombine.low %v231_v41, %v239_v42  ;;  %s887_s8 = sshll.u32 %s1152_s7, 1 }
  0x27   : > { %v902_v50 = vcombine.low %v232_v44, %v240_v45  ;;  %s1113_s11 = scalar_lea.vmem %s1147_s3, %s887_s8 }
  0x28   : > { %904 = vmatmul.mubr.msk.bf16.vlgmr.msra.gmra.mrb[0].mxu0 %vm327_vm0, %v224_v34  ;;  %905 = vmatmul.mubr.msk.bf16.vlgmr.msra.gmra.mrb[0].mxu1 %vm327_vm0, %v224_v34 }
  0x29   : > { %414 = vmatpush1.bf16.msra.mxu0 %v892_v35  ;;  %455 = vmatpush1.bf16.msra.mxu1 %v894_v38 }
  0x2a   : > { %445 = vmatprep.mubr.bf16.mxu0 %v974_v16  ;;  %486 = vmatprep.mubr.bf16.mxu1 %v974_v16 }
  0x2b   : > { %495 = vmatprep.subr.bf16.mxu0 %v897_v39  ;;  %536 = vmatprep.subr.bf16.mxu1 %v899_v40 }
  0x30   : > { %906 = vmatmul.mubr.msk.bf16.vlgmr.msra.gmra.mrb[4].mxu0 %vm327_vm0, %v224_v34  ;;  %907 = vmatmul.mubr.msk.bf16.vlgmr.msra.gmra.mrb[4].mxu1 %vm327_vm0, %v224_v34 }
  0x31   : > { %496 = vmatpush1.bf16.msra.mxu0 %v896_v43  ;;  %537 = vmatpush1.bf16.msra.mxu1 %v898_v46 }
  0x32   : > { %527 = vmatprep.mubr.bf16.mxu0 %v974_v16  ;;  %568 = vmatprep.mubr.bf16.mxu1 %v974_v16 }
  0x33   : > { %577 = vmatprep.subr.bf16.mxu0 %v901_v47  ;;  %618 = vmatprep.subr.bf16.mxu1 %v903_v48 }
  0x38   : > { %908 = vmatmul.mubr.msk.bf16.vlgmr.msra.gmra.mrb[8].mxu0 %vm327_vm0, %v224_v34  ;;  %909 = vmatmul.mubr.msk.bf16.vlgmr.msra.gmra.mrb[8].mxu1 %vm327_vm0, %v224_v34 }
  0x39   : > { %578 = vmatpush1.bf16.msra.mxu0 %v900_v49  ;;  %619 = vmatpush1.bf16.msra.mxu1 %v902_v50 }
  0x3a   : > { %609 = vmatprep.mubr.bf16.mxu0 %v974_v16  ;;  %650 = vmatprep.mubr.bf16.mxu1 %v974_v16 }
  0x40   : > { %910 = vmatmul.mubr.msk.bf16.vlgmr.msra.gmra.mrb[12].mxu0 %vm327_vm0, %v224_v34  ;;  %911 = vmatmul.mubr.msk.bf16.vlgmr.msra.gmra.mrb[12].mxu1 %vm327_vm0, %v224_v34 }
  0x9f   : > { %v1094_v54 = vpop.permute.xlu0 %244 }
  0xfb   : > { %v365_v55 = vpop.f32.mrb[0].mxu0  ;;  %v406_v57 = vpop.f32.mrb[0].mxu1 }
  0xfc   : > { %v366_v56 = vadd.f32 %v365_v55, %v1094_v54  ;;  %v367_v58 = vpop.f32.mrb[1].mxu0  ;;  %v407_v61 = vadd.f32 %v406_v57, %v1094_v54  ;;  %v408_v63 = vpop.f32.mrb[1].mxu1 }
  0xfd   : > { %v368_v62 = vadd.f32 %v367_v58, %v1094_v54  ;;  %v369_v0 = vpop.f32.mrb[2].mxu0  ;;  %v409_v2 = vadd.f32 %v408_v63, %v1094_v54  ;;  %v410_v3 = vpop.f32.mrb[2].mxu1 }
  0xfe   : > { %vm659_vm1 = vcmp.ge.f32.partialorder %v366_v56, 0.0  ;;  %v675_v1 = vmul.f32 0.01, %v366_v56  ;;  %v370_v4 = vpop.f32.mrb[3].mxu0  ;;  %vm661_vm2 = vcmp.ge.f32.partialorder %v407_v61, 0.0  ;;  %v411_v10 = vpop.f32.mrb[3].mxu1 }
  0xff   : > { %v677_v5 = vmul.f32 0.01, %v407_v61  ;;  %vm660_vm3 = vcmp.ge.f32.partialorder %v368_v62, 0.0  ;;  %v676_v6 = vmul.f32 0.01, %v368_v62  ;;  %vm662_vm4 = vcmp.ge.f32.partialorder %v409_v2, 0.0 }
 0x100   : > { %v691_v7 = vsel %vm659_vm1, %v366_v56, %v675_v1  ;;  %v678_v9 = vmul.f32 0.01, %v409_v2 }
 0x101   : > { %v693_v11 = vsel %vm661_vm2, %v407_v61, %v677_v5  ;;  %v692_v12 = vsel %vm660_vm3, %v368_v62, %v676_v6 }
 0x102   : > { %v912_v13 = vpack.c.bf16 %v692_v12, %v691_v7  ;;  %v694_v14 = vsel %vm662_vm4, %v409_v2, %v678_v9 }
 0x103   : > { %v913_v15 = vpack.c.bf16 %v694_v14, %v693_v11  ;;  %v447_v16 = vpop.f32.mrb[4].mxu0  ;;  %v488_v19 = vpop.f32.mrb[4].mxu1 }
 0x104   : > { %v747_v17 = vrot.slane %v912_v13, %v1102_v8  ;;  %v448_v18 = vadd.f32 %v447_v16, %v1094_v54  ;;  %v449_v20 = vpop.f32.mrb[5].mxu0  ;;  %v489_v22 = vadd.f32 %v488_v19, %v1094_v54  ;;  %v490_v24 = vpop.f32.mrb[5].mxu1 }
 0x105   : > { %v754_v21 = vrot.slane %v913_v15, %v1102_v8  ;;  %v450_v23 = vadd.f32 %v449_v20, %v1094_v54  ;;  %v451_v25 = vpop.f32.mrb[6].mxu0  ;;  %v491_v27 = vadd.f32 %v490_v24, %v1094_v54  ;;  %v492_v28 = vpop.f32.mrb[6].mxu1 }
 0x106   : > { %vm663_vm5 = vcmp.ge.f32.partialorder %v448_v18, 0.0  ;;  %v679_v26 = vmul.f32 0.01, %v448_v18  ;;  %v452_v29 = vpop.f32.mrb[7].mxu0  ;;  %vm665_vm6 = vcmp.ge.f32.partialorder %v489_v22, 0.0  ;;  %v493_v32 = vpop.f32.mrb[7].mxu1 }
 0x107   : > { %v755_v30 = vcombine.low %v747_v17, %v754_v21  ;;  %v681_v31 = vmul.f32 0.01, %v489_v22  ;;  %vm664_vm7 = vcmp.ge.f32.partialorder %v450_v23, 0.0  ;;  %v680_v34 = vmul.f32 0.01, %v450_v23 }
 0x108   : > { %v695_v33 = vsel %vm663_vm5, %v448_v18, %v679_v26  ;;  %vm666_vm8 = vcmp.ge.f32.partialorder %v491_v27, 0.0  ;;  %v682_v35 = vmul.f32 0.01, %v491_v27 }
 0x109   : > { %811 = vst [vmem:[%s1113_s11] sm:$0xff] %v755_v30  ;;  %v697_v36 = vsel %vm665_vm6, %v489_v22, %v681_v31  ;;  %v696_v37 = vsel %vm664_vm7, %v450_v23, %v680_v34 }
 0x10a   : > { %v698_v38 = vsel %vm666_vm8, %v491_v27, %v682_v35  ;;  %v914_v39 = vpack.c.bf16 %v696_v37, %v695_v33 }
 0x10b   : > { %v915_v40 = vpack.c.bf16 %v698_v38, %v697_v36  ;;  %v529_v41 = vpop.f32.mrb[8].mxu0  ;;  %v570_v43 = vpop.f32.mrb[8].mxu1 }
 0x10c   : > { %v530_v42 = vadd.f32 %v529_v41, %v1094_v54  ;;  %v531_v44 = vpop.f32.mrb[9].mxu0  ;;  %v764_v45 = vrot.slane %v914_v39, %v1102_v8  ;;  %v571_v47 = vadd.f32 %v570_v43, %v1094_v54  ;;  %v572_v49 = vpop.f32.mrb[9].mxu1 }
 0x10d   : > { %v771_v46 = vrot.slane %v915_v40, %v1102_v8  ;;  %v532_v48 = vadd.f32 %v531_v44, %v1094_v54  ;;  %v533_v50 = vpop.f32.mrb[10].mxu0  ;;  %v573_v52 = vadd.f32 %v572_v49, %v1094_v54  ;;  %v574_v53 = vpop.f32.mrb[10].mxu1 }
 0x10e   : > { %vm667_vm9 = vcmp.ge.f32.partialorder %v530_v42, 0.0  ;;  %v683_v51 = vmul.f32 0.01, %v530_v42  ;;  %v534_v55 = vpop.f32.mrb[11].mxu0  ;;  %vm669_vm10 = vcmp.ge.f32.partialorder %v571_v47, 0.0  ;;  %v575_v58 = vpop.f32.mrb[11].mxu1 }
 0x10f   : > { %v772_v56 = vcombine.low %v764_v45, %v771_v46  ;;  %v685_v57 = vmul.f32 0.01, %v571_v47  ;;  %vm668_vm11 = vcmp.ge.f32.partialorder %v532_v48, 0.0  ;;  %v684_v60 = vmul.f32 0.01, %v532_v48 }
 0x110   : > { %v699_v59 = vsel %vm667_vm9, %v530_v42, %v683_v51  ;;  %vm670_vm12 = vcmp.ge.f32.partialorder %v573_v52, 0.0  ;;  %v686_v61 = vmul.f32 0.01, %v573_v52 }
 0x111   : > { %812 = vst [vmem:[%s1113_s11 + $0x8] sm:$0xff] %v772_v56  ;;  %v701_v62 = vsel %vm669_vm10, %v571_v47, %v685_v57  ;;  %v700_v63 = vsel %vm668_vm11, %v532_v48, %v684_v60 }
 0x112   : > { %v702_v0 = vsel %vm670_vm12, %v573_v52, %v686_v61  ;;  %v916_v1 = vpack.c.bf16 %v700_v63, %v699_v59 }
 0x113   : > { %v917_v2 = vpack.c.bf16 %v702_v0, %v701_v62  ;;  %v611_v3 = vpop.f32.mrb[12].mxu0  ;;  %v652_v5 = vpop.f32.mrb[12].mxu1 }
 0x114   : > { %v612_v4 = vadd.f32 %v611_v3, %v1094_v54  ;;  %v613_v6 = vpop.f32.mrb[13].mxu0  ;;  %v781_v7 = vrot.slane %v916_v1, %v1102_v8  ;;  %v653_v10 = vadd.f32 %v652_v5, %v1094_v54  ;;  %v654_v12 = vpop.f32.mrb[13].mxu1 }
 0x115   : > { %v788_v9 = vrot.slane %v917_v2, %v1102_v8  ;;  %v614_v11 = vadd.f32 %v613_v6, %v1094_v54  ;;  %v615_v13 = vpop.f32.mrb[14].mxu0  ;;  %v655_v15 = vadd.f32 %v654_v12, %v1094_v54  ;;  %v656_v16 = vpop.f32.mrb[14].mxu1 }
 0x116   : > { %vm671_vm13 = vcmp.ge.f32.partialorder %v612_v4, 0.0  ;;  %v687_v14 = vmul.f32 0.01, %v612_v4  ;;  %v616_v17 = vpop.f32.mrb[15].mxu0  ;;  %vm673_vm14 = vcmp.ge.f32.partialorder %v653_v10, 0.0  ;;  %v657_v20 = vpop.f32.mrb[15].mxu1 }
 0x117   : > { %v789_v18 = vcombine.low %v781_v7, %v788_v9  ;;  %v689_v19 = vmul.f32 0.01, %v653_v10  ;;  %vm672_vm15 = vcmp.ge.f32.partialorder %v614_v11, 0.0  ;;  %v688_v22 = vmul.f32 0.01, %v614_v11 }
 0x118   : > { %v703_v21 = vsel %vm671_vm13, %v612_v4, %v687_v14  ;;  %vm674_vm0 = vcmp.ge.f32.partialorder %v655_v15, 0.0  ;;  %v690_v23 = vmul.f32 0.01, %v655_v15 }
 0x119   : > { %813 = vst [vmem:[%s1113_s11 + $0x10] sm:$0xff] %v789_v18  ;;  %v705_v24 = vsel %vm673_vm14, %v653_v10, %v689_v19  ;;  %v704_v25 = vsel %vm672_vm15, %v614_v11, %v688_v22 }
 0x11a   : > { %v706_v26 = vsel %vm674_vm0, %v655_v15, %v690_v23  ;;  %v918_v27 = vpack.c.bf16 %v704_v25, %v703_v21 }
 0x11b   : > { %v919_v28 = vpack.c.bf16 %v706_v26, %v705_v24 }
 0x11c   : > { %v798_v54 = vrot.slane %v918_v27, %v1102_v8 }
 0x11d   : > { %v805_v29 = vrot.slane %v919_v28, %v1102_v8 }
 0x11f   : > { %v806_v30 = vcombine.low %v798_v54, %v805_v29 }
 0x121   : > { %814 = vst [vmem:[%s1113_s11 + $0x18] sm:$0xff] %v806_v30 }
 0x122 PF: > { %p10_p9 = scmp.ge.s32.totalorder %s1013_s16, 6   ;;  %s1148_s12 = smov %s968_s13 }
 0x123   : > { %s1149_s13 = smov %s1022_s19  ;;  %s1150_s14 = smov %s1013_s16 }
 0x124   :  { %12 = sbr.rel (!%p10_p9) target bundleno = 2 (0x2), region = 90 }

// kernel: lstm_encoder_forward.5
= control target key start
LH: loop header
LB: loop body
LE: loop exit
PB: predicated region body
PF: predicated region fallthrough
CT: control target
= control target key end

     0   :  { %s874_s12 = smov 0   ;;  %s876_s13 = smov 0   ;;  %s1049_s0 = inlined_call_operand.vmem [shape: bf16[64,2048], index: 0, kind: input, shape index: {}]   ;;  %s1050_s1 = inlined_call_operand.vmem [shape: bf16[8,64], index: 1, kind: input, shape index: {}]   ;;  %s1051_s2 = inlined_call_operand.vmem [shape: f32[8,1], index: 2, kind: input, shape index: {}]   ;;  %s1052_s3 = inlined_call_operand.vmem [shape: bf16[8,2048], index: 3, kind: output, shape index: {}]  }
   0x1   :  { %s878_s14 = smov 0  }
   0x2 LB: > { %s745_s15 = sadd.s32 4294967295, %s851_s14   ;;  %s891_s16 = sadd.s32 1, %s851_s14   ;;  %s851_s14 = sphi %s878_s14, %s1055_s14   ;;  %s847_s13 = sphi %s876_s13, %s1054_s13   ;;  %s843_s12 = sphi %s874_s12, %s1053_s12  }
   0x3   : > { %s17_s17 = ssub.s32 %s851_s14, %s891_s16  ;;  %s20_s18 = sadd.s32 1, %s847_s13 }
   0x4   : > { %p18_p0 = scmp.eq.s32.totalorder %s17_s17, 0  ;;  %p27_p1 = scmp.ne.s32.totalorder %s847_s13, %s843_s12 }
   0x5   : > { %p28_p2 = scmp.eq.s32.totalorder %s851_s14, 0  ;;  %p748_p4 = scmp.ge.s32.totalorder %s851_s14, 2 }
   0x6   : > { %s900_s19 = scalar_select %p18_p0, %s847_s13, %s20_s18  }
   0x7   : > { %p29_p3 = por %p28_p2, %p27_p1  ;;  %127 = sbr.rel (%p748_p4) target bundleno = 34 (0x22), region = 24 }
   0xe   : > { %130 = sbr.rel (!%p29_p3) target bundleno = 34 (0x22), region = 28  ;;  %s132_s20 = sand.u32 (%p29_p3), 1, %s847_s13  }
   0xf   : > { %s798_s21 = sshll.u32 (%p29_p3), %s851_s14, 5  ;;  %s749_s22 = sshll.u32 (%p29_p3), %s132_s20, 8 }
  0x10   : > { %s908_s25 = scalar_lea.vmem (%p29_p3), %s1049_s0, %s798_s21  ;;  %s913_s26 = scalar_lea.vmem (%p29_p3), [#allocation2], %s749_s22 }
  0x11   : > { %v150_v0 = vld [vmem:[%s908_s25] sm:$0xff] (%p29_p3)  ;;  %v152_v1 = vld [vmem:[%s908_s25 + $0x8] sm:$0xff] (%p29_p3)  ;;  %v154_v2 = vld [vmem:[%s908_s25 + $0x10] sm:$0xff] (%p29_p3) }
  0x12   : > { %151 = vst [vmem:[%s913_s26] sm:$0xff] (%p29_p3), %v150_v0  ;;  %153 = vst [vmem:[%s913_s26 + $0x8] sm:$0xff] (%p29_p3), %v152_v1  ;;  %v156_v3 = vld [vmem:[%s908_s25 + $0x18] sm:$0xff] (%p29_p3)  ;;  %v158_v4 = vld [vmem:[%s908_s25 + $0x40] sm:$0xff] (%p29_p3) }
  0x13   : > { %155 = vst [vmem:[%s913_s26 + $0x10] sm:$0xff] (%p29_p3), %v154_v2  ;;  %v160_v5 = vld [vmem:[%s908_s25 + $0x48] sm:$0xff] (%p29_p3)  ;;  %157 = vst [vmem:[%s913_s26 + $0x18] sm:$0xff] (%p29_p3), %v156_v3  ;;  %v162_v6 = vld [vmem:[%s908_s25 + $0x50] sm:$0xff] (%p29_p3) }
  0x14   : > { %159 = vst [vmem:[%s913_s26 + $0x20] sm:$0xff] (%p29_p3), %v158_v4  ;;  %161 = vst [vmem:[%s913_s26 + $0x28] sm:$0xff] (%p29_p3), %v160_v5  ;;  %v164_v7 = vld [vmem:[%s908_s25 + $0x58] sm:$0xff] (%p29_p3)  ;;  %v166_v8 = vld [vmem:[%s908_s25 + $0x80] sm:$0xff] (%p29_p3) }
  0x15   : > { %163 = vst [vmem:[%s913_s26 + $0x30] sm:$0xff] %v162_v6  ;;  %165 = vst [vmem:[%s913_s26 + $0x38] sm:$0xff] %v164_v7  ;;  %v168_v9 = vld [vmem:[%s908_s25 + $0x88] sm:$0xff]  ;;  %v170_v10 = vld [vmem:[%s908_s25 + $0x90] sm:$0xff] }
  0x16   : > { %167 = vst [vmem:[%s913_s26 + $0x40] sm:$0xff] %v166_v8  ;;  %v172_v11 = vld [vmem:[%s908_s25 + $0x98] sm:$0xff]  ;;  %169 = vst [vmem:[%s913_s26 + $0x48] sm:$0xff] %v168_v9  ;;  %v174_v12 = vld [vmem:[%s908_s25 + $0xc0] sm:$0xff] }
  0x17   : > { %171 = vst [vmem:[%s913_s26 + $0x50] sm:$0xff] %v170_v10  ;;  %173 = vst [vmem:[%s913_s26 + $0x58] sm:$0xff] %v172_v11  ;;  %v176_v13 = vld [vmem:[%s908_s25 + $0xc8] sm:$0xff]  ;;  %v178_v14 = vld [vmem:[%s908_s25 + $0xd0] sm:$0xff] }
  0x18   : > { %175 = vst [vmem:[%s913_s26 + $0x60] sm:$0xff] %v174_v12  ;;  %177 = vst [vmem:[%s913_s26 + $0x68] sm:$0xff] %v176_v13  ;;  %v180_v15 = vld [vmem:[%s908_s25 + $0xd8] sm:$0xff]  ;;  %v182_v16 = vld [vmem:[%s908_s25 + $0x100] sm:$0xff] }
  0x19   : > { %179 = vst [vmem:[%s913_s26 + $0x70] sm:$0xff] %v178_v14  ;;  %v184_v17 = vld [vmem:[%s908_s25 + $0x108] sm:$0xff]  ;;  %181 = vst [vmem:[%s913_s26 + $0x78] sm:$0xff] %v180_v15  ;;  %v186_v18 = vld [vmem:[%s908_s25 + $0x110] sm:$0xff] }
  0x1a   : > { %183 = vst [vmem:[%s913_s26 + $0x80] sm:$0xff] %v182_v16  ;;  %185 = vst [vmem:[%s913_s26 + $0x88] sm:$0xff] %v184_v17  ;;  %v188_v19 = vld [vmem:[%s908_s25 + $0x118] sm:$0xff]  ;;  %v190_v20 = vld [vmem:[%s908_s25 + $0x140] sm:$0xff] }
  0x1b   : > { %187 = vst [vmem:[%s913_s26 + $0x90] sm:$0xff] %v186_v18  ;;  %189 = vst [vmem:[%s913_s26 + $0x98] sm:$0xff] %v188_v19  ;;  %v192_v21 = vld [vmem:[%s908_s25 + $0x148] sm:$0xff]  ;;  %v194_v22 = vld [vmem:[%s908_s25 + $0x150] sm:$0xff] }
  0x1c   : > { %191 = vst [vmem:[%s913_s26 + $0xa0] sm:$0xff] %v190_v20  ;;  %v196_v23 = vld [vmem:[%s908_s25 + $0x158] sm:$0xff]  ;;  %193 = vst [vmem:[%s913_s26 + $0xa8] sm:$0xff] %v192_v21  ;;  %v198_v24 = vld [vmem:[%s908_s25 + $0x180] sm:$0xff] }
  0x1d   : > { %195 = vst [vmem:[%s913_s26 + $0xb0] sm:$0xff] %v194_v22  ;;  %197 = vst [vmem:[%s913_s26 + $0xb8] sm:$0xff] %v196_v23  ;;  %v200_v25 = vld [vmem:[%s908_s25 + $0x188] sm:$0xff]  ;;  %v202_v26 = vld [vmem:[%s908_s25 + $0x190] sm:$0xff] }
  0x1e   : > { %199 = vst [vmem:[%s913_s26 + $0xc0] sm:$0xff] %v198_v24  ;;  %201 = vst [vmem:[%s913_s26 + $0xc8] sm:$0xff] %v200_v25  ;;  %v204_v27 = vld [vmem:[%s908_s25 + $0x198] sm:$0xff]  ;;  %v206_v28 = vld [vmem:[%s908_s25 + $0x1c0] sm:$0xff] }
  0x1f   : > { %203 = vst [vmem:[%s913_s26 + $0xd0] sm:$0xff] %v202_v26  ;;  %v208_v29 = vld [vmem:[%s908_s25 + $0x1c8] sm:$0xff]  ;;  %205 = vst [vmem:[%s913_s26 + $0xd8] sm:$0xff] %v204_v27  ;;  %v210_v30 = vld [vmem:[%s908_s25 + $0x1d0] sm:$0xff] }
  0x20   : > { %207 = vst [vmem:[%s913_s26 + $0xe0] sm:$0xff] %v206_v28  ;;  %209 = vst [vmem:[%s913_s26 + $0xe8] sm:$0xff] %v208_v29  ;;  %v212_v31 = vld [vmem:[%s908_s25 + $0x1d8] sm:$0xff] }
  0x21   : > { %211 = vst [vmem:[%s913_s26 + $0xf0] sm:$0xff] %v210_v30  ;;  %213 = vst [vmem:[%s913_s26 + $0xf8] sm:$0xff] %v212_v31 }
  0x22 PF: > { %p752_p5 = scmp.ge.s32.totalorder %s851_s14, 1  ;;  %p218_p6 = scmp.lt.s32.totalorder %s851_s14, 3 }
  0x24   : > { %p219_p7 = pnand %p752_p5, %p218_p6 }
  0x25   : > { %s225_s27 = sand.u32 (!%p219_p7), 1, %s843_s12   ;;  %v289_v32 = vld [vmem:[%s1051_s2] sm:$0xff] (!%p219_p7)  ;;  %v853_v33 = vmov (!%p219_p7), 0   ;;  %vm455_vm0 = vcmask (!%p219_p7), 523264   ;;  %s754_s7 = sshll.u32 (!%p219_p7), %s745_s15, 3 }
  0x26   : > { %222 = sbr.rel (%p219_p7) target bundleno = 298 (0x12a), region = 51  ;;  %s753_s30 = sshll.u32 (!%p219_p7), %s225_s27, 8  ;;  %491 = vmatprep.mubr.bf16.mxu0 (!%p219_p7), %v853_v33  ;;  %532 = vmatprep.mubr.bf16.mxu1 (!%p219_p7), %v853_v33  ;;  %v256_v12 = vld [vmem:[%s1050_s1] sm:$0xf] (!%p219_p7) }
  0x27   : > { %828 = vset.pattern.permute.xlu0 (!%p219_p7), %v853_v33  ;;  %s985_s4 = scalar_lea.vmem (!%p219_p7), [#allocation2], %s753_s30  ;;  %p250_p8 = scmp.lt.s32.totalorder (!%p219_p7), %s754_s7, 15 }
  0x28   : > { %v257_v34 = vld [vmem:[%s985_s4] sm:$0xff] (!%p219_p7)  ;;  %v258_v36 = vld [vmem:[%s985_s4 + $0x8] sm:$0xff] (!%p219_p7)  ;;  %292 = vperm.xlu0 (!%p219_p7), %828, %v289_v32   ;;  %v259_v0 = vld [vmem:[%s985_s4 + $0x10] sm:$0xff] (!%p219_p7) }
  0x29   : > { %v261_v35 = vld [vmem:[%s985_s4 + $0x20] sm:$0xff] (!%p219_p7)  ;;  %v262_v38 = vld [vmem:[%s985_s4 + $0x28] sm:$0xff] (!%p219_p7)  ;;  %v263_v1 = vld [vmem:[%s985_s4 + $0x30] sm:$0xff] (!%p219_p7) }
  0x2a   : > { %v757_v37 = vcombine.high (!%p219_p7), %v257_v34, %v261_v35  ;;  %v756_v39 = vcombine.low (!%p219_p7), %v257_v34, %v261_v35  ;;  %v265_v40 = vld [vmem:[%s985_s4 + $0x40] sm:$0xff] (!%p219_p7)  ;;  %v759_v42 = vcombine.high (!%p219_p7), %v258_v36, %v262_v38  ;;  %v758_v43 = vcombine.low (!%p219_p7), %v258_v36, %v262_v38  ;;  %v266_v45 = vld [vmem:[%s985_s4 + $0x48] sm:$0xff] (!%p219_p7)  ;;  %v260_v2 = vld [vmem:[%s985_s4 + $0x18] sm:$0xff] (!%p219_p7) }
  0x2b   : > { %v269_v41 = vld [vmem:[%s985_s4 + $0x60] sm:$0xff] (!%p219_p7)  ;;  %v270_v46 = vld [vmem:[%s985_s4 + $0x68] sm:$0xff] (!%p219_p7)  ;;  %v264_v3 = vld [vmem:[%s985_s4 + $0x38] sm:$0xff] (!%p219_p7)  ;;  %v761_v6 = vcombine.high (!%p219_p7), %v259_v0, %v263_v1  ;;  %v760_v13 = vcombine.low (!%p219_p7), %v259_v0, %v263_v1 }
  0x2c   : > { %v765_v44 = vcombine.high (!%p219_p7), %v265_v40, %v269_v41  ;;  %v273_v47 = vld [vmem:[%s985_s4 + $0x80] sm:$0xff] (!%p219_p7)  ;;  %459 = vmatprep.subr.bf16.mxu0 (!%p219_p7), %v757_v37  ;;  %v767_v48 = vcombine.high (!%p219_p7), %v266_v45, %v270_v46  ;;  %v274_v50 = vld [vmem:[%s985_s4 + $0x88] sm:$0xff] (!%p219_p7)  ;;  %500 = vmatprep.subr.bf16.mxu1 (!%p219_p7), %v759_v42  ;;  %v764_v52 = vcombine.low (!%p219_p7), %v265_v40, %v269_v41  ;;  %v267_v8 = vld [vmem:[%s985_s4 + $0x50] sm:$0xff] (!%p219_p7) }
  0x2d   : > { %v277_v49 = vld [vmem:[%s985_s4 + $0xa0] sm:$0xff]  ;;  %v278_v51 = vld [vmem:[%s985_s4 + $0xa8] sm:$0xff]  ;;  %460 = vmatpush1.bf16.msra.mxu0 %v756_v39  ;;  %501 = vmatpush1.bf16.msra.mxu1 %v758_v43  ;;  %v766_v53 = vcombine.low %v266_v45, %v270_v46  ;;  %v763_v7 = vcombine.high %v260_v2, %v264_v3  ;;  %v271_v9 = vld [vmem:[%s985_s4 + $0x70] sm:$0xff]  ;;  %v762_v14 = vcombine.low %v260_v2, %v264_v3  ;;  %s1057_s7 = smov (!%p250_p8, %s754_s7), 15 }
  0x2e   : > { %461 = vmatprep.subr.bf16.mxu0 %v765_v44  ;;  %v773_v54 = vcombine.high %v273_v47, %v277_v49  ;;  %502 = vmatprep.subr.bf16.mxu1 %v767_v48  ;;  %v775_v55 = vcombine.high %v274_v50, %v278_v51  ;;  %v281_v56 = vld [vmem:[%s985_s4 + $0xc0] sm:$0xff]  ;;  %v282_v58 = vld [vmem:[%s985_s4 + $0xc8] sm:$0xff]  ;;  %v772_v60 = vcombine.low %v273_v47, %v277_v49  ;;  %v268_v10 = vld [vmem:[%s985_s4 + $0x58] sm:$0xff]  ;;  %s755_s8 = sshll.u32 %s1057_s7, 2 }
  0x2f   : > { %v285_v57 = vld [vmem:[%s985_s4 + $0xe0] sm:$0xff]  ;;  %v286_v59 = vld [vmem:[%s985_s4 + $0xe8] sm:$0xff]  ;;  %v774_v61 = vcombine.low %v274_v50, %v278_v51  ;;  %v272_v11 = vld [vmem:[%s985_s4 + $0x78] sm:$0xff]  ;;  %v769_v15 = vcombine.high %v267_v8, %v271_v9  ;;  %v768_v21 = vcombine.low %v267_v8, %v271_v9  ;;  %s1033_s11 = scalar_lea.vmem %s1052_s3, %s755_s8 }
  0x30   : > { %v781_v62 = vcombine.high %v281_v56, %v285_v57  ;;  %v783_v63 = vcombine.high %v282_v58, %v286_v59  ;;  %v780_v4 = vcombine.low %v281_v56, %v285_v57  ;;  %v782_v5 = vcombine.low %v282_v58, %v286_v59  ;;  %v275_v17 = vld [vmem:[%s985_s4 + $0x90] sm:$0xff]  ;;  %v276_v19 = vld [vmem:[%s985_s4 + $0x98] sm:$0xff] }
  0x31   : > { %462 = vmatpush1.bf16.msra.mxu0 %v764_v52  ;;  %503 = vmatpush1.bf16.msra.mxu1 %v766_v53  ;;  %v771_v16 = vcombine.high %v268_v10, %v272_v11  ;;  %v279_v18 = vld [vmem:[%s985_s4 + $0xb0] sm:$0xff]  ;;  %v280_v20 = vld [vmem:[%s985_s4 + $0xb8] sm:$0xff]  ;;  %v770_v22 = vcombine.low %v268_v10, %v272_v11 }
  0x32   : > { %463 = vmatprep.subr.bf16.mxu0 %v773_v54  ;;  %504 = vmatprep.subr.bf16.mxu1 %v775_v55  ;;  %v777_v23 = vcombine.high %v275_v17, %v279_v18  ;;  %v779_v24 = vcombine.high %v276_v19, %v280_v20  ;;  %v283_v25 = vld [vmem:[%s985_s4 + $0xd0] sm:$0xff]  ;;  %v284_v27 = vld [vmem:[%s985_s4 + $0xd8] sm:$0xff]  ;;  %v776_v29 = vcombine.low %v275_v17, %v279_v18 }
  0x33   : > { %v287_v26 = vld [vmem:[%s985_s4 + $0xf0] sm:$0xff]  ;;  %v288_v28 = vld [vmem:[%s985_s4 + $0xf8] sm:$0xff]  ;;  %v778_v30 = vcombine.low %v276_v19, %v280_v20 }
  0x34   : > { %v785_v31 = vcombine.high %v283_v25, %v287_v26  ;;  %v787_v32 = vcombine.high %v284_v27, %v288_v28  ;;  %v784_v34 = vcombine.low %v283_v25, %v287_v26  ;;  %v786_v35 = vcombine.low %v284_v27, %v288_v28 }
  0x35   : > { %464 = vmatpush1.bf16.msra.mxu0 %v772_v60  ;;  %505 = vmatpush1.bf16.msra.mxu1 %v774_v61 }
  0x36   : > { %465 = vmatprep.subr.bf16.mxu0 %v781_v62  ;;  %506 = vmatprep.subr.bf16.mxu1 %v783_v63 }
  0x39   : > { %466 = vmatpush1.bf16.msra.mxu0 %v780_v4  ;;  %507 = vmatpush1.bf16.msra.mxu1 %v782_v5 }
  0x3a   : > { %541 = vmatprep.subr.bf16.mxu0 %v761_v6  ;;  %582 = vmatprep.subr.bf16.mxu1 %v763_v7 }
  0x3c   : > { %788 = vmatmul.mubr.msk.bf16.vlgmr.msra.gmra.mrb[0].mxu0 %vm455_vm0, %v256_v12  ;;  %789 = vmatmul.mubr.msk.bf16.vlgmr.msra.gmra.mrb[0].mxu1 %vm455_vm0, %v256_v12 }
  0x3d   : > { %542 = vmatpush1.bf16.msra.mxu0 %v760_v13  ;;  %583 = vmatpush1.bf16.msra.mxu1 %v762_v14 }
  0x3e   : > { %543 = vmatprep.subr.bf16.mxu0 %v769_v15  ;;  %584 = vmatprep.subr.bf16.mxu1 %v771_v16 }
  0x3f   : > { %573 = vmatprep.mubr.bf16.mxu0 %v853_v33  ;;  %614 = vmatprep.mubr.bf16.mxu1 %v853_v33 }
  0x41   : > { %544 = vmatpush1.bf16.msra.mxu0 %v768_v21  ;;  %585 = vmatpush1.bf16.msra.mxu1 %v770_v22 }
  0x42   : > { %545 = vmatprep.subr.bf16.mxu0 %v777_v23  ;;  %586 = vmatprep.subr.bf16.mxu1 %v779_v24 }
  0x45   : > { %546 = vmatpush1.bf16.msra.mxu0 %v776_v29  ;;  %587 = vmatpush1.bf16.msra.mxu1 %v778_v30 }
  0x46   : > { %547 = vmatprep.subr.bf16.mxu0 %v785_v31  ;;  %588 = vmatprep.subr.bf16.mxu1 %v787_v32 }
  0x49   : > { %548 = vmatpush1.bf16.msra.mxu0 %v784_v34  ;;  %589 = vmatpush1.bf16.msra.mxu1 %v786_v35 }
  0x4c   : > { %790 = vmatmul.mubr.msk.bf16.vlgmr.msra.gmra.mrb[4].mxu0 %vm455_vm0, %v256_v12  ;;  %791 = vmatmul.mubr.msk.bf16.vlgmr.msra.gmra.mrb[4].mxu1 %vm455_vm0, %v256_v12 }
  0xa7   : > { %v293_v33 = vpop.permute.xlu0 %292 }
 0x10f   : > { %v493_v36 = vpop.f32.mrb[0].mxu0  ;;  %v534_v38 = vpop.f32.mrb[0].mxu1 }
 0x110   : > { %v494_v37 = vadd.f32 %v493_v36, %v293_v33  ;;  %v495_v39 = vpop.f32.mrb[1].mxu0  ;;  %v535_v40 = vadd.f32 %v534_v38, %v293_v33  ;;  %v536_v42 = vpop.f32.mrb[1].mxu1 }
 0x111   : > { %v496_v41 = vadd.f32 %v495_v39, %v293_v33  ;;  %v497_v43 = vpop.f32.mrb[2].mxu0  ;;  %v537_v45 = vadd.f32 %v536_v42, %v293_v33  ;;  %v538_v46 = vpop.f32.mrb[2].mxu1 }
 0x112   : > { %vm623_vm1 = vcmp.ge.f32.partialorder %v494_v37, 0.0  ;;  %v631_v44 = vmul.f32 0.01, %v494_v37  ;;  %v498_v47 = vpop.f32.mrb[3].mxu0  ;;  %vm625_vm2 = vcmp.ge.f32.partialorder %v535_v40, 0.0  ;;  %v539_v52 = vpop.f32.mrb[3].mxu1 }
 0x113   : > { %v633_v48 = vmul.f32 0.01, %v535_v40  ;;  %vm624_vm3 = vcmp.ge.f32.partialorder %v496_v41, 0.0  ;;  %v632_v49 = vmul.f32 0.01, %v496_v41  ;;  %vm626_vm4 = vcmp.ge.f32.partialorder %v537_v45, 0.0 }
 0x114   : > { %v639_v50 = vsel %vm623_vm1, %v494_v37, %v631_v44  ;;  %v634_v51 = vmul.f32 0.01, %v537_v45 }
 0x115   : > { %v641_v53 = vsel %vm625_vm2, %v535_v40, %v633_v48  ;;  %v640_v54 = vsel %vm624_vm3, %v496_v41, %v632_v49 }
 0x116   : > { %v799_v55 = vpack.c.bf16 %v640_v54, %v639_v50  ;;  %v642_v56 = vsel %vm626_vm4, %v537_v45, %v634_v51 }
 0x117   : > { %v800_v57 = vpack.c.bf16 %v642_v56, %v641_v53 }
 0x118   : > { %679 = vst [vmem:[%s1033_s11] sm:$0xff] %v799_v55 }
 0x119   : > { %680 = vst [vmem:[%s1033_s11 + $0x8] sm:$0xff] %v800_v57 }
 0x11f   : > { %v575_v58 = vpop.f32.mrb[4].mxu0  ;;  %v616_v60 = vpop.f32.mrb[4].mxu1 }
 0x120   : > { %v576_v59 = vadd.f32 %v575_v58, %v293_v33  ;;  %v577_v61 = vpop.f32.mrb[5].mxu0  ;;  %v617_v62 = vadd.f32 %v616_v60, %v293_v33  ;;  %v618_v0 = vpop.f32.mrb[5].mxu1 }
 0x121   : > { %v578_v63 = vadd.f32 %v577_v61, %v293_v33  ;;  %v579_v1 = vpop.f32.mrb[6].mxu0  ;;  %v619_v3 = vadd.f32 %v618_v0, %v293_v33  ;;  %v620_v4 = vpop.f32.mrb[6].mxu1 }
 0x122   : > { %vm627_vm5 = vcmp.ge.f32.partialorder %v576_v59, 0.0  ;;  %v635_v2 = vmul.f32 0.01, %v576_v59  ;;  %v580_v5 = vpop.f32.mrb[7].mxu0  ;;  %vm629_vm6 = vcmp.ge.f32.partialorder %v617_v62, 0.0  ;;  %v621_v10 = vpop.f32.mrb[7].mxu1 }
 0x123   : > { %v637_v6 = vmul.f32 0.01, %v617_v62  ;;  %vm628_vm7 = vcmp.ge.f32.partialorder %v578_v63, 0.0  ;;  %v636_v7 = vmul.f32 0.01, %v578_v63  ;;  %vm630_vm8 = vcmp.ge.f32.partialorder %v619_v3, 0.0 }
 0x124   : > { %v643_v8 = vsel %vm627_vm5, %v576_v59, %v635_v2  ;;  %v638_v9 = vmul.f32 0.01, %v619_v3 }
 0x125   : > { %v645_v11 = vsel %vm629_vm6, %v617_v62, %v637_v6  ;;  %v644_v12 = vsel %vm628_vm7, %v578_v63, %v636_v7 }
 0x126   : > { %v801_v13 = vpack.c.bf16 %v644_v12, %v643_v8  ;;  %v646_v14 = vsel %vm630_vm8, %v619_v3, %v638_v9 }
 0x127   : > { %v802_v15 = vpack.c.bf16 %v646_v14, %v645_v11 }
 0x128   : > { %681 = vst [vmem:[%s1033_s11 + $0x10] sm:$0xff] %v801_v13 }
 0x129   : > { %682 = vst [vmem:[%s1033_s11 + $0x18] sm:$0xff] %v802_v15 }
 0x12a PF: > { %p10_p9 = scmp.ge.s32.totalorder %s891_s16, 4   ;;  %s1053_s12 = smov %s847_s13 }
 0x12b   : > { %s1054_s13 = smov %s900_s19  ;;  %s1055_s14 = smov %s891_s16 }
 0x12c   :  { %12 = sbr.rel (!%p10_p9) target bundleno = 2 (0x2), region = 90 }

// kernel: lstm_encoder_forward.6
= control target key start
LH: loop header
LB: loop body
LE: loop exit
PB: predicated region body
PF: predicated region fallthrough
CT: control target
= control target key end

     0   :  { %s684_s12 = smov 0   ;;  %s686_s13 = smov 0   ;;  %s793_s0 = inlined_call_operand.vmem [shape: bf16[128,512], index: 0, kind: input, shape index: {}]   ;;  %s794_s1 = inlined_call_operand.vmem [shape: bf16[16,128], index: 1, kind: input, shape index: {}]   ;;  %s795_s2 = inlined_call_operand.vmem [shape: f32[16,1], index: 2, kind: input, shape index: {}]   ;;  %s796_s3 = inlined_call_operand.vmem [shape: bf16[16,512], index: 3, kind: output, shape index: {}]  }
   0x1   :  { %s688_s14 = smov 0  }
   0x2 LB: > { %s550_s15 = sadd.s32 4294967295, %s661_s14   ;;  %s701_s16 = sadd.s32 1, %s661_s14   ;;  %s661_s14 = sphi %s688_s14, %s800_s14   ;;  %s657_s13 = sphi %s686_s13, %s799_s13   ;;  %s653_s12 = sphi %s684_s12, %s798_s12  }
   0x3   : > { %s17_s17 = ssub.s32 %s661_s14, %s701_s16  ;;  %s20_s18 = sadd.s32 1, %s657_s13 }
   0x4   : > { %p18_p0 = scmp.eq.s32.totalorder %s17_s17, 0  ;;  %p27_p1 = scmp.ne.s32.totalorder %s657_s13, %s653_s12 }
   0x5   : > { %p28_p2 = scmp.eq.s32.totalorder %s661_s14, 0  ;;  %p99_p3 = scmp.eq.s32.totalorder %s550_s15, 1 }
   0x6   : > { %s712_s19 = scalar_select %p18_p0, %s657_s13, %s20_s18  }
   0x7   : > { %p29_p4 = por %p28_p2, %p27_p1  ;;  %p714_p5 = por %p99_p3, %p27_p1 }
   0x8   : > { %p553_p6 = scmp.ge.s32.totalorder %s661_s14, 2 }
   0xa   : > { %127 = sbr.rel (%p553_p6) target bundleno = 29 (0x1d), region = 24 }
  0x11   : > { %130 = sbr.rel (!%p29_p4) target bundleno = 29 (0x1d), region = 28  ;;  %s132_s21 = sand.u32 (%p29_p4), 1, %s657_s13  }
  0x12   : > { %s584_s22 = sshll.u32 (%p29_p4), %s661_s14, 3  ;;  %s554_s23 = sshll.u32 (%p29_p4), %s132_s21, 7 }
  0x13   : > { %s724_s26 = scalar_lea.vmem (%p29_p4), %s793_s0, %s584_s22  ;;  %s134_s27 = scalar_lea.vmem (%p29_p4), [#allocation2], %s554_s23 }
  0x14   : > { %v195_v0 = vld [vmem:[%s724_s26] sm:$0xff] (%p29_p4)  ;;  %v197_v1 = vld [vmem:[%s724_s26 + $0x10] sm:$0xff] (%p29_p4) }
  0x15   : > { %v199_v2 = vld [vmem:[%s724_s26 + $0x20] sm:$0xff] (%p29_p4)  ;;  %196 = vst [vmem:[%s134_s27] sm:$0xff] (%p29_p4), %v195_v0  ;;  %198 = vst [vmem:[%s134_s27 + $0x8] sm:$0xff] (%p29_p4), %v197_v1  ;;  %v201_v3 = vld [vmem:[%s724_s26 + $0x30] sm:$0xff] (%p29_p4) }
  0x16   : > { %200 = vst [vmem:[%s134_s27 + $0x10] sm:$0xff] (%p29_p4), %v199_v2  ;;  %v203_v4 = vld [vmem:[%s724_s26 + $0x40] sm:$0xff] (%p29_p4)  ;;  %v205_v5 = vld [vmem:[%s724_s26 + $0x50] sm:$0xff] (%p29_p4)  ;;  %202 = vst [vmem:[%s134_s27 + $0x18] sm:$0xff] (%p29_p4), %v201_v3 }
  0x17   : > { %204 = vst [vmem:[%s134_s27 + $0x20] sm:$0xff] (%p29_p4), %v203_v4  ;;  %206 = vst [vmem:[%s134_s27 + $0x28] sm:$0xff] (%p29_p4), %v205_v5  ;;  %v207_v6 = vld [vmem:[%s724_s26 + $0x60] sm:$0xff] (%p29_p4)  ;;  %v209_v7 = vld [vmem:[%s724_s26 + $0x70] sm:$0xff] (%p29_p4) }
  0x18   : > { %v211_v8 = vld [vmem:[%s724_s26 + $0x80] sm:$0xff]  ;;  %208 = vst [vmem:[%s134_s27 + $0x30] sm:$0xff] %v207_v6  ;;  %210 = vst [vmem:[%s134_s27 + $0x38] sm:$0xff] %v209_v7  ;;  %v213_v9 = vld [vmem:[%s724_s26 + $0x90] sm:$0xff] }
  0x19   : > { %212 = vst [vmem:[%s134_s27 + $0x40] sm:$0xff] %v211_v8  ;;  %v215_v10 = vld [vmem:[%s724_s26 + $0xa0] sm:$0xff]  ;;  %v217_v11 = vld [vmem:[%s724_s26 + $0xb0] sm:$0xff]  ;;  %214 = vst [vmem:[%s134_s27 + $0x48] sm:$0xff] %v213_v9 }
  0x1a   : > { %216 = vst [vmem:[%s134_s27 + $0x50] sm:$0xff] %v215_v10  ;;  %218 = vst [vmem:[%s134_s27 + $0x58] sm:$0xff] %v217_v11  ;;  %v219_v12 = vld [vmem:[%s724_s26 + $0xc0] sm:$0xff]  ;;  %v221_v13 = vld [vmem:[%s724_s26 + $0xd0] sm:$0xff] }
  0x1b   : > { %v223_v14 = vld [vmem:[%s724_s26 + $0xe0] sm:$0xff]  ;;  %220 = vst [vmem:[%s134_s27 + $0x60] sm:$0xff] %v219_v12  ;;  %222 = vst [vmem:[%s134_s27 + $0x68] sm:$0xff] %v221_v13  ;;  %v225_v15 = vld [vmem:[%s724_s26 + $0xf0] sm:$0xff] }
  0x1c   : > { %224 = vst [vmem:[%s134_s27 + $0x70] sm:$0xff] %v223_v14  ;;  %226 = vst [vmem:[%s134_s27 + $0x78] sm:$0xff] %v225_v15 }
  0x1d PF: > { %p557_p7 = scmp.ge.s32.totalorder %s661_s14, 1  ;;  %p231_p8 = scmp.lt.s32.totalorder %s661_s14, 3 }
  0x1f   : > { %p232_p9 = pnand %p557_p7, %p231_p8 }
  0x20   : > { %s238_s28 = sand.u32 (!%p232_p9), 1, %s653_s12   ;;  %v663_v16 = vmov (!%p232_p9), 0   ;;  %v281_v17 = vld [vmem:[%s795_s2] sm:$0xff] (!%p232_p9)  ;;  %v282_v18 = vld [vmem:[%s795_s2 + $0x8] sm:$0xff] (!%p232_p9) }
  0x21   : > { %235 = sbr.rel (%p232_p9) target bundleno = 299 (0x12b), region = 66  ;;  %s558_s29 = sshll.u32 (!%p232_p9), %s238_s28, 7  ;;  %411 = vmatprep.mubr.bf16.mxu0 (!%p232_p9), %v663_v16  ;;  %613 = vset.pattern.permute.xlu0 (!%p232_p9), %v663_v16  ;;  %v638_v35 = vld [vmem:[%s794_s1] sm:$0xff] (!%p232_p9)  }
  0x22   : > { %285 = vperm.xlu0 (!%p232_p9), %613, %v281_v17   ;;  %s753_s7 = scalar_lea.vmem (!%p232_p9), [#allocation2], %s558_s29  ;;  %s559_s10 = sshll.u32 (!%p232_p9), %s238_s28, 4 }
  0x23   : > { %v614_v19 = vld [vmem:[%s753_s7 + $0x4] ss:$8 sps:$4 sm:$0xff] (!%p232_p9)   ;;  %v616_v20 = vld [vmem:[%s753_s7] ss:$8 sps:$4 sm:$0xff] (!%p232_p9)   ;;  %v617_v21 = vld [vmem:[%s753_s7 + $0x14] ss:$8 sps:$4 sm:$0xff] (!%p232_p9)  }
  0x24   : > { %379 = vmatprep.subr.bf16.mxu0 (!%p232_p9), %v614_v19  ;;  %v619_v22 = vld [vmem:[%s753_s7 + $0x10] ss:$8 sps:$4 sm:$0xff] (!%p232_p9)   ;;  %v620_v23 = vld [vmem:[%s753_s7 + $0x24] ss:$8 sps:$4 sm:$0xff] (!%p232_p9)   ;;  %v622_v24 = vld [vmem:[%s753_s7 + $0x20] ss:$8 sps:$4 sm:$0xff] (!%p232_p9)  }
  0x25   : > { %380 = vmatpush1.bf16.msra.mxu0 (!%p232_p9), %v616_v20  ;;  %v623_v25 = vld [vmem:[%s753_s7 + $0x34] ss:$8 sps:$4 sm:$0xff] (!%p232_p9)   ;;  %v625_v26 = vld [vmem:[%s753_s7 + $0x30] ss:$8 sps:$4 sm:$0xff] (!%p232_p9)   ;;  %v626_v27 = vld [vmem:[%s753_s7 + $0x44] ss:$8 sps:$4 sm:$0xff] (!%p232_p9)  }
  0x26   : > { %290 = vperm.xlu0 (!%p232_p9), %613, %v282_v18   ;;  %381 = vmatprep.subr.bf16.mxu0 (!%p232_p9), %v617_v21  ;;  %v628_v28 = vld [vmem:[%s753_s7 + $0x40] ss:$8 sps:$4 sm:$0xff] (!%p232_p9)   ;;  %v629_v29 = vld [vmem:[%s753_s7 + $0x54] ss:$8 sps:$4 sm:$0xff] (!%p232_p9)   ;;  %v631_v30 = vld [vmem:[%s753_s7 + $0x50] ss:$8 sps:$4 sm:$0xff] (!%p232_p9)  }
  0x27   : > { %v632_v31 = vld [vmem:[%s753_s7 + $0x64] ss:$8 sps:$4 sm:$0xff] (!%p232_p9)   ;;  %v634_v32 = vld [vmem:[%s753_s7 + $0x60] ss:$8 sps:$4 sm:$0xff] (!%p232_p9)   ;;  %v635_v33 = vld [vmem:[%s753_s7 + $0x74] ss:$8 sps:$4 sm:$0xff] (!%p232_p9)  }
  0x28   : > { %v637_v34 = vld [vmem:[%s753_s7 + $0x70] ss:$8 sps:$4 sm:$0xff]   ;;  %s259_s11 = scalar_lea.vmem [#allocation3], %s559_s10  ;;  %s587_s12 = sshll.u32 (%p714_p5), %s550_s15, 3 }
  0x29   : > { %382 = vmatpush1.bf16.msra.mxu0 %v619_v22  ;;  %s457_s21 = scalar_lea.vmem (%p714_p5), %s796_s3, %s587_s12 }
  0x2a   : > { %383 = vmatprep.subr.bf16.mxu0 %v620_v23 }
  0x2d   : > { %384 = vmatpush1.bf16.msra.mxu0 %v622_v24 }
  0x2e   : > { %385 = vmatprep.subr.bf16.mxu0 %v623_v25 }
  0x31   : > { %386 = vmatpush1.bf16.msra.mxu0 %v625_v26 }
  0x32   : > { %387 = vmatprep.subr.bf16.mxu0 %v626_v27 }
  0x35   : > { %388 = vmatpush1.bf16.msra.mxu0 %v628_v28 }
  0x36   : > { %389 = vmatprep.subr.bf16.mxu0 %v629_v29 }
  0x39   : > { %390 = vmatpush1.bf16.msra.mxu0 %v631_v30 }
  0x3a   : > { %391 = vmatprep.subr.bf16.mxu0 %v632_v31 }
  0x3d   : > { %392 = vmatpush1.bf16.msra.mxu0 %v634_v32 }
  0x3e   : > { %393 = vmatprep.subr.bf16.mxu0 %v635_v33 }
  0x41   : > { %394 = vmatpush1.bf16.msra.mxu0 %v637_v34 }
  0x44   : > { %412 = vmatmul.mubr.bf16.vlgmr.msra.gmra.mrb[0].mxu0 %v638_v35 }
  0xa1   : > { %v286_v36 = vpop.permute.xlu0 %285 }
  0xa5   : > { %v291_v40 = vpop.permute.xlu0 %290 }
 0x117   : > { %v413_v37 = vpop.f32.mrb[0].mxu0 }
 0x118   : > { %v414_v38 = vadd.f32 %v413_v37, %v286_v36  ;;  %v415_v39 = vpop.f32.mrb[1].mxu0 }
 0x119   : > { %v416_v41 = vadd.f32 %v415_v39, %v286_v36  ;;  %v417_v42 = vpop.f32.mrb[2].mxu0 }
 0x11a   : > { %vm422_vm0 = vcmp.ge.f32.partialorder %v414_v38, 0.0  ;;  %v426_v43 = vmul.f32 0.01, %v414_v38  ;;  %v418_v44 = vadd.f32 %v417_v42, %v291_v40  ;;  %v419_v45 = vpop.f32.mrb[3].mxu0 }
 0x11b   : > { %vm423_vm1 = vcmp.ge.f32.partialorder %v416_v41, 0.0  ;;  %v427_v46 = vmul.f32 0.01, %v416_v41  ;;  %v420_v47 = vadd.f32 %v419_v45, %v291_v40 }
 0x11c   : > { %v430_v48 = vsel %vm422_vm0, %v414_v38, %v426_v43  ;;  %vm424_vm2 = vcmp.ge.f32.partialorder %v418_v44, 0.0  ;;  %v428_v49 = vmul.f32 0.01, %v418_v44  ;;  %454 = sbr.rel (!%p714_p5) target bundleno = 299 (0x12b), region = 74 }
 0x11d   : > { %v431_v50 = vsel %vm423_vm1, %v416_v41, %v427_v46  ;;  %vm425_vm3 = vcmp.ge.f32.partialorder %v420_v47, 0.0  ;;  %v429_v51 = vmul.f32 0.01, %v420_v47 }
 0x11e   : > { %v585_v52 = vpack.c.bf16 %v431_v50, %v430_v48  ;;  %v432_v53 = vsel %vm424_vm2, %v418_v44, %v428_v49 }
 0x11f   : > { %v433_v54 = vsel %vm425_vm3, %v420_v47, %v429_v51 }
 0x120   : > { %446 = vst [vmem:[%s259_s11] sm:$0xff] %v585_v52  ;;  %v586_v55 = vpack.c.bf16 %v433_v54, %v432_v53 }
 0x122   : > { %447 = vst [vmem:[%s259_s11 + $0x8] sm:$0xff] %v586_v55 }
 0x127   : > { %v487_v56 = vld [vmem:[%s259_s11] sm:$0xff] }
 0x128   : > { %488 = vst [vmem:[%s457_s21] sm:$0xff] %v487_v56 }
 0x129   : > { %v489_v57 = vld [vmem:[%s259_s11 + $0x8] sm:$0xff] }
 0x12a   : > { %490 = vst [vmem:[%s457_s21 + $0x10] sm:$0xff] %v489_v57 }
 0x12b PF: > { %p10_p10 = scmp.ge.s32.totalorder %s701_s16, 4   ;;  %s798_s12 = smov %s657_s13 }
 0x12c   : > { %s799_s13 = smov %s712_s19  ;;  %s800_s14 = smov %s701_s16 }
 0x12d   :  { %12 = sbr.rel (!%p10_p10) target bundleno = 2 (0x2), region = 143 }

// kernel: lstm_encoder_forward.7
= control target key start
LH: loop header
LB: loop body
LE: loop exit
PB: predicated region body
PF: predicated region fallthrough
CT: control target
= control target key end

     0   :  { %vm5625_vm6 = vmmov 0   ;;  %vm2772_vm8 = vcmask 523264   ;;  %s7523_s1 = inlined_call_operand.vmem [shape: bf16[1024,512], index: 1, kind: input, shape index: {}]   ;;  %s7524_s0 = inlined_call_operand.vmem [shape: bf16[8,1024], index: 0, kind: input, shape index: {}]   ;;  %s7525_s3 = inlined_call_operand.vmem [shape: bf16[512,256], index: 3, kind: input, shape index: {}]   ;;  %s7526_s5 = inlined_call_operand.vmem [shape: bf16[256,128], index: 5, kind: input, shape index: {}]   ;;  %s7527_s2 = inlined_call_operand.vmem [shape: f32[1,512], index: 2, kind: input, shape index: {}]   ;;  %s7528_s4 = inlined_call_operand.vmem [shape: f32[1,256], index: 4, kind: input, shape index: {}]   ;;  %s7529_s7 = inlined_call_operand.vmem [shape: f32[128,64], index: 7, kind: input, shape index: {}]   ;;  %s7530_s6 = inlined_call_operand.vmem [shape: f32[1,128], index: 6, kind: input, shape index: {}]   ;;  %s7531_s9 = inlined_call_operand.vmem [shape: f32[64,64], index: 9, kind: input, shape index: {}]   ;;  %s7532_s8 = inlined_call_operand.vmem [shape: f32[1,64], index: 8, kind: input, shape index: {}]   ;;  %s7533_s11 = inlined_call_operand.vmem [shape: f32[64,64], index: 11, kind: input, shape index: {}]   ;;  %s7534_s10 = inlined_call_operand.vmem [shape: f32[1,64], index: 10, kind: input, shape index: {}]   ;;  %s7535_s13 = inlined_call_operand.vmem [shape: f32[64,64], index: 13, kind: input, shape index: {}]   ;;  %s7536_s15 = inlined_call_operand.vmem [shape: f32[64,512], index: 15, kind: input, shape index: {}]   ;;  %s7537_s12 = inlined_call_operand.vmem [shape: f32[1,64], index: 12, kind: input, shape index: {}]   ;;  %s7538_s17 = inlined_call_operand.vmem [shape: f32[128,512], index: 17, kind: input, shape index: {}]   ;;  %s7539_s14 = inlined_call_operand.vmem [shape: f32[1,64], index: 14, kind: input, shape index: {}]   ;;  %s7540_s16 = inlined_call_operand.vmem [shape: f32[1,512], index: 16, kind: input, shape index: {}]   ;;  %s7541_s18 = inlined_call_operand.vmem [shape: f32[4,2,128], index: 18, kind: output, shape index: {}]  }
   0x1   :  { %7545 = sst [smem:[#allocation3_spill]] %s7523_s1 }
   0x2   :  { %7546 = sst [smem:[#allocation4_spill]] %s7524_s0  ;;  %s7548_s29 = sld [smem:[#allocation3_spill]] }
   0x3   :  { %7547 = sst [smem:[#allocation5_spill]] %s7525_s3  ;;  %s7549_s23 = sld [smem:[#allocation4_spill]] }
   0x4   :  { %s7550_s27 = sld [smem:[#allocation5_spill]] }
   0x8   :  { %v5052_v0 = vld [vmem:[%s7548_s29 + $0x4] ss:$16 sps:$4 sm:$0xff]   ;;  %v5054_v1 = vld [vmem:[%s7548_s29 + $0xc] ss:$16 sps:$4 sm:$0xff]   ;;  %v5056_v2 = vld [vmem:[%s7548_s29] ss:$16 sps:$4 sm:$0xff]  }
   0x9   :  { %1650 = vmatprep.subr.bf16.mxu0 %v5052_v0  ;;  %v5057_v3 = vld [vmem:[%s7548_s29 + $0x8] ss:$16 sps:$4 sm:$0xff]   ;;  %1814 = vmatprep.subr.bf16.mxu1 %v5054_v1  ;;  %v5058_v4 = vld [vmem:[%s7548_s29 + $0x24] ss:$16 sps:$4 sm:$0xff]   ;;  %v5060_v5 = vld [vmem:[%s7548_s29 + $0x2c] ss:$16 sps:$4 sm:$0xff]  }
   0xa   :  { %1651 = vmatpush1.bf16.msra.mxu0 %v5056_v2  ;;  %1815 = vmatpush1.bf16.msra.mxu1 %v5057_v3  ;;  %v5062_v6 = vld [vmem:[%s7548_s29 + $0x20] ss:$16 sps:$4 sm:$0xff]   ;;  %v5063_v7 = vld [vmem:[%s7548_s29 + $0x28] ss:$16 sps:$4 sm:$0xff]   ;;  %v5064_v8 = vld [vmem:[%s7548_s29 + $0x44] ss:$16 sps:$4 sm:$0xff]  }
   0xb   :  { %1652 = vmatprep.subr.bf16.mxu0 %v5058_v4  ;;  %1816 = vmatprep.subr.bf16.mxu1 %v5060_v5  ;;  %v5066_v9 = vld [vmem:[%s7548_s29 + $0x4c] ss:$16 sps:$4 sm:$0xff]   ;;  %v5068_v10 = vld [vmem:[%s7548_s29 + $0x40] ss:$16 sps:$4 sm:$0xff]   ;;  %v5069_v11 = vld [vmem:[%s7548_s29 + $0x48] ss:$16 sps:$4 sm:$0xff]  }
   0xc   :  { %v5070_v12 = vld [vmem:[%s7548_s29 + $0x64] ss:$16 sps:$4 sm:$0xff]   ;;  %v5072_v13 = vld [vmem:[%s7548_s29 + $0x6c] ss:$16 sps:$4 sm:$0xff]   ;;  %v5074_v14 = vld [vmem:[%s7548_s29 + $0x60] ss:$16 sps:$4 sm:$0xff]  }
   0xd   :  { %v5075_v15 = vld [vmem:[%s7548_s29 + $0x68] ss:$16 sps:$4 sm:$0xff]   ;;  %v5076_v16 = vld [vmem:[%s7548_s29 + $0x84] ss:$16 sps:$4 sm:$0xff]   ;;  %v5078_v17 = vld [vmem:[%s7548_s29 + $0x8c] ss:$16 sps:$4 sm:$0xff]  }
   0xe   :  { %1653 = vmatpush1.bf16.msra.mxu0 %v5062_v6  ;;  %1817 = vmatpush1.bf16.msra.mxu1 %v5063_v7  ;;  %v5080_v18 = vld [vmem:[%s7548_s29 + $0x80] ss:$16 sps:$4 sm:$0xff]   ;;  %v5081_v19 = vld [vmem:[%s7548_s29 + $0x88] ss:$16 sps:$4 sm:$0xff]   ;;  %v5082_v20 = vld [vmem:[%s7548_s29 + $0xa4] ss:$16 sps:$4 sm:$0xff]  }
   0xf   :  { %1654 = vmatprep.subr.bf16.mxu0 %v5064_v8  ;;  %1818 = vmatprep.subr.bf16.mxu1 %v5066_v9  ;;  %v5084_v21 = vld [vmem:[%s7548_s29 + $0xac] ss:$16 sps:$4 sm:$0xff]   ;;  %v5086_v22 = vld [vmem:[%s7548_s29 + $0xa0] ss:$16 sps:$4 sm:$0xff]   ;;  %v5087_v23 = vld [vmem:[%s7548_s29 + $0xa8] ss:$16 sps:$4 sm:$0xff]  }
  0x10   :  { %v5088_v24 = vld [vmem:[%s7548_s29 + $0xc4] ss:$16 sps:$4 sm:$0xff]   ;;  %v5090_v25 = vld [vmem:[%s7548_s29 + $0xcc] ss:$16 sps:$4 sm:$0xff]   ;;  %v5092_v26 = vld [vmem:[%s7548_s29 + $0xc0] ss:$16 sps:$4 sm:$0xff]  }
  0x11   :  { %v5093_v27 = vld [vmem:[%s7548_s29 + $0xc8] ss:$16 sps:$4 sm:$0xff]   ;;  %v5094_v28 = vld [vmem:[%s7548_s29 + $0xe4] ss:$16 sps:$4 sm:$0xff]   ;;  %v5096_v29 = vld [vmem:[%s7548_s29 + $0xec] ss:$16 sps:$4 sm:$0xff]  }
  0x12   :  { %1655 = vmatpush1.bf16.msra.mxu0 %v5068_v10  ;;  %1819 = vmatpush1.bf16.msra.mxu1 %v5069_v11  ;;  %v5098_v30 = vld [vmem:[%s7548_s29 + $0xe0] ss:$16 sps:$4 sm:$0xff]   ;;  %v5099_v31 = vld [vmem:[%s7548_s29 + $0xe8] ss:$16 sps:$4 sm:$0xff]   ;;  %v5100_v32 = vld [vmem:[%s7548_s29 + $0x104] ss:$16 sps:$4 sm:$0xff]  }
  0x13   :  { %1656 = vmatprep.subr.bf16.mxu0 %v5070_v12  ;;  %1820 = vmatprep.subr.bf16.mxu1 %v5072_v13  ;;  %v5102_v33 = vld [vmem:[%s7548_s29 + $0x10c] ss:$16 sps:$4 sm:$0xff]   ;;  %v5104_v34 = vld [vmem:[%s7548_s29 + $0x100] ss:$16 sps:$4 sm:$0xff]   ;;  %v5105_v35 = vld [vmem:[%s7548_s29 + $0x108] ss:$16 sps:$4 sm:$0xff]  }
  0x14   :  { %v5106_v36 = vld [vmem:[%s7548_s29 + $0x124] ss:$16 sps:$4 sm:$0xff]   ;;  %v5108_v37 = vld [vmem:[%s7548_s29 + $0x12c] ss:$16 sps:$4 sm:$0xff]   ;;  %v5110_v38 = vld [vmem:[%s7548_s29 + $0x120] ss:$16 sps:$4 sm:$0xff]  }
  0x15   :  { %v5111_v39 = vld [vmem:[%s7548_s29 + $0x128] ss:$16 sps:$4 sm:$0xff]   ;;  %v5112_v40 = vld [vmem:[%s7548_s29 + $0x144] ss:$16 sps:$4 sm:$0xff]   ;;  %v5114_v41 = vld [vmem:[%s7548_s29 + $0x14c] ss:$16 sps:$4 sm:$0xff]  }
  0x16   :  { %1657 = vmatpush1.bf16.msra.mxu0 %v5074_v14  ;;  %1821 = vmatpush1.bf16.msra.mxu1 %v5075_v15  ;;  %v5116_v42 = vld [vmem:[%s7548_s29 + $0x140] ss:$16 sps:$4 sm:$0xff]   ;;  %v5117_v43 = vld [vmem:[%s7548_s29 + $0x148] ss:$16 sps:$4 sm:$0xff]   ;;  %v5118_v44 = vld [vmem:[%s7548_s29 + $0x164] ss:$16 sps:$4 sm:$0xff]  }
  0x17   :  { %1658 = vmatprep.subr.bf16.mxu0 %v5076_v16  ;;  %1822 = vmatprep.subr.bf16.mxu1 %v5078_v17  ;;  %v5120_v45 = vld [vmem:[%s7548_s29 + $0x16c] ss:$16 sps:$4 sm:$0xff]   ;;  %v60_v46 = vld [vmem:[%s7549_s23] sm:$0xff]  ;;  %v5123_v49 = vld [vmem:[%s7548_s29 + $0x168] ss:$16 sps:$4 sm:$0xff]  }
  0x18   :  { %v5122_v47 = vld [vmem:[%s7548_s29 + $0x160] ss:$16 sps:$4 sm:$0xff]   ;;  %v4139_v48 = vcombine.high %v60_v46, %v60_v46  ;;  %v5124_v50 = vld [vmem:[%s7548_s29 + $0x184] ss:$16 sps:$4 sm:$0xff]   ;;  %v5126_v51 = vld [vmem:[%s7548_s29 + $0x18c] ss:$16 sps:$4 sm:$0xff]   ;;  %v4138_v4 = vcombine.low %v60_v46, %v60_v46 }
  0x19   :  { %v5128_v52 = vld [vmem:[%s7548_s29 + $0x180] ss:$16 sps:$4 sm:$0xff]   ;;  %v5129_v53 = vld [vmem:[%s7548_s29 + $0x188] ss:$16 sps:$4 sm:$0xff]   ;;  %v5130_v54 = vld [vmem:[%s7548_s29 + $0x1a4] ss:$16 sps:$4 sm:$0xff]  }
  0x1a   :  { %1659 = vmatpush1.bf16.msra.mxu0 %v5080_v18  ;;  %1823 = vmatpush1.bf16.msra.mxu1 %v5081_v19  ;;  %v5132_v55 = vld [vmem:[%s7548_s29 + $0x1ac] ss:$16 sps:$4 sm:$0xff]   ;;  %v5134_v56 = vld [vmem:[%s7548_s29 + $0x1a0] ss:$16 sps:$4 sm:$0xff]   ;;  %v5135_v57 = vld [vmem:[%s7548_s29 + $0x1a8] ss:$16 sps:$4 sm:$0xff]  }
  0x1b   :  { %1660 = vmatprep.subr.bf16.mxu0 %v5082_v20  ;;  %1824 = vmatprep.subr.bf16.mxu1 %v5084_v21  ;;  %v5136_v58 = vld [vmem:[%s7548_s29 + $0x1c4] ss:$16 sps:$4 sm:$0xff]   ;;  %v5138_v59 = vld [vmem:[%s7548_s29 + $0x1cc] ss:$16 sps:$4 sm:$0xff]   ;;  %v5140_v60 = vld [vmem:[%s7548_s29 + $0x1c0] ss:$16 sps:$4 sm:$0xff]  }
  0x1c   :  { %1682 = vmatprep.mubr.bf16.mxu0 %v4139_v48  ;;  %1846 = vmatprep.mubr.bf16.mxu1 %v4139_v48  ;;  %v5141_v61 = vld [vmem:[%s7548_s29 + $0x1c8] ss:$16 sps:$4 sm:$0xff]   ;;  %v5142_v62 = vld [vmem:[%s7548_s29 + $0x1e4] ss:$16 sps:$4 sm:$0xff]   ;;  %v5144_v63 = vld [vmem:[%s7548_s29 + $0x1ec] ss:$16 sps:$4 sm:$0xff]  }
  0x1d   :  { %v5146_v0 = vld [vmem:[%s7548_s29 + $0x1e0] ss:$16 sps:$4 sm:$0xff]   ;;  %v5147_v1 = vld [vmem:[%s7548_s29 + $0x1e8] ss:$16 sps:$4 sm:$0xff]   ;;  %v5152_v2 = vld [vmem:[%s7548_s29 + $0x204] ss:$16 sps:$4 sm:$0xff]  }
  0x1e   :  { %1661 = vmatpush1.bf16.msra.mxu0 %v5086_v22  ;;  %1825 = vmatpush1.bf16.msra.mxu1 %v5087_v23  ;;  %v5155_v3 = vld [vmem:[%s7548_s29 + $0x20c] ss:$16 sps:$4 sm:$0xff]   ;;  %v5150_v5 = vld [vmem:[%s7548_s29 + $0x200] ss:$16 sps:$4 sm:$0xff]   ;;  %v5153_v6 = vld [vmem:[%s7548_s29 + $0x208] ss:$16 sps:$4 sm:$0xff]  }
  0x1f   :  { %1662 = vmatprep.subr.bf16.mxu0 %v5088_v24  ;;  %1826 = vmatprep.subr.bf16.mxu1 %v5090_v25  ;;  %v5158_v7 = vld [vmem:[%s7548_s29 + $0x224] ss:$16 sps:$4 sm:$0xff]   ;;  %v5161_v8 = vld [vmem:[%s7548_s29 + $0x22c] ss:$16 sps:$4 sm:$0xff]   ;;  %v5156_v9 = vld [vmem:[%s7548_s29 + $0x220] ss:$16 sps:$4 sm:$0xff]  }
  0x20   :  { %v5159_v10 = vld [vmem:[%s7548_s29 + $0x228] ss:$16 sps:$4 sm:$0xff]   ;;  %v5164_v11 = vld [vmem:[%s7548_s29 + $0x244] ss:$16 sps:$4 sm:$0xff]   ;;  %v5167_v12 = vld [vmem:[%s7548_s29 + $0x24c] ss:$16 sps:$4 sm:$0xff]  }
  0x21   :  { %v5162_v13 = vld [vmem:[%s7548_s29 + $0x240] ss:$16 sps:$4 sm:$0xff]   ;;  %v5165_v14 = vld [vmem:[%s7548_s29 + $0x248] ss:$16 sps:$4 sm:$0xff]   ;;  %v5170_v15 = vld [vmem:[%s7548_s29 + $0x264] ss:$16 sps:$4 sm:$0xff]  }
  0x22   :  { %1663 = vmatpush1.bf16.msra.mxu0 %v5092_v26  ;;  %1827 = vmatpush1.bf16.msra.mxu1 %v5093_v27  ;;  %v5173_v16 = vld [vmem:[%s7548_s29 + $0x26c] ss:$16 sps:$4 sm:$0xff]   ;;  %v5168_v17 = vld [vmem:[%s7548_s29 + $0x260] ss:$16 sps:$4 sm:$0xff]   ;;  %v5171_v18 = vld [vmem:[%s7548_s29 + $0x268] ss:$16 sps:$4 sm:$0xff]  }
  0x23   :  { %1664 = vmatprep.subr.bf16.mxu0 %v5094_v28  ;;  %1828 = vmatprep.subr.bf16.mxu1 %v5096_v29  ;;  %v5176_v19 = vld [vmem:[%s7548_s29 + $0x284] ss:$16 sps:$4 sm:$0xff]   ;;  %v5179_v20 = vld [vmem:[%s7548_s29 + $0x28c] ss:$16 sps:$4 sm:$0xff]   ;;  %v5174_v21 = vld [vmem:[%s7548_s29 + $0x280] ss:$16 sps:$4 sm:$0xff]  }
  0x24   :  { %v5177_v22 = vld [vmem:[%s7548_s29 + $0x288] ss:$16 sps:$4 sm:$0xff]   ;;  %v5182_v23 = vld [vmem:[%s7548_s29 + $0x2a4] ss:$16 sps:$4 sm:$0xff]   ;;  %v5185_v24 = vld [vmem:[%s7548_s29 + $0x2ac] ss:$16 sps:$4 sm:$0xff]  }
  0x25   :  { %v5180_v25 = vld [vmem:[%s7548_s29 + $0x2a0] ss:$16 sps:$4 sm:$0xff]   ;;  %v5183_v26 = vld [vmem:[%s7548_s29 + $0x2a8] ss:$16 sps:$4 sm:$0xff]   ;;  %v5188_v27 = vld [vmem:[%s7548_s29 + $0x2c4] ss:$16 sps:$4 sm:$0xff]  }
  0x26   :  { %1665 = vmatpush1.bf16.msra.mxu0 %v5098_v30  ;;  %1829 = vmatpush1.bf16.msra.mxu1 %v5099_v31  ;;  %v5191_v28 = vld [vmem:[%s7548_s29 + $0x2cc] ss:$16 sps:$4 sm:$0xff]   ;;  %v5186_v31 = vld [vmem:[%s7548_s29 + $0x2c0] ss:$16 sps:$4 sm:$0xff]   ;;  %v5213_v48 = vld [vmem:[%s7548_s29 + $0x348] ss:$16 sps:$4 sm:$0xff]  }
  0x27   :  { %1666 = vmatprep.subr.bf16.mxu0 %v5100_v32  ;;  %1830 = vmatprep.subr.bf16.mxu1 %v5102_v33  ;;  %v5999_v29 = vld [vmem:[%s7549_s23 + $0x8] sm:$0xff]  ;;  %v5194_v33 = vld [vmem:[%s7548_s29 + $0x2e4] ss:$16 sps:$4 sm:$0xff]  }
  0x28   :  { %v4141_v30 = vcombine.high %v5999_v29, %v5999_v29  ;;  %v5189_v32 = vld [vmem:[%s7548_s29 + $0x2c8] ss:$16 sps:$4 sm:$0xff]   ;;  %v5215_v46 = vld [vmem:[%s7548_s29 + $0x34c] ss:$16 sps:$4 sm:$0xff]  }
  0x2a   :  { %1667 = vmatpush1.bf16.msra.mxu0 %v5104_v34  ;;  %1831 = vmatpush1.bf16.msra.mxu1 %v5105_v35  ;;  %v5197_v34 = vld [vmem:[%s7548_s29 + $0x2ec] ss:$16 sps:$4 sm:$0xff]   ;;  %v5192_v35 = vld [vmem:[%s7548_s29 + $0x2e0] ss:$16 sps:$4 sm:$0xff]  }
  0x2b   :  { %1668 = vmatprep.subr.bf16.mxu0 %v5106_v36  ;;  %1832 = vmatprep.subr.bf16.mxu1 %v5108_v37  ;;  %v5195_v36 = vld [vmem:[%s7548_s29 + $0x2e8] ss:$16 sps:$4 sm:$0xff]   ;;  %v5200_v37 = vld [vmem:[%s7548_s29 + $0x304] ss:$16 sps:$4 sm:$0xff]  }
  0x2e   :  { %1669 = vmatpush1.bf16.msra.mxu0 %v5110_v38  ;;  %1833 = vmatpush1.bf16.msra.mxu1 %v5111_v39  ;;  %v5203_v38 = vld [vmem:[%s7548_s29 + $0x30c] ss:$16 sps:$4 sm:$0xff]   ;;  %v5198_v39 = vld [vmem:[%s7548_s29 + $0x300] ss:$16 sps:$4 sm:$0xff]  }
  0x2f   :  { %1670 = vmatprep.subr.bf16.mxu0 %v5112_v40  ;;  %1834 = vmatprep.subr.bf16.mxu1 %v5114_v41  ;;  %v5201_v40 = vld [vmem:[%s7548_s29 + $0x308] ss:$16 sps:$4 sm:$0xff]   ;;  %v5206_v41 = vld [vmem:[%s7548_s29 + $0x324] ss:$16 sps:$4 sm:$0xff]  }
  0x32   :  { %1671 = vmatpush1.bf16.msra.mxu0 %v5116_v42  ;;  %1835 = vmatpush1.bf16.msra.mxu1 %v5117_v43  ;;  %v5209_v42 = vld [vmem:[%s7548_s29 + $0x32c] ss:$16 sps:$4 sm:$0xff]   ;;  %v5204_v43 = vld [vmem:[%s7548_s29 + $0x320] ss:$16 sps:$4 sm:$0xff]  }
  0x33   :  { %1672 = vmatprep.subr.bf16.mxu0 %v5118_v44  ;;  %1836 = vmatprep.subr.bf16.mxu1 %v5120_v45  ;;  %v5207_v44 = vld [vmem:[%s7548_s29 + $0x328] ss:$16 sps:$4 sm:$0xff]   ;;  %v5212_v45 = vld [vmem:[%s7548_s29 + $0x344] ss:$16 sps:$4 sm:$0xff]  }
  0x36   :  { %1673 = vmatpush1.bf16.msra.mxu0 %v5122_v47  ;;  %1837 = vmatpush1.bf16.msra.mxu1 %v5123_v49  ;;  %v5210_v47 = vld [vmem:[%s7548_s29 + $0x340] ss:$16 sps:$4 sm:$0xff]   ;;  %v5218_v49 = vld [vmem:[%s7548_s29 + $0x364] ss:$16 sps:$4 sm:$0xff]  }
  0x37   :  { %1674 = vmatprep.subr.bf16.mxu0 %v5124_v50  ;;  %1838 = vmatprep.subr.bf16.mxu1 %v5126_v51  ;;  %v5221_v50 = vld [vmem:[%s7548_s29 + $0x36c] ss:$16 sps:$4 sm:$0xff]   ;;  %v5216_v51 = vld [vmem:[%s7548_s29 + $0x360] ss:$16 sps:$4 sm:$0xff]  }
  0x3a   :  { %1675 = vmatpush1.bf16.msra.mxu0 %v5128_v52  ;;  %1839 = vmatpush1.bf16.msra.mxu1 %v5129_v53  ;;  %v5219_v52 = vld [vmem:[%s7548_s29 + $0x368] ss:$16 sps:$4 sm:$0xff]   ;;  %v5224_v53 = vld [vmem:[%s7548_s29 + $0x384] ss:$16 sps:$4 sm:$0xff]  }
  0x3b   :  { %1676 = vmatprep.subr.bf16.mxu0 %v5130_v54  ;;  %1840 = vmatprep.subr.bf16.mxu1 %v5132_v55  ;;  %v5227_v54 = vld [vmem:[%s7548_s29 + $0x38c] ss:$16 sps:$4 sm:$0xff]   ;;  %v5222_v55 = vld [vmem:[%s7548_s29 + $0x380] ss:$16 sps:$4 sm:$0xff]  }
  0x3e   :  { %1677 = vmatpush1.bf16.msra.mxu0 %v5134_v56  ;;  %1841 = vmatpush1.bf16.msra.mxu1 %v5135_v57  ;;  %v5225_v56 = vld [vmem:[%s7548_s29 + $0x388] ss:$16 sps:$4 sm:$0xff]   ;;  %v5230_v57 = vld [vmem:[%s7548_s29 + $0x3a4] ss:$16 sps:$4 sm:$0xff]  }
  0x3f   :  { %1678 = vmatprep.subr.bf16.mxu0 %v5136_v58  ;;  %1842 = vmatprep.subr.bf16.mxu1 %v5138_v59  ;;  %v5233_v58 = vld [vmem:[%s7548_s29 + $0x3ac] ss:$16 sps:$4 sm:$0xff]   ;;  %v5228_v59 = vld [vmem:[%s7548_s29 + $0x3a0] ss:$16 sps:$4 sm:$0xff]  }
  0x42   :  { %1679 = vmatpush1.bf16.msra.mxu0 %v5140_v60  ;;  %1843 = vmatpush1.bf16.msra.mxu1 %v5141_v61  ;;  %v5231_v60 = vld [vmem:[%s7548_s29 + $0x3a8] ss:$16 sps:$4 sm:$0xff]   ;;  %v5236_v61 = vld [vmem:[%s7548_s29 + $0x3c4] ss:$16 sps:$4 sm:$0xff]  }
  0x43   :  { %1680 = vmatprep.subr.bf16.mxu0 %v5142_v62  ;;  %1844 = vmatprep.subr.bf16.mxu1 %v5144_v63  ;;  %v5239_v62 = vld [vmem:[%s7548_s29 + $0x3cc] ss:$16 sps:$4 sm:$0xff]   ;;  %v5234_v63 = vld [vmem:[%s7548_s29 + $0x3c0] ss:$16 sps:$4 sm:$0xff]  }
  0x46   :  { %1681 = vmatpush1.bf16.msra.mxu0 %v5146_v0  ;;  %1845 = vmatpush1.bf16.msra.mxu1 %v5147_v1  ;;  %v5237_v0 = vld [vmem:[%s7548_s29 + $0x3c8] ss:$16 sps:$4 sm:$0xff]   ;;  %v5242_v1 = vld [vmem:[%s7548_s29 + $0x3e4] ss:$16 sps:$4 sm:$0xff]  }
  0x47   :  { %1691 = vmatprep.subr.bf16.mxu0 %v5152_v2  ;;  %1855 = vmatprep.subr.bf16.mxu1 %v5155_v3  ;;  %v5245_v2 = vld [vmem:[%s7548_s29 + $0x3ec] ss:$16 sps:$4 sm:$0xff]   ;;  %v5240_v3 = vld [vmem:[%s7548_s29 + $0x3e0] ss:$16 sps:$4 sm:$0xff]  }
  0x49   :  { %1683 = vmatmul.mubr.bf16.vlgmr.msra.gmra.mrb[0].mxu0 %v4138_v4  ;;  %1847 = vmatmul.mubr.bf16.vlgmr.msra.gmra.mrb[0].mxu1 %v4138_v4  ;;  %v5243_v4 = vld [vmem:[%s7548_s29 + $0x3e8] ss:$16 sps:$4 sm:$0xff]  }
  0x4a   :  { %1692 = vmatpush1.bf16.msra.mxu0 %v5150_v5  ;;  %1856 = vmatpush1.bf16.msra.mxu1 %v5153_v6  ;;  %v5250_v5 = vld [vmem:[%s7548_s29 + $0x404] ss:$16 sps:$4 sm:$0xff]   ;;  %v5253_v6 = vld [vmem:[%s7548_s29 + $0x40c] ss:$16 sps:$4 sm:$0xff]  }
  0x4b   :  { %1693 = vmatprep.subr.bf16.mxu0 %v5158_v7  ;;  %1857 = vmatprep.subr.bf16.mxu1 %v5161_v8  ;;  %v4140_v7 = vcombine.low %v5999_v29, %v5999_v29  ;;  %v5248_v8 = vld [vmem:[%s7548_s29 + $0x400] ss:$16 sps:$4 sm:$0xff]   ;;  %v5283_v29 = vld [vmem:[%s7548_s29 + $0x4ac] ss:$16 sps:$4 sm:$0xff]  }
  0x4c   :  { %1723 = vmatprep.mubr.bf16.mxu0 %v4141_v30  ;;  %1887 = vmatprep.mubr.bf16.mxu1 %v4141_v30  ;;  %v5278_v30 = vld [vmem:[%s7548_s29 + $0x4a0] ss:$16 sps:$4 sm:$0xff]  }
  0x4e   :  { %1694 = vmatpush1.bf16.msra.mxu0 %v5156_v9  ;;  %1858 = vmatpush1.bf16.msra.mxu1 %v5159_v10  ;;  %v5251_v9 = vld [vmem:[%s7548_s29 + $0x408] ss:$16 sps:$4 sm:$0xff]   ;;  %v5256_v10 = vld [vmem:[%s7548_s29 + $0x424] ss:$16 sps:$4 sm:$0xff]  }
  0x4f   :  { %1695 = vmatprep.subr.bf16.mxu0 %v5164_v11  ;;  %1859 = vmatprep.subr.bf16.mxu1 %v5167_v12  ;;  %v6137_v11 = vld [vmem:[%s7549_s23 + $0x10] sm:$0xff]  ;;  %v5259_v12 = vld [vmem:[%s7548_s29 + $0x42c] ss:$16 sps:$4 sm:$0xff]  }
  0x52   :  { %1696 = vmatpush1.bf16.msra.mxu0 %v5162_v13  ;;  %1860 = vmatpush1.bf16.msra.mxu1 %v5165_v14  ;;  %v4143_v13 = vcombine.high %v6137_v11, %v6137_v11  ;;  %v5254_v14 = vld [vmem:[%s7548_s29 + $0x420] ss:$16 sps:$4 sm:$0xff]  }
  0x53   :  { %1697 = vmatprep.subr.bf16.mxu0 %v5170_v15  ;;  %1861 = vmatprep.subr.bf16.mxu1 %v5173_v16  ;;  %v5257_v15 = vld [vmem:[%s7548_s29 + $0x428] ss:$16 sps:$4 sm:$0xff]   ;;  %v5262_v16 = vld [vmem:[%s7548_s29 + $0x444] ss:$16 sps:$4 sm:$0xff]  }
  0x56   :  { %1698 = vmatpush1.bf16.msra.mxu0 %v5168_v17  ;;  %1862 = vmatpush1.bf16.msra.mxu1 %v5171_v18  ;;  %v5265_v17 = vld [vmem:[%s7548_s29 + $0x44c] ss:$16 sps:$4 sm:$0xff]   ;;  %v5260_v18 = vld [vmem:[%s7548_s29 + $0x440] ss:$16 sps:$4 sm:$0xff]  }
  0x57   :  { %1699 = vmatprep.subr.bf16.mxu0 %v5176_v19  ;;  %1863 = vmatprep.subr.bf16.mxu1 %v5179_v20  ;;  %v5263_v19 = vld [vmem:[%s7548_s29 + $0x448] ss:$16 sps:$4 sm:$0xff]   ;;  %v5268_v20 = vld [vmem:[%s7548_s29 + $0x464] ss:$16 sps:$4 sm:$0xff]  }
  0x5a   :  { %1700 = vmatpush1.bf16.msra.mxu0 %v5174_v21  ;;  %1864 = vmatpush1.bf16.msra.mxu1 %v5177_v22  ;;  %v5271_v21 = vld [vmem:[%s7548_s29 + $0x46c] ss:$16 sps:$4 sm:$0xff]   ;;  %v5266_v22 = vld [vmem:[%s7548_s29 + $0x460] ss:$16 sps:$4 sm:$0xff]  }
  0x5b   :  { %1701 = vmatprep.subr.bf16.mxu0 %v5182_v23  ;;  %1865 = vmatprep.subr.bf16.mxu1 %v5185_v24  ;;  %v5269_v23 = vld [vmem:[%s7548_s29 + $0x468] ss:$16 sps:$4 sm:$0xff]   ;;  %v5274_v24 = vld [vmem:[%s7548_s29 + $0x484] ss:$16 sps:$4 sm:$0xff]  }
  0x5e   :  { %1702 = vmatpush1.bf16.msra.mxu0 %v5180_v25  ;;  %1866 = vmatpush1.bf16.msra.mxu1 %v5183_v26  ;;  %v5277_v25 = vld [vmem:[%s7548_s29 + $0x48c] ss:$16 sps:$4 sm:$0xff]   ;;  %v5272_v26 = vld [vmem:[%s7548_s29 + $0x480] ss:$16 sps:$4 sm:$0xff]  }
  0x5f   :  { %1703 = vmatprep.subr.bf16.mxu0 %v5188_v27  ;;  %1867 = vmatprep.subr.bf16.mxu1 %v5191_v28  ;;  %v5275_v27 = vld [vmem:[%s7548_s29 + $0x488] ss:$16 sps:$4 sm:$0xff]   ;;  %v5280_v28 = vld [vmem:[%s7548_s29 + $0x4a4] ss:$16 sps:$4 sm:$0xff]  }
  0x62   :  { %1704 = vmatpush1.bf16.msra.mxu0 %v5186_v31  ;;  %1868 = vmatpush1.bf16.msra.mxu1 %v5189_v32  ;;  %v5281_v31 = vld [vmem:[%s7548_s29 + $0x4a8] ss:$16 sps:$4 sm:$0xff]   ;;  %v5286_v32 = vld [vmem:[%s7548_s29 + $0x4c4] ss:$16 sps:$4 sm:$0xff]  }
  0x63   :  { %1705 = vmatprep.subr.bf16.mxu0 %v5194_v33  ;;  %1869 = vmatprep.subr.bf16.mxu1 %v5197_v34  ;;  %v5289_v33 = vld [vmem:[%s7548_s29 + $0x4cc] ss:$16 sps:$4 sm:$0xff]   ;;  %v5284_v34 = vld [vmem:[%s7548_s29 + $0x4c0] ss:$16 sps:$4 sm:$0xff]  }
  0x66   :  { %1706 = vmatpush1.bf16.msra.mxu0 %v5192_v35  ;;  %1870 = vmatpush1.bf16.msra.mxu1 %v5195_v36  ;;  %v5287_v35 = vld [vmem:[%s7548_s29 + $0x4c8] ss:$16 sps:$4 sm:$0xff]   ;;  %v5292_v36 = vld [vmem:[%s7548_s29 + $0x4e4] ss:$16 sps:$4 sm:$0xff]  }
  0x67   :  { %1707 = vmatprep.subr.bf16.mxu0 %v5200_v37  ;;  %1871 = vmatprep.subr.bf16.mxu1 %v5203_v38  ;;  %v5295_v37 = vld [vmem:[%s7548_s29 + $0x4ec] ss:$16 sps:$4 sm:$0xff]   ;;  %v5290_v38 = vld [vmem:[%s7548_s29 + $0x4e0] ss:$16 sps:$4 sm:$0xff]  }
  0x6a   :  { %1708 = vmatpush1.bf16.msra.mxu0 %v5198_v39  ;;  %1872 = vmatpush1.bf16.msra.mxu1 %v5201_v40  ;;  %v5293_v39 = vld [vmem:[%s7548_s29 + $0x4e8] ss:$16 sps:$4 sm:$0xff]   ;;  %v5298_v40 = vld [vmem:[%s7548_s29 + $0x504] ss:$16 sps:$4 sm:$0xff]  }
  0x6b   :  { %1709 = vmatprep.subr.bf16.mxu0 %v5206_v41  ;;  %1873 = vmatprep.subr.bf16.mxu1 %v5209_v42  ;;  %v5301_v41 = vld [vmem:[%s7548_s29 + $0x50c] ss:$16 sps:$4 sm:$0xff]   ;;  %v5296_v42 = vld [vmem:[%s7548_s29 + $0x500] ss:$16 sps:$4 sm:$0xff]  }
  0x6e   :  { %1710 = vmatpush1.bf16.msra.mxu0 %v5204_v43  ;;  %1874 = vmatpush1.bf16.msra.mxu1 %v5207_v44  ;;  %v5299_v43 = vld [vmem:[%s7548_s29 + $0x508] ss:$16 sps:$4 sm:$0xff]   ;;  %v5304_v44 = vld [vmem:[%s7548_s29 + $0x524] ss:$16 sps:$4 sm:$0xff]  }
  0x6f   :  { %1711 = vmatprep.subr.bf16.mxu0 %v5212_v45  ;;  %1875 = vmatprep.subr.bf16.mxu1 %v5215_v46  ;;  %v5307_v45 = vld [vmem:[%s7548_s29 + $0x52c] ss:$16 sps:$4 sm:$0xff]   ;;  %v5302_v46 = vld [vmem:[%s7548_s29 + $0x520] ss:$16 sps:$4 sm:$0xff]  }
  0x72   :  { %1712 = vmatpush1.bf16.msra.mxu0 %v5210_v47  ;;  %1876 = vmatpush1.bf16.msra.mxu1 %v5213_v48  ;;  %v5305_v47 = vld [vmem:[%s7548_s29 + $0x528] ss:$16 sps:$4 sm:$0xff]   ;;  %v5310_v48 = vld [vmem:[%s7548_s29 + $0x544] ss:$16 sps:$4 sm:$0xff]  }
  0x73   :  { %1713 = vmatprep.subr.bf16.mxu0 %v5218_v49  ;;  %1877 = vmatprep.subr.bf16.mxu1 %v5221_v50  ;;  %v5313_v49 = vld [vmem:[%s7548_s29 + $0x54c] ss:$16 sps:$4 sm:$0xff]   ;;  %v5308_v50 = vld [vmem:[%s7548_s29 + $0x540] ss:$16 sps:$4 sm:$0xff]  }
  0x76   :  { %1714 = vmatpush1.bf16.msra.mxu0 %v5216_v51  ;;  %1878 = vmatpush1.bf16.msra.mxu1 %v5219_v52  ;;  %v5311_v51 = vld [vmem:[%s7548_s29 + $0x548] ss:$16 sps:$4 sm:$0xff]   ;;  %v5316_v52 = vld [vmem:[%s7548_s29 + $0x564] ss:$16 sps:$4 sm:$0xff]  }
  0x77   :  { %1715 = vmatprep.subr.bf16.mxu0 %v5224_v53  ;;  %1879 = vmatprep.subr.bf16.mxu1 %v5227_v54  ;;  %v5319_v53 = vld [vmem:[%s7548_s29 + $0x56c] ss:$16 sps:$4 sm:$0xff]   ;;  %v5314_v54 = vld [vmem:[%s7548_s29 + $0x560] ss:$16 sps:$4 sm:$0xff]  }
  0x7a   :  { %1716 = vmatpush1.bf16.msra.mxu0 %v5222_v55  ;;  %1880 = vmatpush1.bf16.msra.mxu1 %v5225_v56  ;;  %v5317_v55 = vld [vmem:[%s7548_s29 + $0x568] ss:$16 sps:$4 sm:$0xff]   ;;  %v5322_v56 = vld [vmem:[%s7548_s29 + $0x584] ss:$16 sps:$4 sm:$0xff]  }
  0x7b   :  { %1717 = vmatprep.subr.bf16.mxu0 %v5230_v57  ;;  %1881 = vmatprep.subr.bf16.mxu1 %v5233_v58  ;;  %v5325_v57 = vld [vmem:[%s7548_s29 + $0x58c] ss:$16 sps:$4 sm:$0xff]   ;;  %v5320_v58 = vld [vmem:[%s7548_s29 + $0x580] ss:$16 sps:$4 sm:$0xff]  }
  0x7e   :  { %1718 = vmatpush1.bf16.msra.mxu0 %v5228_v59  ;;  %1882 = vmatpush1.bf16.msra.mxu1 %v5231_v60  ;;  %v5323_v59 = vld [vmem:[%s7548_s29 + $0x588] ss:$16 sps:$4 sm:$0xff]   ;;  %v5328_v60 = vld [vmem:[%s7548_s29 + $0x5a4] ss:$16 sps:$4 sm:$0xff]  }
  0x7f   :  { %1719 = vmatprep.subr.bf16.mxu0 %v5236_v61  ;;  %1883 = vmatprep.subr.bf16.mxu1 %v5239_v62  ;;  %v5331_v61 = vld [vmem:[%s7548_s29 + $0x5ac] ss:$16 sps:$4 sm:$0xff]   ;;  %v5326_v62 = vld [vmem:[%s7548_s29 + $0x5a0] ss:$16 sps:$4 sm:$0xff]  }
  0x82   :  { %1720 = vmatpush1.bf16.msra.mxu0 %v5234_v63  ;;  %1884 = vmatpush1.bf16.msra.mxu1 %v5237_v0  ;;  %v5329_v63 = vld [vmem:[%s7548_s29 + $0x5a8] ss:$16 sps:$4 sm:$0xff]   ;;  %v5334_v0 = vld [vmem:[%s7548_s29 + $0x5c4] ss:$16 sps:$4 sm:$0xff]  }
  0x83   :  { %1721 = vmatprep.subr.bf16.mxu0 %v5242_v1  ;;  %1885 = vmatprep.subr.bf16.mxu1 %v5245_v2  ;;  %v5337_v1 = vld [vmem:[%s7548_s29 + $0x5cc] ss:$16 sps:$4 sm:$0xff]   ;;  %v5332_v2 = vld [vmem:[%s7548_s29 + $0x5c0] ss:$16 sps:$4 sm:$0xff]  }
  0x86   :  { %1722 = vmatpush1.bf16.msra.mxu0 %v5240_v3  ;;  %1886 = vmatpush1.bf16.msra.mxu1 %v5243_v4  ;;  %v5335_v3 = vld [vmem:[%s7548_s29 + $0x5c8] ss:$16 sps:$4 sm:$0xff]   ;;  %v5340_v4 = vld [vmem:[%s7548_s29 + $0x5e4] ss:$16 sps:$4 sm:$0xff]  }
  0x87   :  { %1732 = vmatprep.subr.bf16.mxu0 %v5250_v5  ;;  %1896 = vmatprep.subr.bf16.mxu1 %v5253_v6  ;;  %v5343_v5 = vld [vmem:[%s7548_s29 + $0x5ec] ss:$16 sps:$4 sm:$0xff]   ;;  %v5338_v6 = vld [vmem:[%s7548_s29 + $0x5e0] ss:$16 sps:$4 sm:$0xff]  }
  0x89   :  { %1724 = vmatmul.mubr.bf16.vlgmr.msra.gmra.mrb[0].mxu0 %v4140_v7  ;;  %1888 = vmatmul.mubr.bf16.vlgmr.msra.gmra.mrb[0].mxu1 %v4140_v7  ;;  %v5341_v7 = vld [vmem:[%s7548_s29 + $0x5e8] ss:$16 sps:$4 sm:$0xff]  }
  0x8a   :  { %1733 = vmatpush1.bf16.msra.mxu0 %v5248_v8  ;;  %1897 = vmatpush1.bf16.msra.mxu1 %v5251_v9  ;;  %v5348_v8 = vld [vmem:[%s7548_s29 + $0x604] ss:$16 sps:$4 sm:$0xff]   ;;  %v5351_v9 = vld [vmem:[%s7548_s29 + $0x60c] ss:$16 sps:$4 sm:$0xff]  }
  0x8b   :  { %1734 = vmatprep.subr.bf16.mxu0 %v5256_v10  ;;  %1898 = vmatprep.subr.bf16.mxu1 %v5259_v12  ;;  %v5346_v10 = vld [vmem:[%s7548_s29 + $0x600] ss:$16 sps:$4 sm:$0xff]   ;;  %v5349_v12 = vld [vmem:[%s7548_s29 + $0x608] ss:$16 sps:$4 sm:$0xff]  }
  0x8c   :  { %1764 = vmatprep.mubr.bf16.mxu0 %v4143_v13  ;;  %1928 = vmatprep.mubr.bf16.mxu1 %v4143_v13  ;;  %v6333_v13 = vld [vmem:[%s7549_s23 + $0x18] sm:$0xff] }
  0x8e   :  { %1735 = vmatpush1.bf16.msra.mxu0 %v5254_v14  ;;  %1899 = vmatpush1.bf16.msra.mxu1 %v5257_v15  ;;  %v4142_v14 = vcombine.low %v6137_v11, %v6137_v11  ;;  %v5354_v15 = vld [vmem:[%s7548_s29 + $0x624] ss:$16 sps:$4 sm:$0xff]   ;;  %v5355_v11 = vld [vmem:[%s7548_s29 + $0x628] ss:$16 sps:$4 sm:$0xff]  }
  0x8f   :  { %1736 = vmatprep.subr.bf16.mxu0 %v5262_v16  ;;  %1900 = vmatprep.subr.bf16.mxu1 %v5265_v17  ;;  %v5357_v16 = vld [vmem:[%s7548_s29 + $0x62c] ss:$16 sps:$4 sm:$0xff]   ;;  %v5352_v17 = vld [vmem:[%s7548_s29 + $0x620] ss:$16 sps:$4 sm:$0xff]  }
  0x92   :  { %1737 = vmatpush1.bf16.msra.mxu0 %v5260_v18  ;;  %1901 = vmatpush1.bf16.msra.mxu1 %v5263_v19  ;;  %v4145_v18 = vcombine.high %v6333_v13, %v6333_v13  ;;  %v5360_v19 = vld [vmem:[%s7548_s29 + $0x644] ss:$16 sps:$4 sm:$0xff]  }
  0x93   :  { %1738 = vmatprep.subr.bf16.mxu0 %v5268_v20  ;;  %1902 = vmatprep.subr.bf16.mxu1 %v5271_v21  ;;  %v5363_v20 = vld [vmem:[%s7548_s29 + $0x64c] ss:$16 sps:$4 sm:$0xff]   ;;  %v5358_v21 = vld [vmem:[%s7548_s29 + $0x640] ss:$16 sps:$4 sm:$0xff]  }
  0x96   :  { %1739 = vmatpush1.bf16.msra.mxu0 %v5266_v22  ;;  %1903 = vmatpush1.bf16.msra.mxu1 %v5269_v23  ;;  %v5361_v22 = vld [vmem:[%s7548_s29 + $0x648] ss:$16 sps:$4 sm:$0xff]   ;;  %v5366_v23 = vld [vmem:[%s7548_s29 + $0x664] ss:$16 sps:$4 sm:$0xff]  }
  0x97   :  { %1740 = vmatprep.subr.bf16.mxu0 %v5274_v24  ;;  %1904 = vmatprep.subr.bf16.mxu1 %v5277_v25  ;;  %v5369_v24 = vld [vmem:[%s7548_s29 + $0x66c] ss:$16 sps:$4 sm:$0xff]   ;;  %v5364_v25 = vld [vmem:[%s7548_s29 + $0x660] ss:$16 sps:$4 sm:$0xff]  }
  0x9a   :  { %1741 = vmatpush1.bf16.msra.mxu0 %v5272_v26  ;;  %1905 = vmatpush1.bf16.msra.mxu1 %v5275_v27  ;;  %v5367_v26 = vld [vmem:[%s7548_s29 + $0x668] ss:$16 sps:$4 sm:$0xff]   ;;  %v5372_v27 = vld [vmem:[%s7548_s29 + $0x684] ss:$16 sps:$4 sm:$0xff]  }
  0x9b   :  { %1742 = vmatprep.subr.bf16.mxu0 %v5280_v28  ;;  %1906 = vmatprep.subr.bf16.mxu1 %v5283_v29  ;;  %v5375_v28 = vld [vmem:[%s7548_s29 + $0x68c] ss:$16 sps:$4 sm:$0xff]   ;;  %v5370_v29 = vld [vmem:[%s7548_s29 + $0x680] ss:$16 sps:$4 sm:$0xff]  }
  0x9e   :  { %1743 = vmatpush1.bf16.msra.mxu0 %v5278_v30  ;;  %1907 = vmatpush1.bf16.msra.mxu1 %v5281_v31  ;;  %v5373_v30 = vld [vmem:[%s7548_s29 + $0x688] ss:$16 sps:$4 sm:$0xff]   ;;  %v5378_v31 = vld [vmem:[%s7548_s29 + $0x6a4] ss:$16 sps:$4 sm:$0xff]  }
  0x9f   :  { %1744 = vmatprep.subr.bf16.mxu0 %v5286_v32  ;;  %1908 = vmatprep.subr.bf16.mxu1 %v5289_v33  ;;  %v5381_v32 = vld [vmem:[%s7548_s29 + $0x6ac] ss:$16 sps:$4 sm:$0xff]   ;;  %v5376_v33 = vld [vmem:[%s7548_s29 + $0x6a0] ss:$16 sps:$4 sm:$0xff]  }
  0xa2   :  { %1745 = vmatpush1.bf16.msra.mxu0 %v5284_v34  ;;  %1909 = vmatpush1.bf16.msra.mxu1 %v5287_v35  ;;  %v5379_v34 = vld [vmem:[%s7548_s29 + $0x6a8] ss:$16 sps:$4 sm:$0xff]   ;;  %v5384_v35 = vld [vmem:[%s7548_s29 + $0x6c4] ss:$16 sps:$4 sm:$0xff]  }
  0xa3   :  { %1746 = vmatprep.subr.bf16.mxu0 %v5292_v36  ;;  %1910 = vmatprep.subr.bf16.mxu1 %v5295_v37  ;;  %v5387_v36 = vld [vmem:[%s7548_s29 + $0x6cc] ss:$16 sps:$4 sm:$0xff]   ;;  %v5382_v37 = vld [vmem:[%s7548_s29 + $0x6c0] ss:$16 sps:$4 sm:$0xff]  }
  0xa6   :  { %1747 = vmatpush1.bf16.msra.mxu0 %v5290_v38  ;;  %1911 = vmatpush1.bf16.msra.mxu1 %v5293_v39  ;;  %v5385_v38 = vld [vmem:[%s7548_s29 + $0x6c8] ss:$16 sps:$4 sm:$0xff]   ;;  %v5390_v39 = vld [vmem:[%s7548_s29 + $0x6e4] ss:$16 sps:$4 sm:$0xff]  }
  0xa7   :  { %1748 = vmatprep.subr.bf16.mxu0 %v5298_v40  ;;  %1912 = vmatprep.subr.bf16.mxu1 %v5301_v41  ;;  %v5393_v40 = vld [vmem:[%s7548_s29 + $0x6ec] ss:$16 sps:$4 sm:$0xff]   ;;  %v5388_v41 = vld [vmem:[%s7548_s29 + $0x6e0] ss:$16 sps:$4 sm:$0xff]  }
  0xaa   :  { %1749 = vmatpush1.bf16.msra.mxu0 %v5296_v42  ;;  %1913 = vmatpush1.bf16.msra.mxu1 %v5299_v43  ;;  %v5391_v42 = vld [vmem:[%s7548_s29 + $0x6e8] ss:$16 sps:$4 sm:$0xff]   ;;  %v5396_v43 = vld [vmem:[%s7548_s29 + $0x704] ss:$16 sps:$4 sm:$0xff]  }
  0xab   :  { %1750 = vmatprep.subr.bf16.mxu0 %v5304_v44  ;;  %1914 = vmatprep.subr.bf16.mxu1 %v5307_v45  ;;  %v5399_v44 = vld [vmem:[%s7548_s29 + $0x70c] ss:$16 sps:$4 sm:$0xff]   ;;  %v5394_v45 = vld [vmem:[%s7548_s29 + $0x700] ss:$16 sps:$4 sm:$0xff]  }
  0xae   :  { %1751 = vmatpush1.bf16.msra.mxu0 %v5302_v46  ;;  %1915 = vmatpush1.bf16.msra.mxu1 %v5305_v47  ;;  %v5397_v46 = vld [vmem:[%s7548_s29 + $0x708] ss:$16 sps:$4 sm:$0xff]   ;;  %v5402_v47 = vld [vmem:[%s7548_s29 + $0x724] ss:$16 sps:$4 sm:$0xff]  }
  0xaf   :  { %1752 = vmatprep.subr.bf16.mxu0 %v5310_v48  ;;  %1916 = vmatprep.subr.bf16.mxu1 %v5313_v49  ;;  %v5405_v48 = vld [vmem:[%s7548_s29 + $0x72c] ss:$16 sps:$4 sm:$0xff]   ;;  %v5400_v49 = vld [vmem:[%s7548_s29 + $0x720] ss:$16 sps:$4 sm:$0xff]  }
  0xb2   :  { %1753 = vmatpush1.bf16.msra.mxu0 %v5308_v50  ;;  %1917 = vmatpush1.bf16.msra.mxu1 %v5311_v51  ;;  %v5403_v50 = vld [vmem:[%s7548_s29 + $0x728] ss:$16 sps:$4 sm:$0xff]   ;;  %v5408_v51 = vld [vmem:[%s7548_s29 + $0x744] ss:$16 sps:$4 sm:$0xff]  }
  0xb3   :  { %1754 = vmatprep.subr.bf16.mxu0 %v5316_v52  ;;  %1918 = vmatprep.subr.bf16.mxu1 %v5319_v53  ;;  %v5411_v52 = vld [vmem:[%s7548_s29 + $0x74c] ss:$16 sps:$4 sm:$0xff]   ;;  %v5406_v53 = vld [vmem:[%s7548_s29 + $0x740] ss:$16 sps:$4 sm:$0xff]  }
  0xb6   :  { %1755 = vmatpush1.bf16.msra.mxu0 %v5314_v54  ;;  %1919 = vmatpush1.bf16.msra.mxu1 %v5317_v55  ;;  %v5409_v54 = vld [vmem:[%s7548_s29 + $0x748] ss:$16 sps:$4 sm:$0xff]   ;;  %v5414_v55 = vld [vmem:[%s7548_s29 + $0x764] ss:$16 sps:$4 sm:$0xff]  }
  0xb7   :  { %1756 = vmatprep.subr.bf16.mxu0 %v5322_v56  ;;  %1920 = vmatprep.subr.bf16.mxu1 %v5325_v57  ;;  %v5417_v56 = vld [vmem:[%s7548_s29 + $0x76c] ss:$16 sps:$4 sm:$0xff]   ;;  %v5412_v57 = vld [vmem:[%s7548_s29 + $0x760] ss:$16 sps:$4 sm:$0xff]  }
  0xba   :  { %1757 = vmatpush1.bf16.msra.mxu0 %v5320_v58  ;;  %1921 = vmatpush1.bf16.msra.mxu1 %v5323_v59  ;;  %v5415_v58 = vld [vmem:[%s7548_s29 + $0x768] ss:$16 sps:$4 sm:$0xff]   ;;  %v5420_v59 = vld [vmem:[%s7548_s29 + $0x784] ss:$16 sps:$4 sm:$0xff]  }
  0xbb   :  { %1758 = vmatprep.subr.bf16.mxu0 %v5328_v60  ;;  %1922 = vmatprep.subr.bf16.mxu1 %v5331_v61  ;;  %v5423_v60 = vld [vmem:[%s7548_s29 + $0x78c] ss:$16 sps:$4 sm:$0xff]   ;;  %v5418_v61 = vld [vmem:[%s7548_s29 + $0x780] ss:$16 sps:$4 sm:$0xff]  }
  0xbe   :  { %1759 = vmatpush1.bf16.msra.mxu0 %v5326_v62  ;;  %1923 = vmatpush1.bf16.msra.mxu1 %v5329_v63  ;;  %v5421_v62 = vld [vmem:[%s7548_s29 + $0x788] ss:$16 sps:$4 sm:$0xff]   ;;  %v5426_v63 = vld [vmem:[%s7548_s29 + $0x7a4] ss:$16 sps:$4 sm:$0xff]  }
  0xbf   :  { %1760 = vmatprep.subr.bf16.mxu0 %v5334_v0  ;;  %1924 = vmatprep.subr.bf16.mxu1 %v5337_v1  ;;  %v5429_v0 = vld [vmem:[%s7548_s29 + $0x7ac] ss:$16 sps:$4 sm:$0xff]   ;;  %v5424_v1 = vld [vmem:[%s7548_s29 + $0x7a0] ss:$16 sps:$4 sm:$0xff]  }
  0xc2   :  { %1761 = vmatpush1.bf16.msra.mxu0 %v5332_v2  ;;  %1925 = vmatpush1.bf16.msra.mxu1 %v5335_v3  ;;  %v5427_v2 = vld [vmem:[%s7548_s29 + $0x7a8] ss:$16 sps:$4 sm:$0xff]   ;;  %v5432_v3 = vld [vmem:[%s7548_s29 + $0x7c4] ss:$16 sps:$4 sm:$0xff]  }
  0xc3   :  { %1762 = vmatprep.subr.bf16.mxu0 %v5340_v4  ;;  %1926 = vmatprep.subr.bf16.mxu1 %v5343_v5  ;;  %v5435_v4 = vld [vmem:[%s7548_s29 + $0x7cc] ss:$16 sps:$4 sm:$0xff]   ;;  %v5430_v5 = vld [vmem:[%s7548_s29 + $0x7c0] ss:$16 sps:$4 sm:$0xff]  }
  0xc6   :  { %1763 = vmatpush1.bf16.msra.mxu0 %v5338_v6  ;;  %1927 = vmatpush1.bf16.msra.mxu1 %v5341_v7  ;;  %v5433_v6 = vld [vmem:[%s7548_s29 + $0x7c8] ss:$16 sps:$4 sm:$0xff]   ;;  %v5438_v7 = vld [vmem:[%s7548_s29 + $0x7e4] ss:$16 sps:$4 sm:$0xff]  }
  0xc7   :  { %1773 = vmatprep.subr.bf16.mxu0 %v5348_v8  ;;  %1937 = vmatprep.subr.bf16.mxu1 %v5351_v9  ;;  %v5441_v8 = vld [vmem:[%s7548_s29 + $0x7ec] ss:$16 sps:$4 sm:$0xff]   ;;  %v5436_v9 = vld [vmem:[%s7548_s29 + $0x7e0] ss:$16 sps:$4 sm:$0xff]  }
  0xc9   :  { %1765 = vmatmul.mubr.bf16.vlgmr.msra.gmra.mrb[0].mxu0 %v4142_v14  ;;  %1929 = vmatmul.mubr.bf16.vlgmr.msra.gmra.mrb[0].mxu1 %v4142_v14  ;;  %v4144_v14 = vcombine.low %v6333_v13, %v6333_v13  ;;  %v5452_v13 = vld [vmem:[%s7550_s27 + $0x24] ss:$8 sps:$4 sm:$0xff]  }
  0xca   :  { %1774 = vmatpush1.bf16.msra.mxu0 %v5346_v10  ;;  %1938 = vmatpush1.bf16.msra.mxu1 %v5349_v12  ;;  %v5439_v10 = vld [vmem:[%s7548_s29 + $0x7e8] ss:$16 sps:$4 sm:$0xff]   ;;  %v5446_v12 = vld [vmem:[%s7550_s27 + $0x4] ss:$8 sps:$4 sm:$0xff]  }
  0xcb   :  { %1775 = vmatprep.subr.bf16.mxu0 %v5354_v15  ;;  %1939 = vmatprep.subr.bf16.mxu1 %v5357_v16  ;;  %v5444_v15 = vld [vmem:[%s7550_s27] ss:$8 sps:$4 sm:$0xff]   ;;  %v5449_v16 = vld [vmem:[%s7550_s27 + $0x14] ss:$8 sps:$4 sm:$0xff]  }
  0xcc   :  { %1805 = vmatprep.mubr.bf16.mxu0 %v4145_v18  ;;  %1969 = vmatprep.mubr.bf16.mxu1 %v4145_v18  ;;  %v5455_v18 = vld [vmem:[%s7550_s27 + $0x34] ss:$8 sps:$4 sm:$0xff]  }
  0xce   :  { %1776 = vmatpush1.bf16.msra.mxu0 %v5352_v17  ;;  %1940 = vmatpush1.bf16.msra.mxu1 %v5355_v11  ;;  %v5447_v17 = vld [vmem:[%s7550_s27 + $0x10] ss:$8 sps:$4 sm:$0xff]   ;;  %v5450_v11 = vld [vmem:[%s7550_s27 + $0x20] ss:$8 sps:$4 sm:$0xff]  }
  0xcf   :  { %1777 = vmatprep.subr.bf16.mxu0 %v5360_v19  ;;  %1941 = vmatprep.subr.bf16.mxu1 %v5363_v20  ;;  %v5453_v19 = vld [vmem:[%s7550_s27 + $0x30] ss:$8 sps:$4 sm:$0xff]   ;;  %v5458_v20 = vld [vmem:[%s7550_s27 + $0x44] ss:$8 sps:$4 sm:$0xff]  }
  0xd2   :  { %1778 = vmatpush1.bf16.msra.mxu0 %v5358_v21  ;;  %1942 = vmatpush1.bf16.msra.mxu1 %v5361_v22  ;;  %v5456_v21 = vld [vmem:[%s7550_s27 + $0x40] ss:$8 sps:$4 sm:$0xff]   ;;  %v5461_v22 = vld [vmem:[%s7550_s27 + $0x54] ss:$8 sps:$4 sm:$0xff]  }
  0xd3   :  { %1779 = vmatprep.subr.bf16.mxu0 %v5366_v23  ;;  %1943 = vmatprep.subr.bf16.mxu1 %v5369_v24  ;;  %v5459_v23 = vld [vmem:[%s7550_s27 + $0x50] ss:$8 sps:$4 sm:$0xff]   ;;  %v5464_v24 = vld [vmem:[%s7550_s27 + $0x64] ss:$8 sps:$4 sm:$0xff]  }
  0xd6   :  { %1780 = vmatpush1.bf16.msra.mxu0 %v5364_v25  ;;  %1944 = vmatpush1.bf16.msra.mxu1 %v5367_v26  ;;  %v5462_v25 = vld [vmem:[%s7550_s27 + $0x60] ss:$8 sps:$4 sm:$0xff]   ;;  %v5467_v26 = vld [vmem:[%s7550_s27 + $0x74] ss:$8 sps:$4 sm:$0xff]  }
  0xd7   :  { %1781 = vmatprep.subr.bf16.mxu0 %v5372_v27  ;;  %1945 = vmatprep.subr.bf16.mxu1 %v5375_v28  ;;  %v5465_v27 = vld [vmem:[%s7550_s27 + $0x70] ss:$8 sps:$4 sm:$0xff]   ;;  %v5470_v28 = vld [vmem:[%s7550_s27 + $0x84] ss:$8 sps:$4 sm:$0xff]  }
  0xda   :  { %1782 = vmatpush1.bf16.msra.mxu0 %v5370_v29  ;;  %1946 = vmatpush1.bf16.msra.mxu1 %v5373_v30  ;;  %v5468_v29 = vld [vmem:[%s7550_s27 + $0x80] ss:$8 sps:$4 sm:$0xff]   ;;  %v5473_v30 = vld [vmem:[%s7550_s27 + $0x94] ss:$8 sps:$4 sm:$0xff]  }
  0xdb   :  { %1783 = vmatprep.subr.bf16.mxu0 %v5378_v31  ;;  %1947 = vmatprep.subr.bf16.mxu1 %v5381_v32  ;;  %v5471_v31 = vld [vmem:[%s7550_s27 + $0x90] ss:$8 sps:$4 sm:$0xff]   ;;  %v5476_v32 = vld [vmem:[%s7550_s27 + $0xa4] ss:$8 sps:$4 sm:$0xff]  }
  0xde   :  { %1784 = vmatpush1.bf16.msra.mxu0 %v5376_v33  ;;  %1948 = vmatpush1.bf16.msra.mxu1 %v5379_v34  ;;  %v5474_v33 = vld [vmem:[%s7550_s27 + $0xa0] ss:$8 sps:$4 sm:$0xff]   ;;  %v5479_v34 = vld [vmem:[%s7550_s27 + $0xb4] ss:$8 sps:$4 sm:$0xff]  }
  0xdf   :  { %1785 = vmatprep.subr.bf16.mxu0 %v5384_v35  ;;  %1949 = vmatprep.subr.bf16.mxu1 %v5387_v36  ;;  %v5477_v35 = vld [vmem:[%s7550_s27 + $0xb0] ss:$8 sps:$4 sm:$0xff]   ;;  %v5482_v36 = vld [vmem:[%s7550_s27 + $0xc4] ss:$8 sps:$4 sm:$0xff]  }
  0xe2   :  { %1786 = vmatpush1.bf16.msra.mxu0 %v5382_v37  ;;  %1950 = vmatpush1.bf16.msra.mxu1 %v5385_v38  ;;  %v5480_v37 = vld [vmem:[%s7550_s27 + $0xc0] ss:$8 sps:$4 sm:$0xff]   ;;  %v5485_v38 = vld [vmem:[%s7550_s27 + $0xd4] ss:$8 sps:$4 sm:$0xff]  }
  0xe3   :  { %1787 = vmatprep.subr.bf16.mxu0 %v5390_v39  ;;  %1951 = vmatprep.subr.bf16.mxu1 %v5393_v40  ;;  %v5483_v39 = vld [vmem:[%s7550_s27 + $0xd0] ss:$8 sps:$4 sm:$0xff]   ;;  %v5488_v40 = vld [vmem:[%s7550_s27 + $0xe4] ss:$8 sps:$4 sm:$0xff]  }
  0xe6   :  { %1788 = vmatpush1.bf16.msra.mxu0 %v5388_v41  ;;  %1952 = vmatpush1.bf16.msra.mxu1 %v5391_v42  ;;  %v5486_v41 = vld [vmem:[%s7550_s27 + $0xe0] ss:$8 sps:$4 sm:$0xff]   ;;  %v5491_v42 = vld [vmem:[%s7550_s27 + $0xf4] ss:$8 sps:$4 sm:$0xff]  }
  0xe7   :  { %1789 = vmatprep.subr.bf16.mxu0 %v5396_v43  ;;  %1953 = vmatprep.subr.bf16.mxu1 %v5399_v44  ;;  %v5489_v43 = vld [vmem:[%s7550_s27 + $0xf0] ss:$8 sps:$4 sm:$0xff]   ;;  %v5494_v44 = vld [vmem:[%s7550_s27 + $0x104] ss:$8 sps:$4 sm:$0xff]  }
  0xea   :  { %1790 = vmatpush1.bf16.msra.mxu0 %v5394_v45  ;;  %1954 = vmatpush1.bf16.msra.mxu1 %v5397_v46  ;;  %v5540_v45 = vld [vmem:[%s7526_s5 + $0x40] sm:$0xff]  }
  0xeb   :  { %1791 = vmatprep.subr.bf16.mxu0 %v5402_v47  ;;  %1955 = vmatprep.subr.bf16.mxu1 %v5405_v48  ;;  %v5541_v46 = vld [vmem:[%s7526_s5] sm:$0xff]   ;;  %v5542_v47 = vld [vmem:[%s7526_s5 + $0x48] sm:$0xff]  }
  0xec   :  { %v5543_v48 = vld [vmem:[%s7526_s5 + $0x8] sm:$0xff]  }
  0xee   :  { %1792 = vmatpush1.bf16.msra.mxu0 %v5400_v49  ;;  %1956 = vmatpush1.bf16.msra.mxu1 %v5403_v50  ;;  %v5544_v49 = vld [vmem:[%s7526_s5 + $0x50] sm:$0xff]  }
  0xef   :  { %1793 = vmatprep.subr.bf16.mxu0 %v5408_v51  ;;  %1957 = vmatprep.subr.bf16.mxu1 %v5411_v52  ;;  %v5545_v50 = vld [vmem:[%s7526_s5 + $0x10] sm:$0xff]   ;;  %v5546_v51 = vld [vmem:[%s7526_s5 + $0x58] sm:$0xff]  }
  0xf0   :  { %v5547_v52 = vld [vmem:[%s7526_s5 + $0x18] sm:$0xff]  }
  0xf2   :  { %1794 = vmatpush1.bf16.msra.mxu0 %v5406_v53  ;;  %1958 = vmatpush1.bf16.msra.mxu1 %v5409_v54  ;;  %v5548_v53 = vld [vmem:[%s7526_s5 + $0x60] sm:$0xff]  }
  0xf3   :  { %1795 = vmatprep.subr.bf16.mxu0 %v5414_v55  ;;  %1959 = vmatprep.subr.bf16.mxu1 %v5417_v56  ;;  %v5549_v54 = vld [vmem:[%s7526_s5 + $0x20] sm:$0xff]   ;;  %v5550_v55 = vld [vmem:[%s7526_s5 + $0x68] sm:$0xff]  }
  0xf4   :  { %v5551_v56 = vld [vmem:[%s7526_s5 + $0x28] sm:$0xff]  }
  0xf6   :  { %1796 = vmatpush1.bf16.msra.mxu0 %v5412_v57  ;;  %1960 = vmatpush1.bf16.msra.mxu1 %v5415_v58  ;;  %v322_v57 = vlaneseq }
  0xf7   :  { %1797 = vmatprep.subr.bf16.mxu0 %v5420_v59  ;;  %1961 = vmatprep.subr.bf16.mxu1 %v5423_v60  ;;  %v6664_v60 = vld [vmem:[%s7527_s2] sm:$0xf] }
  0xf8   :  { %v6656_v58 = vshrl.u32 %v322_v57, 7 }
  0xfa   :  { %1798 = vmatpush1.bf16.msra.mxu0 %v5418_v61  ;;  %1962 = vmatpush1.bf16.msra.mxu1 %v5421_v62  ;;  %v6659_v59 = vsub.s32 0, %v6656_v58  ;;  %v6667_v61 = vsub.s32 1, %v6656_v58  ;;  %v336_v62 = vsub.s32 3, %v6656_v58 }
  0xfb   :  { %1799 = vmatprep.subr.bf16.mxu0 %v5426_v63  ;;  %1963 = vmatprep.subr.bf16.mxu1 %v5429_v0 }
  0xfc   :  { %v325_v63 = vrot.slane %v6664_v60, %v6659_v59  ;;  %v329_v0 = vrot.slane %v6664_v60, %v6667_v61 }
  0xfe   :  { %1800 = vmatpush1.bf16.msra.mxu0 %v5424_v1  ;;  %1964 = vmatpush1.bf16.msra.mxu1 %v5427_v2  ;;  %v337_v1 = vrot.slane %v6664_v60, %v336_v62 }
  0xff   :  { %1801 = vmatprep.subr.bf16.mxu0 %v5432_v3  ;;  %1965 = vmatprep.subr.bf16.mxu1 %v5435_v4 }
 0x102   :  { %1802 = vmatpush1.bf16.msra.mxu0 %v5430_v5  ;;  %1966 = vmatpush1.bf16.msra.mxu1 %v5433_v6 }
 0x103   :  { %1803 = vmatprep.subr.bf16.mxu0 %v5438_v7  ;;  %1967 = vmatprep.subr.bf16.mxu1 %v5441_v8 }
 0x106   :  { %1804 = vmatpush1.bf16.msra.mxu0 %v5436_v9  ;;  %1968 = vmatpush1.bf16.msra.mxu1 %v5439_v10 }
 0x107   :  { %2390 = vmatprep.subr.bf16.mxu0 %v5446_v12  ;;  %4508 = vmatprep.subr.bf16.mxu1 %v5540_v45  ;;  %v5530_v45 = vld [vmem:[%s7550_s27 + $0x1c4] ss:$8 sps:$4 sm:$0xff]  }
 0x109   :  { %1806 = vmatmul.mubr.bf16.vlgmr.msra.gmra.mrb[0].mxu0 %v4144_v14  ;;  %1970 = vmatmul.mubr.bf16.vlgmr.msra.gmra.mrb[0].mxu1 %v4144_v14 }
 0x10a   :  { %2391 = vmatpush1.bf16.msra.mxu0 %v5444_v15  ;;  %4509 = vmatpush3.bf16.msra.mxu1 %v5541_v46  ;;  %v332_v46 = vsub.s32 2, %v6656_v58 }
 0x10b   :  { %2392 = vmatprep.subr.bf16.mxu0 %v5449_v16  ;;  %4510 = vmatprep.subr.bf16.mxu1 %v5542_v47  ;;  %v5528_v47 = vld [vmem:[%s7550_s27 + $0x1c0] ss:$8 sps:$4 sm:$0xff]  }
 0x10e   :  { %2393 = vmatpush1.bf16.msra.mxu0 %v5447_v17  ;;  %4511 = vmatpush3.bf16.msra.mxu1 %v5543_v48  ;;  %v5533_v48 = vld [vmem:[%s7550_s27 + $0x1d4] ss:$8 sps:$4 sm:$0xff]  }
 0x10f   :  { %2394 = vmatprep.subr.bf16.mxu0 %v5452_v13  ;;  %4512 = vmatprep.subr.bf16.mxu1 %v5544_v49  ;;  %v333_v49 = vrot.slane %v6664_v60, %v332_v46 }
 0x112   :  { %2395 = vmatpush1.bf16.msra.mxu0 %v5450_v11  ;;  %4513 = vmatpush3.bf16.msra.mxu1 %v5545_v50  ;;  %v5531_v50 = vld [vmem:[%s7550_s27 + $0x1d0] ss:$8 sps:$4 sm:$0xff]  }
 0x113   :  { %2396 = vmatprep.subr.bf16.mxu0 %v5455_v18  ;;  %4514 = vmatprep.subr.bf16.mxu1 %v5546_v51  ;;  %v5536_v51 = vld [vmem:[%s7550_s27 + $0x1e4] ss:$8 sps:$4 sm:$0xff]  }
 0x116   :  { %2397 = vmatpush1.bf16.msra.mxu0 %v5453_v19  ;;  %4515 = vmatpush3.bf16.msra.mxu1 %v5547_v52 }
 0x117   :  { %2398 = vmatprep.subr.bf16.mxu0 %v5458_v20  ;;  %4516 = vmatprep.subr.bf16.mxu1 %v5548_v53  ;;  %v5492_v20 = vld [vmem:[%s7550_s27 + $0x100] ss:$8 sps:$4 sm:$0xff]  }
 0x118   :  { %v5534_v53 = vld [vmem:[%s7550_s27 + $0x1e0] ss:$8 sps:$4 sm:$0xff]  }
 0x11a   :  { %2399 = vmatpush1.bf16.msra.mxu0 %v5456_v21  ;;  %4517 = vmatpush3.bf16.msra.mxu1 %v5549_v54  ;;  %v5539_v54 = vld [vmem:[%s7550_s27 + $0x1f4] ss:$8 sps:$4 sm:$0xff]  }
 0x11b   :  { %2400 = vmatprep.subr.bf16.mxu0 %v5461_v22  ;;  %4518 = vmatprep.subr.bf16.mxu1 %v5550_v55  ;;  %v5497_v22 = vld [vmem:[%s7550_s27 + $0x114] ss:$8 sps:$4 sm:$0xff]  }
 0x11e   :  { %2401 = vmatpush1.bf16.msra.mxu0 %v5459_v23  ;;  %4519 = vmatpush3.bf16.msra.mxu1 %v5551_v56  ;;  %v5537_v56 = vld [vmem:[%s7550_s27 + $0x1f0] ss:$8 sps:$4 sm:$0xff]  }
 0x11f   :  { %2402 = vmatprep.subr.bf16.mxu0 %v5464_v24  ;;  %v5495_v24 = vld [vmem:[%s7550_s27 + $0x110] ss:$8 sps:$4 sm:$0xff]  }
 0x122   :  { %2403 = vmatpush1.bf16.msra.mxu0 %v5462_v25  ;;  %v5500_v25 = vld [vmem:[%s7550_s27 + $0x124] ss:$8 sps:$4 sm:$0xff]  }
 0x123   :  { %2404 = vmatprep.subr.bf16.mxu0 %v5467_v26  ;;  %v5498_v26 = vld [vmem:[%s7550_s27 + $0x120] ss:$8 sps:$4 sm:$0xff]  }
 0x126   :  { %2405 = vmatpush1.bf16.msra.mxu0 %v5465_v27  ;;  %v5503_v27 = vld [vmem:[%s7550_s27 + $0x134] ss:$8 sps:$4 sm:$0xff]  }
 0x127   :  { %2406 = vmatprep.subr.bf16.mxu0 %v5470_v28  ;;  %v5501_v28 = vld [vmem:[%s7550_s27 + $0x130] ss:$8 sps:$4 sm:$0xff]  }
 0x12a   :  { %2407 = vmatpush1.bf16.msra.mxu0 %v5468_v29  ;;  %v5506_v29 = vld [vmem:[%s7550_s27 + $0x144] ss:$8 sps:$4 sm:$0xff]  }
 0x12b   :  { %2408 = vmatprep.subr.bf16.mxu0 %v5473_v30  ;;  %v5504_v30 = vld [vmem:[%s7550_s27 + $0x140] ss:$8 sps:$4 sm:$0xff]  }
 0x12e   :  { %2409 = vmatpush1.bf16.msra.mxu0 %v5471_v31  ;;  %v5509_v31 = vld [vmem:[%s7550_s27 + $0x154] ss:$8 sps:$4 sm:$0xff]  }
 0x12f   :  { %2410 = vmatprep.subr.bf16.mxu0 %v5476_v32  ;;  %v5507_v32 = vld [vmem:[%s7550_s27 + $0x150] ss:$8 sps:$4 sm:$0xff]  }
 0x132   :  { %2411 = vmatpush1.bf16.msra.mxu0 %v5474_v33  ;;  %v5512_v33 = vld [vmem:[%s7550_s27 + $0x164] ss:$8 sps:$4 sm:$0xff]  }
 0x133   :  { %2412 = vmatprep.subr.bf16.mxu0 %v5479_v34  ;;  %v5510_v34 = vld [vmem:[%s7550_s27 + $0x160] ss:$8 sps:$4 sm:$0xff]  }
 0x136   :  { %2413 = vmatpush1.bf16.msra.mxu0 %v5477_v35  ;;  %v5515_v35 = vld [vmem:[%s7550_s27 + $0x174] ss:$8 sps:$4 sm:$0xff]  }
 0x137   :  { %2414 = vmatprep.subr.bf16.mxu0 %v5482_v36  ;;  %v5513_v36 = vld [vmem:[%s7550_s27 + $0x170] ss:$8 sps:$4 sm:$0xff]  }
 0x13a   :  { %2415 = vmatpush1.bf16.msra.mxu0 %v5480_v37  ;;  %v5518_v37 = vld [vmem:[%s7550_s27 + $0x184] ss:$8 sps:$4 sm:$0xff]  }
 0x13b   :  { %2416 = vmatprep.subr.bf16.mxu0 %v5485_v38  ;;  %v5516_v38 = vld [vmem:[%s7550_s27 + $0x180] ss:$8 sps:$4 sm:$0xff]  }
 0x13e   :  { %2417 = vmatpush1.bf16.msra.mxu0 %v5483_v39  ;;  %v5521_v39 = vld [vmem:[%s7550_s27 + $0x194] ss:$8 sps:$4 sm:$0xff]  }
 0x13f   :  { %2418 = vmatprep.subr.bf16.mxu0 %v5488_v40  ;;  %v5519_v40 = vld [vmem:[%s7550_s27 + $0x190] ss:$8 sps:$4 sm:$0xff]  }
 0x142   :  { %2419 = vmatpush1.bf16.msra.mxu0 %v5486_v41  ;;  %v5524_v41 = vld [vmem:[%s7550_s27 + $0x1a4] ss:$8 sps:$4 sm:$0xff]  }
 0x143   :  { %2420 = vmatprep.subr.bf16.mxu0 %v5491_v42  ;;  %v5522_v42 = vld [vmem:[%s7550_s27 + $0x1a0] ss:$8 sps:$4 sm:$0xff]  }
 0x146   :  { %2421 = vmatpush1.bf16.msra.mxu0 %v5489_v43  ;;  %v5527_v43 = vld [vmem:[%s7550_s27 + $0x1b4] ss:$8 sps:$4 sm:$0xff]  }
 0x147   :  { %2431 = vmatprep.subr.bf16.mxu0 %v5494_v44  ;;  %v5525_v44 = vld [vmem:[%s7550_s27 + $0x1b0] ss:$8 sps:$4 sm:$0xff]  }
 0x1dc   :  { %v1807_v2 = vpop.f32.mrb[0].mxu0  ;;  %v6677_v3 = vpop.f32.mrb[0].mxu1 }
 0x1dd   :  { %v5014_v4 = vadd.f32 %v1807_v2, %v325_v63  ;;  %v1809_v5 = vpop.f32.mrb[1].mxu0  ;;  %v1973_v6 = vpop.f32.mrb[1].mxu1  ;;  %v5016_v52 = vadd.f32 %v6677_v3, %v333_v49  ;;  %v5552_v63 = vld [vmem:[%s7526_s5 + $0x70] sm:$0xff]   ;;  %v5555_v2 = vld [vmem:[%s7526_s5 + $0x38] sm:$0xff]   ;;  %v5624_v3 = vmov 0.0|0.0  }
 0x1de   :  { %v5015_v7 = vadd.f32 %v1809_v5, %v329_v0  ;;  %v5017_v8 = vadd.f32 %v1973_v6, %v337_v1  ;;  %v1811_v9 = vpop.f32.mrb[2].mxu0  ;;  %v1975_v10 = vpop.f32.mrb[2].mxu1  ;;  %v5553_v0 = vld [vmem:[%s7526_s5 + $0x30] sm:$0xff]   ;;  %4520 = vmatprep.subr.bf16.mxu1 %v5552_v63  ;;  %v5554_v1 = vld [vmem:[%s7526_s5 + $0x78] sm:$0xff]  }
 0x1df   :  { %vm1978_vm0 = vcmp.ge.f32.partialorder %v5014_v4, 0.0  ;;  %v1982_v12 = vmul.f32 0.01, %v5014_v4  ;;  %v1812_v17 = vpop.f32.mrb[3].mxu0  ;;  %v1976_v13 = vpop.f32.mrb[3].mxu1  ;;  %vm1980_vm3 = vcmp.ge.f32.partialorder %v5016_v52, 0.0  ;;  %4521 = vmatpush3.bf16.msra.mxu1 %v5553_v0 }
 0x1e0   :  { %vm1979_vm1 = vcmp.ge.f32.partialorder %v5015_v7, 0.0  ;;  %v1983_v14 = vmul.f32 0.01, %v5015_v7  ;;  %vm1981_vm2 = vcmp.ge.f32.partialorder %v5017_v8, 0.0  ;;  %v1985_v15 = vmul.f32 0.01, %v5017_v8  ;;  %4522 = vmatprep.subr.bf16.mxu1 %v5554_v1 }
 0x1e1   :  { %v1986_v16 = vsel %vm1978_vm0, %v5014_v4, %v1982_v12  ;;  %v1984_v55 = vmul.f32 0.01, %v5016_v52  ;;  %v2058_v4 = vld [vmem:[%s7528_s4] sm:$0x3]  ;;  %v2659_v13 = vld [vmem:[%s7529_s7 + $0x8] sm:$0xff] }
 0x1e2   :  { %v1987_v11 = vsel %vm1979_vm1, %v5015_v7, %v1983_v14  ;;  %v1989_v18 = vsel %vm1981_vm2, %v5017_v8, %v1985_v15  ;;  %v1990_v21 = vpack.c.bf16 %v1986_v16, %v1986_v16  ;;  %v2063_v5 = vrot.slane %v2058_v4, %v6659_v59  ;;  %v2658_v17 = vld [vmem:[%s7529_s7] sm:$0xff]  ;;  %v2762_v1 = vld [vmem:[%s7531_s9 + $0x28] sm:$0xff] }
 0x1e3   :  { %v1991_v19 = vpack.c.bf16 %v1987_v11, %v1987_v11  ;;  %v1993_v23 = vpack.c.bf16 %v1989_v18, %v1989_v18  ;;  %v1988_v57 = vsel %vm1980_vm3, %v5016_v52, %v1984_v55  ;;  %4523 = vmatpush3.bf16.msra.mxu1 %v5555_v2  ;;  %v2067_v6 = vrot.slane %v2058_v4, %v6667_v61  ;;  %v2758_v55 = vld [vmem:[%s7531_s9 + $0x8] sm:$0xff]  ;;  %v2761_v0 = vld [vmem:[%s7531_s9 + $0x20] sm:$0xff]  ;;  %v2763_v4 = vld [vmem:[%s7531_s9 + $0x30] sm:$0xff] }
 0x1e4   :  { %v1992_v60 = vpack.c.bf16 %v1988_v57, %v1988_v57  ;;  %4666 = vmatprep.subr.bf16.mxu1 %v5624_v3  ;;  %v2759_v57 = vld [vmem:[%s7531_s9 + $0x10] sm:$0xff]  ;;  %v4697_v2 = vpack.c.bf16 %v2762_v1, %v2761_v0  ;;  %v3044_v0 = vld [vmem:[%s7536_s15 + $0x98] sm:$0xff] }
 0x1e5   :  { %2422 = vmatprep.mubr.bf16.mxu0 %v1991_v19  ;;  %v3048_v1 = vld [vmem:[%s7536_s15 + $0xb8] sm:$0xff] }
 0x1e6   :  { %2423 = vmatmul.mubr.bf16.vlgmr.msra.gmra.mrb[4].mxu0 %v1990_v21 }
 0x1e7   :  { %2432 = vmatpush1.bf16.msra.mxu0 %v5492_v20  ;;  %2463 = vmatprep.mubr.bf16.mxu0 %v1993_v23  ;;  %v4667_v20 = vpack.c.bf16 %v2659_v13, %v2658_v17  ;;  %v2661_v23 = vld [vmem:[%s7529_s7 + $0x18] sm:$0xff]  ;;  %v2848_v17 = vld [vmem:[%s7533_s11 + $0x8] sm:$0xff] }
 0x1e8   :  { %2433 = vmatprep.subr.bf16.mxu0 %v5497_v22  ;;  %v2660_v22 = vld [vmem:[%s7529_s7 + $0x10] sm:$0xff] }
 0x1eb   :  { %2434 = vmatpush1.bf16.msra.mxu0 %v5495_v24  ;;  %v4670_v24 = vpack.c.bf16 %v2661_v23, %v2660_v22  ;;  %v2852_v22 = vld [vmem:[%s7533_s11 + $0x28] sm:$0xff] }
 0x1ec   :  { %2435 = vmatprep.subr.bf16.mxu0 %v5500_v25  ;;  %v2662_v25 = vld [vmem:[%s7529_s7 + $0x20] sm:$0xff] }
 0x1ef   :  { %2436 = vmatpush1.bf16.msra.mxu0 %v5498_v26  ;;  %v2663_v26 = vld [vmem:[%s7529_s7 + $0x28] sm:$0xff] }
 0x1f0   :  { %2437 = vmatprep.subr.bf16.mxu0 %v5503_v27  ;;  %v4673_v27 = vpack.c.bf16 %v2663_v26, %v2662_v25  ;;  %v2854_v25 = vld [vmem:[%s7533_s11 + $0x38] sm:$0xff] }
 0x1f3   :  { %2438 = vmatpush1.bf16.msra.mxu0 %v5501_v28  ;;  %v2664_v28 = vld [vmem:[%s7529_s7 + $0x30] sm:$0xff] }
 0x1f4   :  { %2439 = vmatprep.subr.bf16.mxu0 %v5506_v29  ;;  %v2665_v29 = vld [vmem:[%s7529_s7 + $0x38] sm:$0xff] }
 0x1f7   :  { %2440 = vmatpush1.bf16.msra.mxu0 %v5504_v30  ;;  %v4676_v30 = vpack.c.bf16 %v2665_v29, %v2664_v28  ;;  %v2936_v28 = vld [vmem:[%s7535_s13] sm:$0xff]  ;;  %v2937_v29 = vld [vmem:[%s7535_s13 + $0x8] sm:$0xff] }
 0x1f8   :  { %2441 = vmatprep.subr.bf16.mxu0 %v5509_v31  ;;  %v2666_v31 = vld [vmem:[%s7529_s7 + $0x40] sm:$0xff] }
 0x1fb   :  { %2442 = vmatpush1.bf16.msra.mxu0 %v5507_v32  ;;  %v2667_v32 = vld [vmem:[%s7529_s7 + $0x48] sm:$0xff] }
 0x1fc   :  { %2443 = vmatprep.subr.bf16.mxu0 %v5512_v33  ;;  %v4679_v33 = vpack.c.bf16 %v2667_v32, %v2666_v31 }
 0x1ff   :  { %2444 = vmatpush1.bf16.msra.mxu0 %v5510_v34  ;;  %v2668_v34 = vld [vmem:[%s7529_s7 + $0x50] sm:$0xff] }
 0x200   :  { %2445 = vmatprep.subr.bf16.mxu0 %v5515_v35  ;;  %v2669_v35 = vld [vmem:[%s7529_s7 + $0x58] sm:$0xff] }
 0x203   :  { %2446 = vmatpush1.bf16.msra.mxu0 %v5513_v36  ;;  %v4682_v36 = vpack.c.bf16 %v2669_v35, %v2668_v34  ;;  %v2938_v35 = vld [vmem:[%s7535_s13 + $0x10] sm:$0xff] }
 0x204   :  { %2447 = vmatprep.subr.bf16.mxu0 %v5518_v37  ;;  %v2670_v37 = vld [vmem:[%s7529_s7 + $0x60] sm:$0xff] }
 0x207   :  { %2448 = vmatpush1.bf16.msra.mxu0 %v5516_v38  ;;  %v2671_v38 = vld [vmem:[%s7529_s7 + $0x68] sm:$0xff] }
 0x208   :  { %2449 = vmatprep.subr.bf16.mxu0 %v5521_v39  ;;  %v4685_v39 = vpack.c.bf16 %v2671_v38, %v2670_v37  ;;  %v2940_v38 = vld [vmem:[%s7535_s13 + $0x20] sm:$0xff] }
 0x20b   :  { %2450 = vmatpush1.bf16.msra.mxu0 %v5519_v40  ;;  %v2672_v40 = vld [vmem:[%s7529_s7 + $0x70] sm:$0xff] }
 0x20c   :  { %2451 = vmatprep.subr.bf16.mxu0 %v5524_v41  ;;  %v2673_v41 = vld [vmem:[%s7529_s7 + $0x78] sm:$0xff] }
 0x20f   :  { %2452 = vmatpush1.bf16.msra.mxu0 %v5522_v42  ;;  %v4688_v42 = vpack.c.bf16 %v2673_v41, %v2672_v40  ;;  %v2942_v41 = vld [vmem:[%s7535_s13 + $0x30] sm:$0xff] }
 0x210   :  { %2453 = vmatprep.subr.bf16.mxu0 %v5527_v43  ;;  %v5626_v43 = vmov 0.0  }
 0x213   :  { %2454 = vmatpush1.bf16.msra.mxu0 %v5525_v44 }
 0x214   :  { %2455 = vmatprep.subr.bf16.mxu0 %v5530_v45  ;;  %v4466_v45 = vld [vmem:[%s7530_s6] ss:$0 sm:$0xff] }
 0x217   :  { %2456 = vmatpush1.bf16.msra.mxu0 %v5528_v47 }
 0x218   :  { %2457 = vmatprep.subr.bf16.mxu0 %v5533_v48 }
 0x21b   :  { %2458 = vmatpush1.bf16.msra.mxu0 %v5531_v50 }
 0x21c   :  { %2459 = vmatprep.subr.bf16.mxu0 %v5536_v51 }
 0x21f   :  { %2460 = vmatpush1.bf16.msra.mxu0 %v5534_v53 }
 0x220   :  { %2461 = vmatprep.subr.bf16.mxu0 %v5539_v54  ;;  %v2757_v54 = vld [vmem:[%s7531_s9] sm:$0xff] }
 0x223   :  { %2462 = vmatpush1.bf16.msra.mxu0 %v5537_v56  ;;  %v4691_v56 = vpack.c.bf16 %v2758_v55, %v2757_v54  ;;  %v3036_v54 = vld [vmem:[%s7536_s15 + $0x58] sm:$0xff] }
 0x224   :  { %v3040_v55 = vld [vmem:[%s7536_s15 + $0x78] sm:$0xff] }
 0x226   :  { %2464 = vmatmul.mubr.bf16.vlgmr.msra.gmra.mrb[4].mxu0 %v1992_v60  ;;  %v2760_v60 = vld [vmem:[%s7531_s9 + $0x18] sm:$0xff] }
 0x227   :  { %3217 = vmatprep.mubr.f32.mxu0 %v5626_v43  ;;  %v4694_v63 = vpack.c.bf16 %v2760_v60, %v2759_v57  ;;  %v3035_v57 = vld [vmem:[%s7536_s15 + $0x50] sm:$0xff] }
 0x228   :  { %v3039_v60 = vld [vmem:[%s7536_s15 + $0x70] sm:$0xff] }
 0x2f9   :  { %v2465_v7 = vpop.f32.mrb[4].mxu0 }
 0x2fa   :  { %v5018_v8 = vadd.f32 %v2465_v7, %v2063_v5  ;;  %v2467_v9 = vpop.f32.mrb[5].mxu0  ;;  %v2764_v5 = vld [vmem:[%s7531_s9 + $0x38] sm:$0xff]  ;;  %v4483_v7 = vld [vmem:[%s7532_s8] ss:$0 sm:$0xff] }
 0x2fb   :  { %v5019_v10 = vadd.f32 %v2467_v9, %v2067_v6  ;;  %v2469_v12 = vpop.f32.mrb[6].mxu0  ;;  %v4700_v6 = vpack.c.bf16 %v2764_v5, %v2763_v4  ;;  %v3043_v4 = vld [vmem:[%s7536_s15 + $0x90] sm:$0xff] }
 0x2fc   :  { %vm2472_vm4 = vcmp.ge.f32.partialorder %v5018_v8, 0.0  ;;  %v2474_v14 = vmul.f32 0.01, %v5018_v8  ;;  %v2470_v15 = vpop.f32.mrb[7].mxu0  ;;  %v3047_v5 = vld [vmem:[%s7536_s15 + $0xb0] sm:$0xff] }
 0x2fd   :  { %vm2473_vm5 = vcmp.ge.f32.partialorder %v5019_v10, 0.0  ;;  %v2475_v16 = vmul.f32 0.01, %v5019_v10 }
 0x2fe   :  { %v2476_v11 = vsel %vm2472_vm4, %v5018_v8, %v2474_v14 }
 0x2ff   :  { %v2477_v18 = vsel %vm2473_vm5, %v5019_v10, %v2475_v16  ;;  %v2478_v21 = vpack.c.bf16 %v2476_v11, %v2476_v11  ;;  %v2847_v16 = vld [vmem:[%s7533_s11] sm:$0xff]  ;;  %v2849_v11 = vld [vmem:[%s7533_s11 + $0x10] sm:$0xff] }
 0x300   :  { %v2479_v19 = vpack.c.bf16 %v2477_v18, %v2477_v18  ;;  %v4703_v13 = vpack.c.bf16 %v2848_v17, %v2847_v16  ;;  %v2850_v18 = vld [vmem:[%s7533_s11 + $0x18] sm:$0xff] }
 0x302   :  { %2647 = vmatprep.mubr.bf16.mxu1 %v2479_v19 }
 0x303   :  { %2648 = vmatmul.mubr.bf16.vlgmr.msra.gmra.mrb[4].mxu1 %v2478_v21  ;;  %v2851_v21 = vld [vmem:[%s7533_s11 + $0x20] sm:$0xff] }
 0x304   :  { %4668 = vmatpush3.bf16.msra.mxu1 %v4667_v20  ;;  %4606 = vmatprep.mubr.msk.f32.mxu1 %vm5625_vm6, %v5626_v43  ;;  %v4706_v20 = vpack.c.bf16 %v2850_v18, %v2849_v11  ;;  %v4709_v23 = vpack.c.bf16 %v2852_v22, %v2851_v21  ;;  %v3033_v18 = vld [vmem:[%s7536_s15 + $0x40] sm:$0xff]  ;;  %v3046_v21 = vld [vmem:[%s7536_s15 + $0xa8] sm:$0xff] }
 0x305   :  { %4669 = vmatprep.subr.bf16.mxu1 %v5624_v3 }
 0x308   :  { %4671 = vmatpush3.bf16.msra.mxu1 %v4670_v24  ;;  %v2853_v24 = vld [vmem:[%s7533_s11 + $0x30] sm:$0xff] }
 0x309   :  { %4672 = vmatprep.subr.bf16.mxu1 %v5624_v3  ;;  %v4712_v26 = vpack.c.bf16 %v2854_v25, %v2853_v24  ;;  %v3041_v24 = vld [vmem:[%s7536_s15 + $0x80] sm:$0xff] }
 0x30a   :  { %v3045_v25 = vld [vmem:[%s7536_s15 + $0xa0] sm:$0xff] }
 0x30c   :  { %4674 = vmatpush3.bf16.msra.mxu1 %v4673_v27  ;;  %v4485_v27 = vld [vmem:[%s7534_s10] ss:$0 sm:$0xff] }
 0x30d   :  { %4675 = vmatprep.subr.bf16.mxu1 %v5624_v3 }
 0x310   :  { %4677 = vmatpush3.bf16.msra.mxu1 %v4676_v30 }
 0x311   :  { %4678 = vmatprep.subr.bf16.mxu1 %v5624_v3 }
 0x314   :  { %4680 = vmatpush3.bf16.msra.mxu1 %v4679_v33  ;;  %v4715_v33 = vpack.c.bf16 %v2937_v29, %v2936_v28  ;;  %v3054_v28 = vld [vmem:[%s7536_s15 + $0xe8] sm:$0xff]  ;;  %v3052_v29 = vld [vmem:[%s7536_s15 + $0xd8] sm:$0xff] }
 0x315   :  { %4681 = vmatprep.subr.bf16.mxu1 %v5624_v3 }
 0x318   :  { %4683 = vmatpush3.bf16.msra.mxu1 %v4682_v36  ;;  %v2939_v36 = vld [vmem:[%s7535_s13 + $0x18] sm:$0xff] }
 0x319   :  { %4684 = vmatprep.subr.bf16.mxu1 %v5624_v3  ;;  %v4718_v37 = vpack.c.bf16 %v2939_v36, %v2938_v35  ;;  %v3051_v36 = vld [vmem:[%s7536_s15 + $0xd0] sm:$0xff] }
 0x31c   :  { %4686 = vmatpush3.bf16.msra.mxu1 %v4685_v39  ;;  %v2941_v39 = vld [vmem:[%s7535_s13 + $0x28] sm:$0xff] }
 0x31d   :  { %4687 = vmatprep.subr.bf16.mxu1 %v5624_v3  ;;  %v4721_v40 = vpack.c.bf16 %v2941_v39, %v2940_v38  ;;  %v3276_v39 = vld [vmem:[%s7538_s17 + $0x8] sm:$0xff] }
 0x320   :  { %4689 = vmatpush3.bf16.msra.mxu1 %v4688_v42  ;;  %v2943_v42 = vld [vmem:[%s7535_s13 + $0x38] sm:$0xff] }
 0x321   :  { %4690 = vmatprep.subr.bf16.mxu1 %v5624_v3 }
 0x3d6   :  { %v4524_v44 = vpop.f32.mrb[4].mxu1 }
 0x3d7   :  { %v4525_v47 = vpop.f32.mrb[5].mxu1 }
 0x3d8   :  { %v4526_v48 = vadd.f32 %v4525_v47, %v4524_v44  ;;  %v4527_v49 = vpop.f32.mrb[6].mxu1  ;;  %v4724_v44 = vpack.c.bf16 %v2943_v42, %v2942_v41  ;;  %v3030_v47 = vld [vmem:[%s7536_s15 + $0x28] sm:$0xff]  ;;  %v3278_v41 = vld [vmem:[%s7538_s17 + $0x18] sm:$0xff] }
 0x3d9   :  { %v4528_v50 = vpop.f32.mrb[7].mxu1  ;;  %v3032_v49 = vld [vmem:[%s7536_s15 + $0x38] sm:$0xff] }
 0x3da   :  { %v2650_v51 = vadd.f32 %v4526_v48, %v4466_v45  ;;  %v3026_v45 = vld [vmem:[%s7536_s15 + $0x8] sm:$0xff] }
 0x3db   :  { %v4726_v48 = vpack.c.bf16 %v3030_v47, %v3026_v45  ;;  %v4489_v47 = vld [vmem:[%s7539_s14] ss:$0 sm:$0xff] }
 0x3dc   :  { %v2656_v52 = vmul.f32 0.01, %v2650_v51  ;;  %vm2655_vm7 = vcmp.ge.f32.partialorder %v2650_v51, 0.0 }
 0x3de   :  { %v2657_v53 = vsel %vm2655_vm7, %v2650_v51, %v2656_v52  ;;  %v3027_v51 = vld [vmem:[%s7536_s15 + $0x10] sm:$0xff] }
 0x3df   :  { %4607 = vmatmul.mubr.f32.vlgmr.msra.gmra.mrb[8].mxu1 %v2657_v53  ;;  %v3031_v52 = vld [vmem:[%s7536_s15 + $0x30] sm:$0xff] }
 0x3e0   :  { %4625 = vmatprep.mubr.msk.f32.mxu1 %vm5625_vm6, %v5626_v43  ;;  %4692 = vmatpush3.bf16.msra.mxu1 %v4691_v56  ;;  %v4744_v53 = vpack.c.bf16 %v3031_v52, %v3027_v51  ;;  %v4746_v56 = vpack.c.bf16 %v3040_v55, %v3036_v54  ;;  %v3284_v51 = vld [vmem:[%s7538_s17 + $0x48] sm:$0xff]  ;;  %v3286_v54 = vld [vmem:[%s7538_s17 + $0x58] sm:$0xff] }
 0x3e1   :  { %4693 = vmatprep.subr.bf16.mxu1 %v5624_v3  ;;  %v3290_v55 = vld [vmem:[%s7538_s17 + $0x78] sm:$0xff] }
 0x3e4   :  { %4695 = vmatpush3.bf16.msra.mxu1 %v4694_v63  ;;  %v4748_v63 = vpack.c.bf16 %v3039_v60, %v3035_v57 }
 0x3e5   :  { %4696 = vmatprep.subr.bf16.mxu1 %v5624_v3 }
 0x3e8   :  { %4698 = vmatpush3.bf16.msra.mxu1 %v4697_v2  ;;  %v4750_v2 = vpack.c.bf16 %v3048_v1, %v3044_v0  ;;  %v3283_v0 = vld [vmem:[%s7538_s17 + $0x40] sm:$0xff] }
 0x3e9   :  { %4699 = vmatprep.subr.bf16.mxu1 %v5624_v3  ;;  %v3287_v1 = vld [vmem:[%s7538_s17 + $0x60] sm:$0xff] }
 0x3ec   :  { %4701 = vmatpush3.bf16.msra.mxu1 %v4700_v6  ;;  %v4752_v6 = vpack.c.bf16 %v3047_v5, %v3043_v4  ;;  %v7112_v5 = vpack.c.bf16 %v3290_v55, %v3286_v54  ;;  %v3319_v54 = vld [vmem:[%s7538_s17 + $0x160] sm:$0xff] }
 0x3ed   :  { %4702 = vmatprep.subr.bf16.mxu1 %v5624_v3 }
 0x4b2   :  { %v2747_v8 = vpop.f32.mrb[8].mxu1 }
 0x4b3   :  { %v2748_v9 = vadd.f32 %v4483_v7, %v2747_v8  ;;  %v4608_v10 = vpop.f32.mrb[9].mxu1  ;;  %v4487_v7 = vld [vmem:[%s7537_s12] ss:$0 sm:$0xff] }
 0x4b4   :  { %v3025_v8 = vld [vmem:[%s7536_s15] sm:$0xff] }
 0x4b5   :  { %v4484_v12 = vmul.f32 -1.442695, %v2748_v9  ;;  %v3029_v9 = vld [vmem:[%s7536_s15 + $0x20] sm:$0xff] }
 0x4b6   :  { %v4728_v17 = vpack.c.bf16 %v3029_v9, %v3025_v8  ;;  %v3292_v8 = vld [vmem:[%s7538_s17 + $0x88] sm:$0xff] }
 0x4b7   :  { %5556 = vpow2.f32 %v4484_v12  ;;  %v3034_v12 = vld [vmem:[%s7536_s15 + $0x48] sm:$0xff] }
 0x4b8   :  { %v3296_v9 = vld [vmem:[%s7538_s17 + $0xa8] sm:$0xff] }
 0x4c1   :  { %v5557_v14 = vpop.eup %5556 }
 0x4c2   :  { %v2754_v15 = vadd.f32 1.0, %v5557_v14  ;;  %v3038_v14 = vld [vmem:[%s7536_s15 + $0x68] sm:$0xff] }
 0x4c3   :  { %v4730_v11 = vpack.c.bf16 %v3038_v14, %v3034_v12  ;;  %v3298_v12 = vld [vmem:[%s7538_s17 + $0xb8] sm:$0xff]  ;;  %v7136_v14 = vpack.c.bf16 %v3287_v1, %v3283_v0  ;;  %v3321_v0 = vld [vmem:[%s7538_s17 + $0x170] sm:$0xff]  ;;  %v3324_v1 = vld [vmem:[%s7538_s17 + $0x188] sm:$0xff] }
 0x4c4   :  { %5558 = vrcp.f32 %v2754_v15 }
 0x4ce   :  { %v5559_v19 = vpop.eup %5558 }
 0x4cf   :  { %4626 = vmatmul.mubr.msk.f32.vlgmr.msra.gmra.mrb[10].mxu1 %vm2772_vm8, %v5559_v19  ;;  %v3037_v19 = vld [vmem:[%s7536_s15 + $0x60] sm:$0xff] }
 0x4d0   :  { %4704 = vmatpush3.bf16.msra.mxu1 %v4703_v13  ;;  %4644 = vmatprep.mubr.msk.f32.mxu1 %vm5625_vm6, %v5626_v43  ;;  %v4732_v22 = vpack.c.bf16 %v3037_v19, %v3033_v18  ;;  %v3293_v18 = vld [vmem:[%s7538_s17 + $0x90] sm:$0xff] }
 0x4d1   :  { %4705 = vmatprep.subr.bf16.mxu1 %v5624_v3  ;;  %v3297_v19 = vld [vmem:[%s7538_s17 + $0xb0] sm:$0xff] }
 0x4d4   :  { %4707 = vmatpush3.bf16.msra.mxu1 %v4706_v20  ;;  %v3042_v20 = vld [vmem:[%s7536_s15 + $0x88] sm:$0xff] }
 0x4d5   :  { %4708 = vmatprep.subr.bf16.mxu1 %v5624_v3 }
 0x4d8   :  { %4710 = vmatpush3.bf16.msra.mxu1 %v4709_v23  ;;  %v4734_v23 = vpack.c.bf16 %v3046_v21, %v3042_v20  ;;  %v3300_v20 = vld [vmem:[%s7538_s17 + $0xc8] sm:$0xff] }
 0x4d9   :  { %4711 = vmatprep.subr.bf16.mxu1 %v5624_v3  ;;  %v3304_v21 = vld [vmem:[%s7538_s17 + $0xe8] sm:$0xff] }
 0x4dc   :  { %4713 = vmatpush3.bf16.msra.mxu1 %v4712_v26  ;;  %v4736_v26 = vpack.c.bf16 %v3045_v25, %v3041_v24  ;;  %v7176_v25 = vpack.c.bf16 %v3297_v19, %v3293_v18  ;;  %v3325_v18 = vld [vmem:[%s7538_s17 + $0x190] sm:$0xff] }
 0x4dd   :  { %4714 = vmatprep.subr.bf16.mxu1 %v5624_v3  ;;  %v3329_v19 = vld [vmem:[%s7538_s17 + $0x1b0] sm:$0xff] }
 0x5a2   :  { %v2842_v30 = vpop.f32.mrb[10].mxu1 }
 0x5a3   :  { %v2843_v31 = vadd.f32 %v4485_v27, %v2842_v30  ;;  %v4627_v32 = vpop.f32.mrb[11].mxu1  ;;  %v3050_v27 = vld [vmem:[%s7536_s15 + $0xc8] sm:$0xff] }
 0x5a4   :  { %v4738_v30 = vpack.c.bf16 %v3054_v28, %v3050_v27  ;;  %v3049_v32 = vld [vmem:[%s7536_s15 + $0xc0] sm:$0xff]  ;;  %v7186_v28 = vpack.c.bf16 %v3304_v21, %v3300_v20  ;;  %v3332_v20 = vld [vmem:[%s7538_s17 + $0x1c8] sm:$0xff] }
 0x5a5   :  { %v2846_v34 = vmax.f32 %v2843_v31, 0.0  ;;  %v3056_v31 = vld [vmem:[%s7536_s15 + $0xf8] sm:$0xff]  ;;  %v3303_v27 = vld [vmem:[%s7538_s17 + $0xe0] sm:$0xff]  ;;  %v3336_v21 = vld [vmem:[%s7538_s17 + $0x1e8] sm:$0xff] }
 0x5a7   :  { %4645 = vmatmul.mubr.msk.f32.vlgmr.msra.gmra.mrb[12].mxu1 %vm2772_vm8, %v2846_v34  ;;  %v4754_v34 = vpack.c.bf16 %v3056_v31, %v3052_v29  ;;  %v3305_v31 = vld [vmem:[%s7538_s17 + $0xf0] sm:$0xff] }
 0x5a8   :  { %4716 = vmatpush3.bf16.msra.mxu1 %v4715_v33  ;;  %4663 = vmatprep.mubr.msk.f32.mxu1 %vm5625_vm6, %v5626_v43  ;;  %v3053_v33 = vld [vmem:[%s7536_s15 + $0xe0] sm:$0xff] }
 0x5a9   :  { %4717 = vmatprep.subr.bf16.mxu1 %v5624_v3  ;;  %v4740_v35 = vpack.c.bf16 %v3053_v33, %v3049_v32  ;;  %v3308_v32 = vld [vmem:[%s7538_s17 + $0x108] sm:$0xff] }
 0x5aa   :  { %v3312_v33 = vld [vmem:[%s7538_s17 + $0x128] sm:$0xff] }
 0x5ac   :  { %4719 = vmatpush3.bf16.msra.mxu1 %v4718_v37  ;;  %v3055_v37 = vld [vmem:[%s7536_s15 + $0xf0] sm:$0xff] }
 0x5ad   :  { %4720 = vmatprep.subr.bf16.mxu1 %v5624_v3  ;;  %v4756_v38 = vpack.c.bf16 %v3055_v37, %v3051_v36 }
 0x5b0   :  { %4722 = vmatpush3.bf16.msra.mxu1 %v4721_v40  ;;  %v3280_v40 = vld [vmem:[%s7538_s17 + $0x28] sm:$0xff] }
 0x5b1   :  { %4723 = vmatprep.subr.bf16.mxu1 %v5624_v3  ;;  %v3028_v3 = vld [vmem:[%s7536_s15 + $0x18] sm:$0xff]  ;;  %v7064_v42 = vpack.c.bf16 %v3280_v40, %v3276_v39  ;;  %v3311_v39 = vld [vmem:[%s7538_s17 + $0x120] sm:$0xff]  ;;  %v7222_v40 = vpack.c.bf16 %v3312_v33, %v3308_v32 }
 0x5b2   :  { %v4742_v50 = vpack.c.bf16 %v3032_v49, %v3028_v3  ;;  %v3275_v3 = vld [vmem:[%s7538_s17] sm:$0xff]  ;;  %v3277_v49 = vld [vmem:[%s7538_s17 + $0x10] sm:$0xff] }
 0x5b3   :  { %v3335_v33 = vld [vmem:[%s7538_s17 + $0x1e0] sm:$0xff] }
 0x5b4   :  { %4725 = vmatpush3.bf16.msra.mxu1 %v4724_v44  ;;  %4743 = vmatprep.subr.bf16.mxu0 %v4742_v50  ;;  %v3282_v44 = vld [vmem:[%s7538_s17 + $0x38] sm:$0xff]  ;;  %v3281_v50 = vld [vmem:[%s7538_s17 + $0x30] sm:$0xff] }
 0x5b5   :  { %4727 = vmatprep.subr.bf16.mxu1 %v4726_v48  ;;  %4745 = vmatpush1.bf16.msra.mxu0 %v4744_v53  ;;  %v7069_v45 = vpack.c.bf16 %v3282_v44, %v3278_v41  ;;  %v3279_v48 = vld [vmem:[%s7538_s17 + $0x20] sm:$0xff]  ;;  %v3288_v53 = vld [vmem:[%s7538_s17 + $0x68] sm:$0xff]  ;;  %v3309_v44 = vld [vmem:[%s7538_s17 + $0x110] sm:$0xff] }
 0x5b6   :  { %4747 = vmatprep.subr.bf16.mxu0 %v4746_v56  ;;  %v7100_v60 = vpack.c.bf16 %v3279_v48, %v3275_v3  ;;  %v7110_v4 = vpack.c.bf16 %v3288_v53, %v3284_v51  ;;  %v3316_v3 = vld [vmem:[%s7538_s17 + $0x148] sm:$0xff]  ;;  %v3315_v53 = vld [vmem:[%s7538_s17 + $0x140] sm:$0xff] }
 0x5b7   :  { %v3320_v48 = vld [vmem:[%s7538_s17 + $0x168] sm:$0xff] }
 0x5b8   :  { %v7258_v55 = vpack.c.bf16 %v3320_v48, %v3316_v3  ;;  %v3057_v3 = vld [vmem:[%s7540_s16] sm:$0xf] }
 0x5b9   :  { %4749 = vmatpush1.bf16.msra.mxu0 %v4748_v63  ;;  %v7102_v63 = vpack.c.bf16 %v3281_v50, %v3277_v49  ;;  %v3318_v49 = vld [vmem:[%s7538_s17 + $0x158] sm:$0xff]  ;;  %v3062_v48 = vrot.slane %v3057_v3, %v6659_v59 }
 0x5ba   :  { %4751 = vmatprep.subr.bf16.mxu0 %v4750_v2  ;;  %v3322_v50 = vld [vmem:[%s7538_s17 + $0x178] sm:$0xff] }
 0x5bd   :  { %4753 = vmatpush1.bf16.msra.mxu0 %v4752_v6  ;;  %v3285_v6 = vld [vmem:[%s7538_s17 + $0x50] sm:$0xff] }
 0x5be   :  { %4755 = vmatprep.subr.bf16.mxu0 %v4754_v34  ;;  %v3310_v34 = vld [vmem:[%s7538_s17 + $0x118] sm:$0xff] }
 0x5c1   :  { %4757 = vmatpush1.bf16.msra.mxu0 %v4756_v38  ;;  %v3307_v38 = vld [vmem:[%s7538_s17 + $0x100] sm:$0xff] }
 0x5c2   :  { %4791 = vmatprep.subr.bf16.mxu0 %v7069_v45  ;;  %v7246_v51 = vpack.c.bf16 %v3311_v39, %v3307_v38 }
 0x67a   :  { %v2931_v10 = vpop.f32.mrb[12].mxu1 }
 0x67b   :  { %v2932_v15 = vadd.f32 %v4487_v7, %v2931_v10  ;;  %v4646_v16 = vpop.f32.mrb[13].mxu1  ;;  %v3289_v7 = vld [vmem:[%s7538_s17 + $0x70] sm:$0xff]  ;;  %v3294_v10 = vld [vmem:[%s7538_s17 + $0x98] sm:$0xff] }
 0x67c   :  { %v3291_v16 = vld [vmem:[%s7538_s17 + $0x80] sm:$0xff] }
 0x67d   :  { %v2935_v13 = vmax.f32 %v2932_v15, 0.0  ;;  %v7138_v15 = vpack.c.bf16 %v3289_v7, %v3285_v6  ;;  %v3326_v6 = vld [vmem:[%s7538_s17 + $0x198] sm:$0xff] }
 0x67e   :  { %v3330_v7 = vld [vmem:[%s7538_s17 + $0x1b8] sm:$0xff] }
 0x67f   :  { %4664 = vmatmul.mubr.msk.f32.vlgmr.msra.gmra.mrb[14].mxu1 %vm2772_vm8, %v2935_v13  ;;  %v7148_v13 = vpack.c.bf16 %v3296_v9, %v3292_v8  ;;  %v7282_v8 = vpack.c.bf16 %v3319_v54, %v3315_v53  ;;  %v3066_v53 = vrot.slane %v3057_v3, %v6667_v61  ;;  %v3074_v54 = vrot.slane %v3057_v3, %v336_v62 }
 0x680   :  { %4729 = vmatpush1.bf16.msra.mxu1 %v4728_v17  ;;  %3146 = vmatprep.mubr.f32.mxu1 %v5626_v43  ;;  %v3295_v17 = vld [vmem:[%s7538_s17 + $0xa0] sm:$0xff] }
 0x681   :  { %4731 = vmatprep.subr.bf16.mxu1 %v4730_v11  ;;  %v7150_v11 = vpack.c.bf16 %v3298_v12, %v3294_v10  ;;  %v7174_v24 = vpack.c.bf16 %v3295_v17, %v3291_v16  ;;  %v3323_v10 = vld [vmem:[%s7538_s17 + $0x180] sm:$0xff]  ;;  %v7296_v17 = vpack.c.bf16 %v3330_v7, %v3326_v6 }
 0x682   :  { %v3327_v12 = vld [vmem:[%s7538_s17 + $0x1a0] sm:$0xff] }
 0x684   :  { %4733 = vmatpush1.bf16.msra.mxu1 %v4732_v22  ;;  %v3302_v22 = vld [vmem:[%s7538_s17 + $0xd8] sm:$0xff] }
 0x685   :  { %4735 = vmatprep.subr.bf16.mxu1 %v4734_v23  ;;  %v3306_v23 = vld [vmem:[%s7538_s17 + $0xf8] sm:$0xff] }
 0x686   :  { %v7188_v29 = vpack.c.bf16 %v3306_v23, %v3302_v22  ;;  %v3334_v22 = vld [vmem:[%s7538_s17 + $0x1d8] sm:$0xff] }
 0x687   :  { %v3338_v23 = vld [vmem:[%s7538_s17 + $0x1f8] sm:$0xff] }
 0x688   :  { %4737 = vmatpush1.bf16.msra.mxu1 %v4736_v26  ;;  %v3299_v26 = vld [vmem:[%s7538_s17 + $0xc0] sm:$0xff]  ;;  %v7329_v32 = vpack.c.bf16 %v3338_v23, %v3334_v22 }
 0x689   :  { %4739 = vmatprep.subr.bf16.mxu1 %v4738_v30  ;;  %v3301_v30 = vld [vmem:[%s7538_s17 + $0xd0] sm:$0xff]  ;;  %v7210_v36 = vpack.c.bf16 %v3303_v27, %v3299_v26  ;;  %v7318_v26 = vpack.c.bf16 %v3327_v12, %v3323_v10  ;;  %v7320_v27 = vpack.c.bf16 %v3329_v19, %v3325_v18 }
 0x68a   :  { %v7212_v37 = vpack.c.bf16 %v3305_v31, %v3301_v30  ;;  %v3331_v30 = vld [vmem:[%s7538_s17 + $0x1c0] sm:$0xff]  ;;  %v7327_v31 = vpack.c.bf16 %v3336_v21, %v3332_v20 }
 0x68b   :  { %v7342_v38 = vpack.c.bf16 %v3335_v33, %v3331_v30 }
 0x68c   :  { %4741 = vmatpush1.bf16.msra.mxu1 %v4740_v35  ;;  %v3314_v35 = vld [vmem:[%s7538_s17 + $0x138] sm:$0xff] }
 0x68d   :  { %4759 = vmatprep.subr.bf16.mxu1 %v7064_v42  ;;  %v7224_v41 = vpack.c.bf16 %v3314_v35, %v3310_v34  ;;  %v3333_v34 = vld [vmem:[%s7538_s17 + $0x1d0] sm:$0xff] }
 0x68e   :  { %v3337_v35 = vld [vmem:[%s7538_s17 + $0x1f0] sm:$0xff] }
 0x68f   :  { %v7344_v39 = vpack.c.bf16 %v3337_v35, %v3333_v34 }
 0x752   :  { %v3020_v52 = vpop.f32.mrb[14].mxu1 }
 0x753   :  { %v3021_v56 = vadd.f32 %v4489_v47, %v3020_v52  ;;  %v4665_v57 = vpop.f32.mrb[15].mxu1  ;;  %v3313_v47 = vld [vmem:[%s7538_s17 + $0x130] sm:$0xff] }
 0x754   :  { %v7248_v52 = vpack.c.bf16 %v3313_v47, %v3309_v44  ;;  %v3317_v57 = vld [vmem:[%s7538_s17 + $0x150] sm:$0xff]  ;;  %v5627_v44 = vmov 1983009808  }
 0x755   :  { %v3024_v2 = vmax.f32 %v3021_v56, 0.0  ;;  %v7260_v56 = vpack.c.bf16 %v3322_v50, %v3318_v49  ;;  %v7284_v9 = vpack.c.bf16 %v3321_v0, %v3317_v57  ;;  %v3231_v47 = vunpack.c.l.s4 %v5627_v44 }
 0x756   :  { %v3070_v49 = vrot.slane %v3057_v3, %v332_v46 }
 0x757   :  { %4491 = vmatmul.mubr.msk.f32.vlgmr.msra.gmra.mrb[16].mxu1 %vm2772_vm8, %v3024_v2  ;;  %4492 = vmatmul.mubr.msk.f32.vlgmr.msra.gmra.mrb[8].mxu0 %vm2772_vm8, %v3024_v2  ;;  %v3328_v2 = vld [vmem:[%s7538_s17 + $0x1a8] sm:$0xff]  ;;  %v3232_v50 = vunpack.c.0.s8 %v3231_v47 }
 0x758   :  { %4761 = vmatpush1.bf16.msra.mxu1 %v7100_v60  ;;  %4793 = vmatpush1.bf16.msra.mxu0 %v7102_v63  ;;  %v7294_v16 = vpack.c.bf16 %v3328_v2, %v3324_v1 }
 0x759   :  { %4763 = vmatprep.subr.bf16.mxu1 %v7110_v4  ;;  %4795 = vmatprep.subr.bf16.mxu0 %v7112_v5  ;;  %v7398_v10 = vsub.s32 %v3232_v50, %v6656_v58 }
 0x75a   :  { %3404 = vmatprep.mubr.f32.mxu1 %v5626_v43  ;;  %3475 = vmatprep.mubr.f32.mxu0 %v5626_v43 }
 0x75c   :  { %4765 = vmatpush1.bf16.msra.mxu1 %v7136_v14  ;;  %4797 = vmatpush1.bf16.msra.mxu0 %v7138_v15 }
 0x75d   :  { %4767 = vmatprep.subr.bf16.mxu1 %v7148_v13  ;;  %4799 = vmatprep.subr.bf16.mxu0 %v7150_v11 }
 0x760   :  { %4769 = vmatpush1.bf16.msra.mxu1 %v7174_v24  ;;  %4801 = vmatpush1.bf16.msra.mxu0 %v7176_v25 }
 0x761   :  { %4771 = vmatprep.subr.bf16.mxu1 %v7186_v28  ;;  %4803 = vmatprep.subr.bf16.mxu0 %v7188_v29 }
 0x764   :  { %4773 = vmatpush1.bf16.msra.mxu1 %v7210_v36  ;;  %4805 = vmatpush1.bf16.msra.mxu0 %v7212_v37 }
 0x765   :  { %4775 = vmatprep.subr.bf16.mxu1 %v7222_v40  ;;  %4807 = vmatprep.subr.bf16.mxu0 %v7224_v41 }
 0x768   :  { %4777 = vmatpush1.bf16.msra.mxu1 %v7246_v51  ;;  %4809 = vmatpush1.bf16.msra.mxu0 %v7248_v52 }
 0x769   :  { %4779 = vmatprep.subr.bf16.mxu1 %v7258_v55  ;;  %4811 = vmatprep.subr.bf16.mxu0 %v7260_v56 }
 0x76c   :  { %4781 = vmatpush1.bf16.msra.mxu1 %v7282_v8  ;;  %4813 = vmatpush1.bf16.msra.mxu0 %v7284_v9 }
 0x76d   :  { %4783 = vmatprep.subr.bf16.mxu1 %v7294_v16  ;;  %4815 = vmatprep.subr.bf16.mxu0 %v7296_v17 }
 0x770   :  { %4785 = vmatpush1.bf16.msra.mxu1 %v7318_v26  ;;  %4817 = vmatpush1.bf16.msra.mxu0 %v7320_v27 }
 0x771   :  { %4787 = vmatprep.subr.bf16.mxu1 %v7327_v31  ;;  %4819 = vmatprep.subr.bf16.mxu0 %v7329_v32 }
 0x774   :  { %4789 = vmatpush1.bf16.msra.mxu1 %v7342_v38  ;;  %4821 = vmatpush1.bf16.msra.mxu0 %v7344_v39 }
 0x775   :  { %4823 = vmatprep.subr.bf16.mxu1 %v7064_v42  ;;  %4855 = vmatprep.subr.bf16.mxu0 %v7069_v45 }
 0x777   :  { %3405 = vmatmul.mubr.f32.vlgmr.msra.gmra.mrb[18].mxu1 %v5626_v43  ;;  %3476 = vmatmul.mubr.f32.vlgmr.msra.gmra.mrb[10].mxu0 %v5626_v43 }
 0x778   :  { %4825 = vmatpush1.bf16.msra.mxu1 %v7100_v60  ;;  %4857 = vmatpush1.bf16.msra.mxu0 %v7102_v63 }
 0x779   :  { %4827 = vmatprep.subr.bf16.mxu1 %v7110_v4  ;;  %4859 = vmatprep.subr.bf16.mxu0 %v7112_v5 }
 0x77a   :  { %3602 = vmatprep.mubr.f32.mxu1 %v5626_v43  ;;  %3673 = vmatprep.mubr.f32.mxu0 %v5626_v43 }
 0x77c   :  { %4829 = vmatpush1.bf16.msra.mxu1 %v7136_v14  ;;  %4861 = vmatpush1.bf16.msra.mxu0 %v7138_v15 }
 0x77d   :  { %4831 = vmatprep.subr.bf16.mxu1 %v7148_v13  ;;  %4863 = vmatprep.subr.bf16.mxu0 %v7150_v11 }
 0x780   :  { %4833 = vmatpush1.bf16.msra.mxu1 %v7174_v24  ;;  %4865 = vmatpush1.bf16.msra.mxu0 %v7176_v25 }
 0x781   :  { %4835 = vmatprep.subr.bf16.mxu1 %v7186_v28  ;;  %4867 = vmatprep.subr.bf16.mxu0 %v7188_v29 }
 0x784   :  { %4837 = vmatpush1.bf16.msra.mxu1 %v7210_v36  ;;  %4869 = vmatpush1.bf16.msra.mxu0 %v7212_v37 }
 0x785   :  { %4839 = vmatprep.subr.bf16.mxu1 %v7222_v40  ;;  %4871 = vmatprep.subr.bf16.mxu0 %v7224_v41 }
 0x788   :  { %4841 = vmatpush1.bf16.msra.mxu1 %v7246_v51  ;;  %4873 = vmatpush1.bf16.msra.mxu0 %v7248_v52 }
 0x789   :  { %4843 = vmatprep.subr.bf16.mxu1 %v7258_v55  ;;  %4875 = vmatprep.subr.bf16.mxu0 %v7260_v56 }
 0x78c   :  { %4845 = vmatpush1.bf16.msra.mxu1 %v7282_v8  ;;  %4877 = vmatpush1.bf16.msra.mxu0 %v7284_v9 }
 0x78d   :  { %4847 = vmatprep.subr.bf16.mxu1 %v7294_v16  ;;  %4879 = vmatprep.subr.bf16.mxu0 %v7296_v17 }
 0x790   :  { %4849 = vmatpush1.bf16.msra.mxu1 %v7318_v26  ;;  %4881 = vmatpush1.bf16.msra.mxu0 %v7320_v27 }
 0x791   :  { %4851 = vmatprep.subr.bf16.mxu1 %v7327_v31  ;;  %4883 = vmatprep.subr.bf16.mxu0 %v7329_v32 }
 0x794   :  { %4853 = vmatpush1.bf16.msra.mxu1 %v7342_v38  ;;  %4885 = vmatpush1.bf16.msra.mxu0 %v7344_v39 }
 0x795   :  { %4887 = vmatprep.subr.bf16.mxu1 %v7064_v42  ;;  %4919 = vmatprep.subr.bf16.mxu0 %v7069_v45 }
 0x82a   :  { %v3148_v57 = vpop.f32.mrb[16].mxu1  ;;  %v3219_v0 = vpop.f32.mrb[8].mxu0 }
 0x82b   :  { %v3149_v1 = vadd.f32 %v3148_v57, %v3062_v48  ;;  %v3220_v2 = vadd.f32 %v3219_v0, %v3070_v49  ;;  %v3150_v6 = vpop.f32.mrb[17].mxu1  ;;  %v3221_v7 = vpop.f32.mrb[9].mxu0 }
 0x82c   :  { %v3151_v12 = vadd.f32 %v3150_v6, %v3066_v53  ;;  %v3222_v59 = vadd.f32 %v3221_v7, %v3074_v54 }
 0x82e   :  { %v3228_v18 = vcombine.low %v3149_v1, %v3151_v12  ;;  %v3251_v19 = vcombine.high %v3149_v1, %v3151_v12  ;;  %v3229_v46 = vcombine.low %v3220_v2, %v3222_v59  ;;  %v3252_v20 = vcombine.high %v3220_v2, %v3222_v59 }
 0x830   :  { %v7401_v61 = vrot.slane %v3228_v18, %v7398_v10  ;;  %v7404_v62 = vrot.slane %v3251_v19, %v7398_v10  ;;  %v7407_v21 = vrot.slane %v3229_v46, %v7398_v10  ;;  %v7410_v22 = vrot.slane %v3252_v20, %v7398_v10 }
 0x832   :  { %v3244_v58 = vcombine.low %v7401_v61, %v7407_v21  ;;  %v3247_v23 = vcombine.high %v7401_v61, %v7407_v21  ;;  %v3267_v30 = vcombine.low %v7404_v62, %v7410_v22  ;;  %v3271_v33 = vcombine.high %v7404_v62, %v7410_v22 }
 0x84a   :  { %v3406_v34 = vpop.f32.mrb[18].mxu1  ;;  %v3477_v35 = vpop.f32.mrb[10].mxu0 }
 0x84b   :  { %v3408_v44 = vpop.f32.mrb[19].mxu1  ;;  %v3479_v47 = vpop.f32.mrb[11].mxu0 }
 0x84c   :  { %v3486_v3 = vcombine.low %v3406_v34, %v3408_v44  ;;  %v3487_v48 = vcombine.low %v3477_v35, %v3479_v47 }
 0x84e   :  { %v3494_v49 = vrot.slane %v3486_v3, %v7398_v10  ;;  %v3501_v50 = vrot.slane %v3487_v48, %v7398_v10 }
 0x850   :  { %v3502_v53 = vcombine.low %v3494_v49, %v3501_v50 }
 0x852   :  { %v3504_v54 = vadd.f32 %v3502_v53, %v3244_v58 }
 0x854   :  { %v4493_v57 = vmul.f32 -1.442695, %v3504_v54  ;;  %v3512_v0 = vrot.slane %v3504_v54, 2  ;;  %v3523_v2 = vrot.slane %v3504_v54, 6  ;;  %v3520_v12 = vrot.slane %v3504_v54, 4 }
 0x856   :  { %5560 = vpow2.f32 %v4493_v57  ;;  %v4494_v1 = vmul.f32 -1.442695, %v3512_v0  ;;  %v4495_v6 = vmul.f32 -1.442695, %v3523_v2 }
 0x858   :  { %5562 = vpow2.f32 %v4494_v1 }
 0x859   :  { %5564 = vpow2.f32 %v4495_v6 }
 0x860   :  { %v5561_v7 = vpop.eup %5560 }
 0x861   :  { %v3508_v59 = vadd.f32 1.0, %v5561_v7 }
 0x862   :  { %v5563_v18 = vpop.eup %5562 }
 0x863   :  { %5566 = vrcp.f32 %v3508_v59  ;;  %v3517_v19 = vadd.f32 1.0, %v5563_v18  ;;  %v5565_v46 = vpop.eup %5564 }
 0x864   :  { %5568 = vtanh.f32 %v3520_v12  ;;  %v3528_v35 = vadd.f32 1.0, %v5565_v46 }
 0x865   :  { %5570 = vrcp.f32 %v3517_v19 }
 0x866   :  { %5572 = vrcp.f32 %v3528_v35 }
 0x86d   :  { %v5567_v20 = vpop.eup %5566 }
 0x86e   :  { %v5569_v34 = vpop.eup %5568 }
 0x86f   :  { %v5571_v58 = vpop.eup %5570  ;;  %v3532_v47 = vmul.f32 %v5569_v34, %v5567_v20 }
 0x870   :  { %v3531_v44 = vmul.f32 0.0, %v5571_v58  ;;  %v5573_v48 = vpop.eup %5572 }
 0x872   :  { %v7422_v3 = vadd.f32 %v3532_v47, %v3531_v44 }
 0x874   :  { %5574 = vtanh.f32 %v7422_v3 }
 0x87e   :  { %v5575_v49 = vpop.eup %5574 }
 0x87f   :  { %v3535_v50 = vmul.f32 %v5575_v49, %v5573_v48 }
 0x881   :  { %3536 = vst [vmem:[%s7541_s18] sm:$0x3] %v3535_v50  ;;  %3603 = vmatmul.mubr.f32.vlgmr.msra.gmra.mrb[20].mxu1 %v3535_v50  ;;  %3674 = vmatmul.mubr.f32.vlgmr.msra.gmra.mrb[12].mxu0 %v3535_v50 }
 0x882   :  { %4889 = vmatpush1.bf16.msra.mxu1 %v7100_v60  ;;  %4921 = vmatpush1.bf16.msra.mxu0 %v7102_v63 }
 0x883   :  { %4891 = vmatprep.subr.bf16.mxu1 %v7110_v4  ;;  %4923 = vmatprep.subr.bf16.mxu0 %v7112_v5 }
 0x884   :  { %3801 = vmatprep.mubr.f32.mxu1 %v5626_v43  ;;  %3872 = vmatprep.mubr.f32.mxu0 %v5626_v43 }
 0x886   :  { %4893 = vmatpush1.bf16.msra.mxu1 %v7136_v14  ;;  %4925 = vmatpush1.bf16.msra.mxu0 %v7138_v15 }
 0x887   :  { %4895 = vmatprep.subr.bf16.mxu1 %v7148_v13  ;;  %4927 = vmatprep.subr.bf16.mxu0 %v7150_v11 }
 0x88a   :  { %4897 = vmatpush1.bf16.msra.mxu1 %v7174_v24  ;;  %4929 = vmatpush1.bf16.msra.mxu0 %v7176_v25 }
 0x88b   :  { %4899 = vmatprep.subr.bf16.mxu1 %v7186_v28  ;;  %4931 = vmatprep.subr.bf16.mxu0 %v7188_v29 }
 0x88e   :  { %4901 = vmatpush1.bf16.msra.mxu1 %v7210_v36  ;;  %4933 = vmatpush1.bf16.msra.mxu0 %v7212_v37 }
 0x88f   :  { %4903 = vmatprep.subr.bf16.mxu1 %v7222_v40  ;;  %4935 = vmatprep.subr.bf16.mxu0 %v7224_v41 }
 0x892   :  { %4905 = vmatpush1.bf16.msra.mxu1 %v7246_v51  ;;  %4937 = vmatpush1.bf16.msra.mxu0 %v7248_v52 }
 0x893   :  { %4907 = vmatprep.subr.bf16.mxu1 %v7258_v55  ;;  %4939 = vmatprep.subr.bf16.mxu0 %v7260_v56 }
 0x896   :  { %4909 = vmatpush1.bf16.msra.mxu1 %v7282_v8  ;;  %4941 = vmatpush1.bf16.msra.mxu0 %v7284_v9 }
 0x897   :  { %4911 = vmatprep.subr.bf16.mxu1 %v7294_v16  ;;  %4943 = vmatprep.subr.bf16.mxu0 %v7296_v17 }
 0x89a   :  { %4913 = vmatpush1.bf16.msra.mxu1 %v7318_v26  ;;  %4945 = vmatpush1.bf16.msra.mxu0 %v7320_v27 }
 0x89b   :  { %4915 = vmatprep.subr.bf16.mxu1 %v7327_v31  ;;  %4947 = vmatprep.subr.bf16.mxu0 %v7329_v32 }
 0x89e   :  { %4917 = vmatpush1.bf16.msra.mxu1 %v7342_v38  ;;  %4949 = vmatpush1.bf16.msra.mxu0 %v7344_v39 }
 0x89f   :  { %4951 = vmatprep.subr.bf16.mxu1 %v7064_v42  ;;  %4983 = vmatprep.subr.bf16.mxu0 %v7069_v45 }
 0x954   :  { %v3604_v53 = vpop.f32.mrb[20].mxu1  ;;  %v3675_v54 = vpop.f32.mrb[12].mxu0 }
 0x955   :  { %v3606_v57 = vpop.f32.mrb[21].mxu1  ;;  %v3677_v0 = vpop.f32.mrb[13].mxu0 }
 0x956   :  { %v3684_v1 = vcombine.low %v3604_v53, %v3606_v57  ;;  %v3685_v2 = vcombine.low %v3675_v54, %v3677_v0 }
 0x958   :  { %v3692_v6 = vrot.slane %v3684_v1, %v7398_v10  ;;  %v3699_v7 = vrot.slane %v3685_v2, %v7398_v10 }
 0x95a   :  { %v3700_v12 = vcombine.low %v3692_v6, %v3699_v7 }
 0x95c   :  { %v3702_v59 = vadd.f32 %v3700_v12, %v3247_v23 }
 0x95e   :  { %v4496_v18 = vmul.f32 -1.442695, %v3702_v59  ;;  %v3710_v19 = vrot.slane %v3702_v59, 2  ;;  %v3721_v45 = vrot.slane %v3702_v59, 6  ;;  %v3718_v34 = vrot.slane %v3702_v59, 4 }
 0x960   :  { %5576 = vpow2.f32 %v4496_v18  ;;  %v4497_v42 = vmul.f32 -1.442695, %v3710_v19  ;;  %v4498_v46 = vmul.f32 -1.442695, %v3721_v45 }
 0x962   :  { %5578 = vpow2.f32 %v4497_v42 }
 0x963   :  { %5580 = vpow2.f32 %v4498_v46 }
 0x96a   :  { %v5577_v20 = vpop.eup %5576 }
 0x96b   :  { %v3706_v58 = vadd.f32 1.0, %v5577_v20 }
 0x96c   :  { %v5579_v35 = vpop.eup %5578 }
 0x96d   :  { %5582 = vrcp.f32 %v3706_v58  ;;  %v3715_v44 = vadd.f32 1.0, %v5579_v35  ;;  %v5581_v47 = vpop.eup %5580 }
 0x96e   :  { %5584 = vtanh.f32 %v3718_v34  ;;  %v3726_v23 = vadd.f32 1.0, %v5581_v47 }
 0x96f   :  { %5586 = vrcp.f32 %v3715_v44 }
 0x970   :  { %5588 = vrcp.f32 %v3726_v23 }
 0x977   :  { %v5583_v48 = vpop.eup %5582 }
 0x978   :  { %v5585_v61 = vpop.eup %5584 }
 0x979   :  { %v5587_v21 = vpop.eup %5586  ;;  %v3730_v50 = vmul.f32 %v5585_v61, %v5583_v48 }
 0x97a   :  { %v3729_v49 = vmul.f32 %v5587_v21, %v7422_v3  ;;  %v5589_v54 = vpop.eup %5588 }
 0x97c   :  { %v7468_v53 = vadd.f32 %v3730_v50, %v3729_v49 }
 0x97e   :  { %5590 = vtanh.f32 %v7468_v53 }
 0x988   :  { %v5591_v57 = vpop.eup %5590 }
 0x989   :  { %v3733_v0 = vmul.f32 %v5591_v57, %v5589_v54 }
 0x98b   :  { %4499 = vst [vmem:[%s7541_s18 + $0x2] sm:$0x3] %v3733_v0  ;;  %3802 = vmatmul.mubr.f32.vlgmr.msra.gmra.mrb[22].mxu1 %v3733_v0  ;;  %3873 = vmatmul.mubr.f32.vlgmr.msra.gmra.mrb[14].mxu0 %v3733_v0 }
 0x98c   :  { %4953 = vmatpush1.bf16.msra.mxu1 %v7100_v60  ;;  %4985 = vmatpush1.bf16.msra.mxu0 %v7102_v63 }
 0x98d   :  { %4955 = vmatprep.subr.bf16.mxu1 %v7110_v4  ;;  %4987 = vmatprep.subr.bf16.mxu0 %v7112_v5 }
 0x98e   :  { %4000 = vmatprep.mubr.f32.mxu1 %v5626_v43  ;;  %4071 = vmatprep.mubr.f32.mxu0 %v5626_v43 }
 0x990   :  { %4957 = vmatpush1.bf16.msra.mxu1 %v7136_v14  ;;  %4989 = vmatpush1.bf16.msra.mxu0 %v7138_v15 }
 0x991   :  { %4959 = vmatprep.subr.bf16.mxu1 %v7148_v13  ;;  %4991 = vmatprep.subr.bf16.mxu0 %v7150_v11 }
 0x994   :  { %4961 = vmatpush1.bf16.msra.mxu1 %v7174_v24  ;;  %4993 = vmatpush1.bf16.msra.mxu0 %v7176_v25 }
 0x995   :  { %4963 = vmatprep.subr.bf16.mxu1 %v7186_v28  ;;  %4995 = vmatprep.subr.bf16.mxu0 %v7188_v29 }
 0x998   :  { %4965 = vmatpush1.bf16.msra.mxu1 %v7210_v36  ;;  %4997 = vmatpush1.bf16.msra.mxu0 %v7212_v37 }
 0x999   :  { %4967 = vmatprep.subr.bf16.mxu1 %v7222_v40  ;;  %4999 = vmatprep.subr.bf16.mxu0 %v7224_v41 }
 0x99c   :  { %4969 = vmatpush1.bf16.msra.mxu1 %v7246_v51  ;;  %5001 = vmatpush1.bf16.msra.mxu0 %v7248_v52 }
 0x99d   :  { %4971 = vmatprep.subr.bf16.mxu1 %v7258_v55  ;;  %5003 = vmatprep.subr.bf16.mxu0 %v7260_v56 }
 0x9a0   :  { %4973 = vmatpush1.bf16.msra.mxu1 %v7282_v8  ;;  %5005 = vmatpush1.bf16.msra.mxu0 %v7284_v9 }
 0x9a1   :  { %4975 = vmatprep.subr.bf16.mxu1 %v7294_v16  ;;  %5007 = vmatprep.subr.bf16.mxu0 %v7296_v17 }
 0x9a4   :  { %4977 = vmatpush1.bf16.msra.mxu1 %v7318_v26  ;;  %5009 = vmatpush1.bf16.msra.mxu0 %v7320_v27 }
 0x9a5   :  { %4979 = vmatprep.subr.bf16.mxu1 %v7327_v31  ;;  %5011 = vmatprep.subr.bf16.mxu0 %v7329_v32 }
 0x9a8   :  { %4981 = vmatpush1.bf16.msra.mxu1 %v7342_v38  ;;  %5013 = vmatpush1.bf16.msra.mxu0 %v7344_v39 }
 0xa5e   :  { %v3803_v43 = vpop.f32.mrb[22].mxu1  ;;  %v3874_v60 = vpop.f32.mrb[14].mxu0 }
 0xa5f   :  { %v3805_v63 = vpop.f32.mrb[23].mxu1  ;;  %v3876_v4 = vpop.f32.mrb[15].mxu0 }
 0xa60   :  { %v3883_v5 = vcombine.low %v3803_v43, %v3805_v63  ;;  %v3884_v14 = vcombine.low %v3874_v60, %v3876_v4 }
 0xa62   :  { %v3891_v15 = vrot.slane %v3883_v5, %v7398_v10  ;;  %v3898_v13 = vrot.slane %v3884_v14, %v7398_v10 }
 0xa64   :  { %v3899_v11 = vcombine.low %v3891_v15, %v3898_v13 }
 0xa66   :  { %v3901_v24 = vadd.f32 %v3899_v11, %v3267_v30 }
 0xa68   :  { %v4500_v25 = vmul.f32 -1.442695, %v3901_v24  ;;  %v3909_v28 = vrot.slane %v3901_v24, 2  ;;  %v3920_v36 = vrot.slane %v3901_v24, 6  ;;  %v3917_v41 = vrot.slane %v3901_v24, 4 }
 0xa6a   :  { %5592 = vpow2.f32 %v4500_v25  ;;  %v4501_v29 = vmul.f32 -1.442695, %v3909_v28  ;;  %v4502_v37 = vmul.f32 -1.442695, %v3920_v36 }
 0xa6c   :  { %5594 = vpow2.f32 %v4501_v29 }
 0xa6d   :  { %5596 = vpow2.f32 %v4502_v37 }
 0xa74   :  { %v5593_v40 = vpop.eup %5592 }
 0xa75   :  { %v3905_v51 = vadd.f32 1.0, %v5593_v40 }
 0xa76   :  { %v5595_v52 = vpop.eup %5594 }
 0xa77   :  { %5598 = vrcp.f32 %v3905_v51  ;;  %v3914_v55 = vadd.f32 1.0, %v5595_v52  ;;  %v5597_v56 = vpop.eup %5596 }
 0xa78   :  { %5600 = vtanh.f32 %v3917_v41  ;;  %v3925_v17 = vadd.f32 1.0, %v5597_v56 }
 0xa79   :  { %5602 = vrcp.f32 %v3914_v55 }
 0xa7a   :  { %5604 = vrcp.f32 %v3925_v17 }
 0xa81   :  { %v5599_v8 = vpop.eup %5598 }
 0xa82   :  { %v5601_v9 = vpop.eup %5600 }
 0xa83   :  { %v5603_v16 = vpop.eup %5602  ;;  %v3929_v27 = vmul.f32 %v5601_v9, %v5599_v8 }
 0xa84   :  { %v3928_v26 = vmul.f32 %v5603_v16, %v7468_v53  ;;  %v5605_v32 = vpop.eup %5604 }
 0xa86   :  { %v3930_v31 = vadd.f32 %v3929_v27, %v3928_v26 }
 0xa88   :  { %5606 = vtanh.f32 %v3930_v31 }
 0xa92   :  { %v5607_v38 = vpop.eup %5606 }
 0xa93   :  { %v3932_v39 = vmul.f32 %v5607_v38, %v5605_v32 }
 0xa95   :  { %4503 = vst [vmem:[%s7541_s18 + $0x4] sm:$0x3] %v3932_v39  ;;  %4001 = vmatmul.mubr.f32.vlgmr.msra.gmra.mrb[24].mxu1 %v3932_v39  ;;  %4072 = vmatmul.mubr.f32.vlgmr.msra.gmra.mrb[16].mxu0 %v3932_v39 }
 0xb68   :  { %v4002_v30 = vpop.f32.mrb[24].mxu1  ;;  %v4073_v3 = vpop.f32.mrb[16].mxu0 }
 0xb69   :  { %v4004_v1 = vpop.f32.mrb[25].mxu1  ;;  %v4075_v2 = vpop.f32.mrb[17].mxu0 }
 0xb6a   :  { %v4082_v6 = vcombine.low %v4002_v30, %v4004_v1  ;;  %v4083_v7 = vcombine.low %v4073_v3, %v4075_v2 }
 0xb6c   :  { %v4090_v12 = vrot.slane %v4082_v6, %v7398_v10  ;;  %v4097_v59 = vrot.slane %v4083_v7, %v7398_v10 }
 0xb6e   :  { %v4098_v18 = vcombine.low %v4090_v12, %v4097_v59 }
 0xb70   :  { %v4100_v19 = vadd.f32 %v4098_v18, %v3271_v33 }
 0xb72   :  { %v4504_v42 = vmul.f32 -1.442695, %v4100_v19  ;;  %v4108_v45 = vrot.slane %v4100_v19, 2  ;;  %v4119_v20 = vrot.slane %v4100_v19, 6  ;;  %v4116_v35 = vrot.slane %v4100_v19, 4 }
 0xb74   :  { %5608 = vpow2.f32 %v4504_v42  ;;  %v4505_v46 = vmul.f32 -1.442695, %v4108_v45  ;;  %v4506_v34 = vmul.f32 -1.442695, %v4119_v20 }
 0xb76   :  { %5610 = vpow2.f32 %v4505_v46 }
 0xb77   :  { %5612 = vpow2.f32 %v4506_v34 }
 0xb7e   :  { %v5609_v58 = vpop.eup %5608 }
 0xb7f   :  { %v4104_v44 = vadd.f32 1.0, %v5609_v58 }
 0xb80   :  { %v5611_v47 = vpop.eup %5610 }
 0xb81   :  { %5614 = vrcp.f32 %v4104_v44  ;;  %v4113_v48 = vadd.f32 1.0, %v5611_v47  ;;  %v5613_v10 = vpop.eup %5612 }
 0xb82   :  { %5616 = vtanh.f32 %v4116_v35  ;;  %v4124_v33 = vadd.f32 1.0, %v5613_v10 }
 0xb83   :  { %5618 = vrcp.f32 %v4113_v48 }
 0xb84   :  { %5620 = vrcp.f32 %v4124_v33 }
 0xb8b   :  { %v5615_v61 = vpop.eup %5614 }
 0xb8c   :  { %v5617_v62 = vpop.eup %5616 }
 0xb8d   :  { %v5619_v22 = vpop.eup %5618  ;;  %v4128_v23 = vmul.f32 %v5617_v62, %v5615_v61 }
 0xb8e   :  { %v4127_v21 = vmul.f32 %v5619_v22, %v3930_v31  ;;  %v5621_v50 = vpop.eup %5620 }
 0xb90   :  { %v4129_v49 = vadd.f32 %v4128_v23, %v4127_v21 }
 0xb92   :  { %5622 = vtanh.f32 %v4129_v49 }
 0xb9c   :  { %v5623_v53 = vpop.eup %5622 }
 0xb9d   :  { %v4131_v54 = vmul.f32 %v5623_v53, %v5621_v50 }
 0xb9f   :  { %4507 = vst [vmem:[%s7541_s18 + $0x6] sm:$0x3] %v4131_v54 }

</bundles_post_ra>
